<compile_context>
chip_gen: v6e
topology: v6e:2x2x1
jax: 0.10.0
libtpu: 0.0.40
codegen_flags: <defaults>
</compile_context>

<pallas_src>
import functools
import math

import jax
import jax.numpy as jnp
from jax.experimental import pallas as pl
from jax.experimental.pallas import tpu as pltpu


# ----------------------------- Pallas kernels -----------------------------

def _encoder_kernel(*refs, heads, tokens):
    """Fused Swin-block stand-in encoder: tokens -> latent code, one batch item."""
    xp_ref = refs[0]
    (pe_w, pe_b, pe_g, pe_bn,
     ln1_g, ln1_b, wq, bq, wk, bk, wv, bv, proj_w, proj_b,
     ln2_g, ln2_b, fc1_w, fc1_b, fc2_w, fc2_b,
     lnf_g, lnf_b, head_w, head_b, hmask_ref) = refs[1:26]
    o_ref = refs[26]

    def mm(x, w_ref):
        w = w_ref[...]
        return jnp.dot(x.astype(w.dtype), w, preferred_element_type=jnp.float32)

    def ln(x, g_ref, b_ref):
        # single-pass layer norm: var = E[x^2] - mu^2
        mu = jnp.mean(x, axis=-1, keepdims=True)
        var = jnp.mean(x * x, axis=-1, keepdims=True) - mu * mu
        return (x - mu) * jax.lax.rsqrt(var + 1e-5) * g_ref[...] + b_ref[...]

    T = tokens

    # patch embedding + patch_norm
    t = ln(mm(xp_ref[0], pe_w) + pe_b[...], pe_g, pe_bn)          # (T, E)

    # transformer block (Swin window-attention stand-in): block-diagonal attention + MLP
    h = ln(t, ln1_g, ln1_b)
    q = mm(h, wq) + bq[...]                                       # scale folded into wq/bq
    k = mm(h, wk) + bk[...]
    v = mm(h, wv) + bv[...]

    mask = hmask_ref[...]                                         # (heads*T, E) block-diag mask
    qs = jnp.concatenate([q] * heads, axis=0) * mask              # (heads*T, E), zeroed off-head cols
    # one contraction (single implicit K transpose); rows are (head, query) pairs
    s = jax.lax.dot_general(qs, k, (((1,), (1,)), ((), ())),
                            preferred_element_type=jnp.float32)   # (heads*T, T)
    m = jnp.max(s, axis=-1, keepdims=True)                        # ONE softmax for all heads
    e = jnp.exp(s - m)
    p = e * pl.reciprocal(jnp.sum(e, axis=-1, keepdims=True), approx=True)
    o_st = jnp.dot(p, v, preferred_element_type=jnp.float32) * mask   # (heads*T, E)
    a = o_st[0:T]
    for hh in range(1, heads):                                    # 3 sublane-block adds, no concat
        a = a + o_st[hh * T:(hh + 1) * T]
    t = t + mm(a, proj_w) + proj_b[...]

    h = ln(t, ln2_g, ln2_b)
    # TODO(synk): PyTorch Swin uses exact (erf) GELU; tanh approximation used here.
    h = jax.nn.gelu(mm(h, fc1_w) + fc1_b[...], approximate=True)
    t = t + mm(h, fc2_w) + fc2_b[...]

    t = ln(t, lnf_g, lnf_b)
    pooled = jnp.mean(t, axis=0, keepdims=True)                   # avgpool over tokens (1, E)
    o_ref[0] = mm(pooled, head_w) + head_b[...]                   # (1, 2F)


def _decoder_kernel(*refs, n_film, R, S, deltas):
    """Fused FiLM-SIREN decoder + per-ray volume renderer, one batch item.

    Points are ordered step-major: rows [s*R:(s+1)*R] are sample step s of all R rays,
    so the exclusive transmittance is a running sum over S static sublane blocks.
    """
    pts_ref, freq_ref, shift_ref = refs[0], refs[1], refs[2]
    film_refs = refs[3:3 + 2 * n_film]
    wc_ref, bc_ref, wht_ref, whb_ref, bh_ref = refs[3 + 2 * n_film:8 + 2 * n_film]
    o_ref = refs[8 + 2 * n_film]

    def mm(x, w_ref):
        w = w_ref[...]
        return jnp.dot(x.astype(w.dtype), w, preferred_element_type=jnp.float32)

    fr = freq_ref[0] * 15.0 + 30.0                        # (n_film+1, Hs)
    ph = shift_ref[0]                                     # (n_film+1, Hs)

    # FiLM-SIREN trunk; activations stay VMEM/vreg resident (never written to HBM)
    h = pts_ref[0]                                        # (P, 8), xyz zero-padded
    for li in range(n_film):
        y = mm(h, film_refs[2 * li]) + film_refs[2 * li + 1][...]
        h = jnp.sin(fr[li:li + 1, :] * y + ph[li:li + 1, :])

    # color-sine FiLM layer; fixed view dir (lock_view_dependence) folded into bias
    yc = mm(h, wc_ref) + bc_ref[...]
    hc = jnp.sin(fr[n_film:n_film + 1, :] * yc + ph[n_film:n_film + 1, :])

    # split sigma/rgb head (no h|hc lane concat): col 0 = sigma, cols 1:4 = rgb logits
    head = mm(h, wht_ref) + mm(hc, whb_ref) + bh_ref[...]         # (P, 8)
    rgb = jax.nn.sigmoid(head)                                    # cols 1:4 valid

    # pi-GAN fancy_integration (relu clamp, no noise, delta_inf on last sample):
    # running exclusive transmittance over S step blocks + fused weighted pixel sum.
    # TODO(synk): last_back / white_back handling omitted (reference default path only).
    acc = jnp.zeros((R, 8), jnp.float32)
    cum = jnp.zeros((R, 1), jnp.float32)
    for s in range(S):                                    # S=6, fully unrolled
        lo = s * R
        sig = jnp.maximum(head[lo:lo + R, 0:1], 0.0)      # (R, 1) relu clamp
        alpha = 1.0 - jnp.exp(-deltas[s] * sig)
        w = alpha * jnp.exp(cum)                          # weight = alpha * T_exclusive
        acc = acc + w * rgb[lo:lo + R, :]
        cum = cum + jnp.log(1.0 - alpha + 1e-10)
    o_ref[0] = acc * 2.0 - 1.0                            # rgb in cols 1:4, scaled to [-1, 1]


def _mapping_kernel(z_ref, *refs):
    """Fused pi-GAN mapping network + mean over z (latent_avg), init-time only."""
    o_ref = refs[-1]
    wb = refs[:-1]
    h = z_ref[...]
    n_layers = len(wb) // 2
    for i in range(n_layers):
        h = jnp.dot(h, wb[2 * i][...], preferred_element_type=jnp.float32) + wb[2 * i + 1][...]
        if i < n_layers - 1:
            h = jnp.where(h > 0.0, h, 0.2 * h)            # leaky_relu(0.2)
    o_ref[...] = jnp.mean(h, axis=0, keepdims=True)       # (1, 2F)


# --------------------------------- model ---------------------------------

class Sem2NeRFPallas:
    def __init__(self, key, *, in_chans=3, img_size=16, patch=4, embed=32,
                 heads=4, mlp_ratio=4, siren_hidden=32, n_film=3,
                 z_dim=32, map_hidden=64, n_avg=1024,
                 img_out=8, num_steps=6, fov_deg=30.0,
                 ray_start=0.7, ray_end=1.3):
        self.patch, self.embed, self.heads = patch, embed, heads
        self.siren_hidden, self.n_film = siren_hidden, n_film
        self.img_out, self.num_steps = img_out, num_steps
        self.fov_deg, self.ray_start, self.ray_end = fov_deg, ray_start, ray_end
        self.F = siren_hidden * (n_film + 1)       # frequency / phase-shift dim
        self.tokens = (img_size // patch) ** 2

        keys = iter(jax.random.split(key, 64))

        def lin(fan_in, fan_out):
            k1, k2 = jax.random.split(next(keys))
            lim = 1.0 / math.sqrt(fan_in)
            w = jax.random.uniform(k1, (fan_in, fan_out), jnp.float32, -lim, lim)
            b = jax.random.uniform(k2, (fan_out,), jnp.float32, -lim, lim)
            return w, b

        bf16 = jnp.bfloat16
        E = embed
        T = self.tokens

        # --- encoder (Swin-tiny stand-in) ---
        # TODO(synk): full Swin-T (4 stages, shifted 7x7 windows, relative position
        # bias, patch merging) not reproduced; one fused attention+MLP block instead.
        pe_w, pe_b = lin(in_chans * patch * patch, E)
        wq, bq = lin(E, E)
        wk, bk = lin(E, E)
        wv, bv = lin(E, E)
        scale = 1.0 / math.sqrt(E // heads)
        wq, bq = wq * scale, bq * scale                    # fold attention scale into q proj
        proj_w, proj_b = lin(E, E)
        fc1_w, fc1_b = lin(E, mlp_ratio * E)
        fc2_w, fc2_b = lin(mlp_ratio * E, E)
        head_w, head_b = lin(E, 2 * self.F)
        ones = jnp.ones((1, E), jnp.float32)
        zeros = jnp.zeros((1, E), jnp.float32)
        # precomputed block-diagonal head mask: (heads*T, E)
        hd = E // heads
        col_head = jnp.arange(E, dtype=jnp.int32) // hd
        row_head = jnp.arange(heads * T, dtype=jnp.int32) // T
        hmask = (row_head[:, None] == col_head[None, :]).astype(jnp.float32)
        self.enc_weights = [
            pe_w.astype(bf16), pe_b.reshape(1, -1), ones, zeros,        # patch embed + patch_norm
            ones, zeros,                                                # ln1
            wq.astype(bf16), bq.reshape(1, -1),
            wk.astype(bf16), bk.reshape(1, -1),
            wv.astype(bf16), bv.reshape(1, -1),
            proj_w.astype(bf16), proj_b.reshape(1, -1),
            ones, zeros,                                                # ln2
            fc1_w.astype(bf16), fc1_b.reshape(1, -1),
            fc2_w.astype(bf16), fc2_b.reshape(1, -1),
            ones, zeros,                                                # final ln
            head_w.astype(bf16), head_b.reshape(1, -1),
            hmask,
        ]

        # --- SIREN decoder (TALLSIREN-style) ---
        Hs = siren_hidden
        dec = []
        w0, b0 = lin(3, Hs)
        w0p = jnp.zeros((8, Hs), jnp.float32).at[:3].set(w0)            # pad xyz -> 8
        dec += [w0p.astype(bf16), b0.reshape(1, -1)]
        for _ in range(n_film - 1):
            w, b = lin(Hs, Hs)
            dec += [w.astype(bf16), b.reshape(1, -1)]
        sig_w, sig_b = lin(Hs, 1)
        cs_w, cs_b = lin(3 + Hs, Hs)
        col_w, col_b = lin(Hs, 3)
        # lock_view_dependence=True: ray_dir fixed at (0,0,-1) -> fold into bias
        cs_b_eff = cs_b - cs_w[2]
        dec += [cs_w[3:].astype(bf16), cs_b_eff.reshape(1, -1)]
        # split sigma/rgb head: h @ wh_top + hc @ wh_bot (col 0 sigma, cols 1:4 rgb)
        wh_top = jnp.zeros((Hs, 8), jnp.float32).at[:, 0].set(sig_w[:, 0])
        wh_bot = jnp.zeros((Hs, 8), jnp.float32).at[:, 1:4].set(col_w)
        bh = jnp.zeros((8,), jnp.float32).at[0].set(sig_b[0]).at[1:4].set(col_b)
        dec += [wh_top.astype(bf16), wh_bot.astype(bf16), bh.reshape(1, -1)]
        self.dec_weights = dec

        # --- latent_avg: mean mapping-network output over random z (single fused kernel) ---
        map_params = [lin(z_dim, map_hidden), lin(map_hidden, map_hidden),
                      lin(map_hidden, map_hidden), lin(map_hidden, 2 * self.F)]
        z = jax.random.normal(next(keys), (n_avg, z_dim), jnp.float32)
        map_args = []
        for w, b in map_params:
            map_args += [w, b.reshape(1, -1)]
        avg = pl.pallas_call(
            _mapping_kernel,
            out_shape=jax.ShapeDtypeStruct((1, 2 * self.F), jnp.float32),
        )(z, *map_args)
        self.latent_avg = (avg[:, :self.F], avg[:, self.F:])

    # ------------------------------ encoder ------------------------------
    def encode(self, x):
        B, C, H, W = x.shape
        p = self.patch
        # TODO(synk): patchify kept as XLA glue; fold into the kernel before scaling image size.
        xp = x.reshape(B, C, H // p, p, W // p, p)
        xp = xp.transpose(0, 2, 4, 1, 3, 5).reshape(B, (H // p) * (W // p), C * p * p)
        T, Cpp = xp.shape[1], xp.shape[2]

        in_specs = [pl.BlockSpec((1, T, Cpp), lambda i: (i, 0, 0))]
        in_specs += [pl.BlockSpec(w.shape, lambda i: (0, 0)) for w in self.enc_weights]
        code = pl.pallas_call(
            functools.partial(_encoder_kernel, heads=self.heads, tokens=T),
            grid=(B,),
            in_specs=in_specs,
            out_specs=pl.BlockSpec((1, 1, 2 * self.F), lambda i: (i, 0, 0)),
            out_shape=jax.ShapeDtypeStruct((B, 1, 2 * self.F), jnp.float32),
            compiler_params=pltpu.CompilerParams(dimension_semantics=("parallel",)),
        )(xp, *self.enc_weights)[:, 0]
        return code[:, :self.F], code[:, self.F:]            # (freq, shift)

    # ------------------------------ decoder ------------------------------
    def decode(self, freq, shift, pose):
        B = freq.shape[0]
        R = self.img_out * self.img_out
        S = self.num_steps
        P = R * S
        Hs = self.siren_hidden
        nfp1 = self.n_film + 1

        # --- rays in camera space (trace-time constants), step-major layout (S, R, 3) ---
        lin_px = (jnp.arange(self.img_out, dtype=jnp.float32) + 0.5) / self.img_out * 2 - 1
        xg, yg = jnp.meshgrid(lin_px, -lin_px, indexing="xy")
        tanf = math.tan(math.radians(self.fov_deg) / 2)
        dirs = jnp.stack([xg * tanf, yg * tanf, -jnp.ones_like(xg)], -1).reshape(R, 3)
        dirs = dirs / jnp.linalg.norm(dirs, axis=-1, keepdims=True)
        tvals = jnp.linspace(self.ray_start, self.ray_end, S, dtype=jnp.float32)
        # TODO(synk): stratified z-perturbation and hierarchical (fine) resampling skipped.
        pts_cam = tvals[:, None, None] * dirs[None, :, :]         # (S, R, 3), step-major

        # --- camera-to-world from pose = (pitch, yaw) on unit sphere ---
        pitch, yaw = pose[:, 0], pose[:, 1]
        origin = jnp.stack([jnp.sin(pitch) * jnp.cos(yaw),
                            jnp.cos(pitch),
                            jnp.sin(pitch) * jnp.sin(yaw)], -1)   # (B, 3)
        fwd = -origin / jnp.linalg.norm(origin, axis=-1, keepdims=True)
        up = jnp.broadcast_to(jnp.array([0.0, 1.0, 0.0], jnp.float32), fwd.shape)
        right = jnp.cross(up, fwd)
        right = right / jnp.linalg.norm(right, axis=-1, keepdims=True)
        up2 = jnp.cross(fwd, right)
        rot = jnp.stack([right, up2, -fwd], axis=-1)              # (B, 3, 3)
        pts = jnp.einsum("bij,srj->bsri", rot, pts_cam) + origin[:, None, None, :]
        pts = pts.reshape(B, P, 3)
        pts = jnp.pad(pts, ((0, 0), (0, 0), (0, 5)))              # xyz zero-padded to 8 feats

        # per-step deltas; pi-GAN fancy_integration appends delta_inf (1e10) for the last sample
        zv = [self.ray_start + (self.ray_end - self.ray_start) * s / (S - 1) for s in range(S)]
        deltas = tuple(zv[s + 1] - zv[s] for s in range(S - 1)) + (1e10,)

        F = self.F
        in_specs = [
            pl.BlockSpec((1, P, 8), lambda i: (i, 0, 0)),
            pl.BlockSpec((1, nfp1, Hs), lambda i: (i, 0, 0)),
            pl.BlockSpec((1, nfp1, Hs), lambda i: (i, 0, 0)),
        ]
        in_specs += [pl.BlockSpec(w.shape, lambda i: (0, 0)) for w in self.dec_weights]

        out8 = pl.pallas_call(
            functools.partial(_decoder_kernel, n_film=self.n_film, R=R, S=S, deltas=deltas),
            grid=(B,),
            in_specs=in_specs,
            out_specs=pl.BlockSpec((1, R, 8), lambda i: (i, 0, 0)),
            out_shape=jax.ShapeDtypeStruct((B, R, 8), jnp.float32),
            compiler_params=pltpu.CompilerParams(dimension_semantics=("parallel",)),
        )(pts, freq.reshape(B, nfp1, Hs), shift.reshape(B, nfp1, Hs), *self.dec_weights)

        # pixels already scaled to [-1, 1] in-kernel; rgb lives in cols 1:4 of the 8-lane slab
        pixels = out8[:, :, 1:4]
        return pixels.reshape(B, self.img_out, self.img_out, 3).transpose(0, 3, 1, 2)

    # ------------------------------ forward ------------------------------
    def forward(self, x, pose, return_latents=False):
        freq, shift = self.encode(x)
        # start_from_latent_avg=True: codes = enc_codes + latent_avg
        codes = (freq + self.latent_avg[0], shift + self.latent_avg[1])
        images = self.decode(codes[0], codes[1], pose)
        out = {"images": images}
        if return_latents:
            out["latents"] = (codes,
                              (jnp.tile(self.latent_avg[0], (freq.shape[0], 1)),
                               jnp.tile(self.latent_avg[1], (shift.shape[0], 1))))
        return out


# ---------------------------------- main ----------------------------------

if __name__ == "__main__":
    key = jax.random.PRNGKey(0)
    k_params, k_x, k_pose = jax.random.split(key, 3)

    model = Sem2NeRFPallas(k_params)

    x = jax.random.normal(k_x, (2, 3, 16, 16), jnp.float32)        # NCHW semantic input
    k1, k2 = jax.random.split(k_pose)
    pitch = jax.random.uniform(k1, (2,), jnp.float32, 0.6, 2.5)
    yaw = jax.random.uniform(k2, (2,), jnp.float32, 0.0, 6.28)
    pose = jnp.stack([pitch, yaw], axis=-1)                        # (B, 2)

    out = model.forward(x, pose, return_latents=True)
    jax.block_until_ready(out["images"])
    assert out["images"].shape == (2, 3, 8, 8)
    assert out["latents"][0][0].shape == (2, model.F)
    print("KERNEL_OK")
</pallas_src>

<mosaic_0001>
module attributes {stable_mosaic.version = 11 : i64} {
  func.func @_mapping_kernel(%arg0: memref<1024x32xf32, #tpu.memory_space<vmem>>, %arg1: memref<32x64xf32, #tpu.memory_space<vmem>>, %arg2: memref<1x64xf32, #tpu.memory_space<vmem>>, %arg3: memref<64x64xf32, #tpu.memory_space<vmem>>, %arg4: memref<1x64xf32, #tpu.memory_space<vmem>>, %arg5: memref<64x64xf32, #tpu.memory_space<vmem>>, %arg6: memref<1x64xf32, #tpu.memory_space<vmem>>, %arg7: memref<64x256xf32, #tpu.memory_space<vmem>>, %arg8: memref<1x256xf32, #tpu.memory_space<vmem>>, %arg9: memref<1x256xf32, #tpu.memory_space<vmem>>) attributes {dimension_semantics = [], scalar_prefetch = 0 : i64, scratch_operands = 0 : i64, tpu.core_type = #tpu.core_type<tc>} {
    %c0 = arith.constant 0 : index
    %c0_0 = arith.constant 0 : index
    %0 = vector.load %arg0[%c0, %c0_0] : memref<1024x32xf32, #tpu.memory_space<vmem>>, vector<1024x32xf32>
    %c0_1 = arith.constant 0 : index
    %c0_2 = arith.constant 0 : index
    %1 = vector.load %arg1[%c0_1, %c0_2] : memref<32x64xf32, #tpu.memory_space<vmem>>, vector<32x64xf32>
    %cst = arith.constant dense<0.000000e+00> : vector<1024x64xf32>
    %2 = tpu.matmul %0, %1, %cst {dimension_numbers = #tpu.dot_dimension_numbers<[1], [0], [0], [1], [0, 0, 1, 1], [], []>} : vector<1024x32xf32>, vector<32x64xf32>, vector<1024x64xf32> -> vector<1024x64xf32>
    %c0_3 = arith.constant 0 : index
    %c0_4 = arith.constant 0 : index
    %3 = vector.load %arg2[%c0_3, %c0_4] : memref<1x64xf32, #tpu.memory_space<vmem>>, vector<1x64xf32>
    %4 = vector.broadcast %3 : vector<1x64xf32> to vector<1024x64xf32>
    %5 = arith.addf %2, %4 : vector<1024x64xf32>
    %cst_5 = arith.constant 0.000000e+00 : f32
    %6 = vector.broadcast %cst_5 : f32 to vector<1024x64xf32>
    %7 = arith.cmpf ogt, %5, %6 : vector<1024x64xf32>
    %cst_6 = arith.constant 2.000000e-01 : f32
    %8 = vector.broadcast %cst_6 : f32 to vector<1024x64xf32>
    %9 = arith.mulf %8, %5 : vector<1024x64xf32>
    %10 = arith.select %7, %5, %9 : vector<1024x64xi1>, vector<1024x64xf32>
    %c0_7 = arith.constant 0 : index
    %c0_8 = arith.constant 0 : index
    %11 = vector.load %arg3[%c0_7, %c0_8] : memref<64x64xf32, #tpu.memory_space<vmem>>, vector<64x64xf32>
    %cst_9 = arith.constant dense<0.000000e+00> : vector<1024x64xf32>
    %12 = tpu.matmul %10, %11, %cst_9 {dimension_numbers = #tpu.dot_dimension_numbers<[1], [0], [0], [1], [0, 0, 1, 1], [], []>} : vector<1024x64xf32>, vector<64x64xf32>, vector<1024x64xf32> -> vector<1024x64xf32>
    %c0_10 = arith.constant 0 : index
    %c0_11 = arith.constant 0 : index
    %13 = vector.load %arg4[%c0_10, %c0_11] : memref<1x64xf32, #tpu.memory_space<vmem>>, vector<1x64xf32>
    %14 = vector.broadcast %13 : vector<1x64xf32> to vector<1024x64xf32>
    %15 = arith.addf %12, %14 : vector<1024x64xf32>
    %cst_12 = arith.constant 0.000000e+00 : f32
    %16 = vector.broadcast %cst_12 : f32 to vector<1024x64xf32>
    %17 = arith.cmpf ogt, %15, %16 : vector<1024x64xf32>
    %cst_13 = arith.constant 2.000000e-01 : f32
    %18 = vector.broadcast %cst_13 : f32 to vector<1024x64xf32>
    %19 = arith.mulf %18, %15 : vector<1024x64xf32>
    %20 = arith.select %17, %15, %19 : vector<1024x64xi1>, vector<1024x64xf32>
    %c0_14 = arith.constant 0 : index
    %c0_15 = arith.constant 0 : index
    %21 = vector.load %arg5[%c0_14, %c0_15] : memref<64x64xf32, #tpu.memory_space<vmem>>, vector<64x64xf32>
    %cst_16 = arith.constant dense<0.000000e+00> : vector<1024x64xf32>
    %22 = tpu.matmul %20, %21, %cst_16 {dimension_numbers = #tpu.dot_dimension_numbers<[1], [0], [0], [1], [0, 0, 1, 1], [], []>} : vector<1024x64xf32>, vector<64x64xf32>, vector<1024x64xf32> -> vector<1024x64xf32>
    %c0_17 = arith.constant 0 : index
    %c0_18 = arith.constant 0 : index
    %23 = vector.load %arg6[%c0_17, %c0_18] : memref<1x64xf32, #tpu.memory_space<vmem>>, vector<1x64xf32>
    %24 = vector.broadcast %23 : vector<1x64xf32> to vector<1024x64xf32>
    %25 = arith.addf %22, %24 : vector<1024x64xf32>
    %cst_19 = arith.constant 0.000000e+00 : f32
    %26 = vector.broadcast %cst_19 : f32 to vector<1024x64xf32>
    %27 = arith.cmpf ogt, %25, %26 : vector<1024x64xf32>
    %cst_20 = arith.constant 2.000000e-01 : f32
    %28 = vector.broadcast %cst_20 : f32 to vector<1024x64xf32>
    %29 = arith.mulf %28, %25 : vector<1024x64xf32>
    %30 = arith.select %27, %25, %29 : vector<1024x64xi1>, vector<1024x64xf32>
    %c0_21 = arith.constant 0 : index
    %c0_22 = arith.constant 0 : index
    %31 = vector.load %arg7[%c0_21, %c0_22] : memref<64x256xf32, #tpu.memory_space<vmem>>, vector<64x256xf32>
    %cst_23 = arith.constant dense<0.000000e+00> : vector<1024x256xf32>
    %32 = tpu.matmul %30, %31, %cst_23 {dimension_numbers = #tpu.dot_dimension_numbers<[1], [0], [0], [1], [0, 0, 1, 1], [], []>} : vector<1024x64xf32>, vector<64x256xf32>, vector<1024x256xf32> -> vector<1024x256xf32>
    %c0_24 = arith.constant 0 : index
    %c0_25 = arith.constant 0 : index
    %33 = vector.load %arg8[%c0_24, %c0_25] : memref<1x256xf32, #tpu.memory_space<vmem>>, vector<1x256xf32>
    %34 = vector.broadcast %33 : vector<1x256xf32> to vector<1024x256xf32>
    %35 = arith.addf %32, %34 : vector<1024x256xf32>
    %cst_26 = arith.constant dense<0.000000e+00> : vector<256xf32>
    %36 = vector.multi_reduction <add>, %35, %cst_26 [0] : vector<1024x256xf32> to vector<256xf32>
    %37 = vector.shape_cast %36 : vector<256xf32> to vector<1x256xf32>
    %cst_27 = arith.constant 1.024000e+03 : f32
    %38 = vector.broadcast %cst_27 : f32 to vector<1x256xf32>
    %39 = arith.divf %37, %38 : vector<1x256xf32>
    %c0_28 = arith.constant 0 : index
    %c0_29 = arith.constant 0 : index
    %40 = vector.load %arg9[%c0_28, %c0_29] : memref<1x256xf32, #tpu.memory_space<vmem>>, vector<1x256xf32>
    tpu.vector_store %arg9[%c0_28, %c0_29], %39 {strides = array<i32>} : memref<1x256xf32, #tpu.memory_space<vmem>>, vector<1x256xf32>,
    return
  }
}

</mosaic_0001>

<bundles_post_ra>
// kernel: tpu_custom_call.1
= control target key start
LH: loop header
LB: loop body
LE: loop exit
PB: predicated region body
PF: predicated region fallthrough
CT: control target
= control target key end

     0   :  { %vm172_vm0 = vcmask 261120   ;;  %s10073_s0 = inlined_call_operand.vmem [shape: f32[1024,32], index: 0, kind: input, shape index: {}]   ;;  %s10074_s1 = inlined_call_operand.vmem [shape: f32[32,64], index: 1, kind: input, shape index: {}]   ;;  %s10075_s2 = inlined_call_operand.vmem [shape: f32[1,64], index: 2, kind: input, shape index: {}]   ;;  %s10076_s3 = inlined_call_operand.vmem [shape: f32[64,64], index: 3, kind: input, shape index: {}]   ;;  %s10077_s4 = inlined_call_operand.vmem [shape: f32[1,64], index: 4, kind: input, shape index: {}]   ;;  %s10078_s5 = inlined_call_operand.vmem [shape: f32[64,64], index: 5, kind: input, shape index: {}]   ;;  %s10079_s6 = inlined_call_operand.vmem [shape: f32[1,64], index: 6, kind: input, shape index: {}]   ;;  %s10080_s7 = inlined_call_operand.vmem [shape: f32[64,256], index: 7, kind: input, shape index: {}]   ;;  %s10081_s8 = inlined_call_operand.vmem [shape: f32[1,256], index: 8, kind: input, shape index: {}]   ;;  %s10082_s9 = inlined_call_operand.hbm [shape: f32[1,256], index: 9, kind: output, shape index: {}]  }
   0x1   :  { %v164_v0 = vld [vmem:[%s10074_s1 + $0x18] sm:$0xff]  ;;  %v163_v1 = vld [vmem:[%s10074_s1 + $0x10] sm:$0xff]  ;;  %v33_v2 = vld [vmem:[%s10073_s0] sm:$0xff] }
   0x2   :  { %7093 = vmatprep.subr.mxu0 %v164_v0  ;;  %v162_v3 = vld [vmem:[%s10074_s1 + $0x8] sm:$0xff]  ;;  %7101 = vmatprep.mubr.msk.f32.mxu0 %vm172_vm0, %v33_v2  ;;  %v1653_v4 = vld [vmem:[%s10076_s3 + $0x38] sm:$0xff]  ;;  %v161_v5 = vld [vmem:[%s10074_s1] sm:$0xff] }
   0x3   :  { %7094 = vmatpush3.msra.mxu0 %v164_v0  ;;  %7709 = vmatprep.subr.mxu1 %v1653_v4  ;;  %v34_v6 = vld [vmem:[%s10073_s0 + $0x8] sm:$0xff]  ;;  %v35_v7 = vld [vmem:[%s10073_s0 + $0x10] sm:$0xff]  ;;  %v36_v9 = vld [vmem:[%s10073_s0 + $0x18] sm:$0xff] }
   0x4   :  { %7095 = vmatprep.subr.mxu0 %v163_v1  ;;  %7717 = vmatpush3.msra.mxu1 %v1653_v4  ;;  %v1652_v8 = vld [vmem:[%s10076_s3 + $0x30] sm:$0xff]  ;;  %v37_v10 = vld [vmem:[%s10073_s0 + $0x20] sm:$0xff]  ;;  %v1651_v11 = vld [vmem:[%s10076_s3 + $0x28] sm:$0xff] }
   0x5   :  { %7096 = vmatpush3.msra.mxu0 %v163_v1  ;;  %7710 = vmatprep.subr.mxu1 %v1652_v8  ;;  %v38_v12 = vld [vmem:[%s10073_s0 + $0x28] sm:$0xff]  ;;  %v39_v13 = vld [vmem:[%s10073_s0 + $0x30] sm:$0xff]  ;;  %v40_v14 = vld [vmem:[%s10073_s0 + $0x38] sm:$0xff] }
   0x6   :  { %7097 = vmatprep.subr.mxu0 %v162_v3  ;;  %7718 = vmatpush3.msra.mxu1 %v1652_v8  ;;  %v41_v15 = vld [vmem:[%s10073_s0 + $0x40] sm:$0xff]  ;;  %v42_v17 = vld [vmem:[%s10073_s0 + $0x48] sm:$0xff]  ;;  %v43_v18 = vld [vmem:[%s10073_s0 + $0x50] sm:$0xff] }
   0x7   :  { %7098 = vmatpush3.msra.mxu0 %v162_v3  ;;  %7711 = vmatprep.subr.mxu1 %v1651_v11  ;;  %v1650_v16 = vld [vmem:[%s10076_s3 + $0x20] sm:$0xff]  ;;  %v1649_v19 = vld [vmem:[%s10076_s3 + $0x18] sm:$0xff] }
   0x8   :  { %7099 = vmatprep.subr.mxu0 %v161_v5  ;;  %7719 = vmatpush3.msra.mxu1 %v1651_v11  ;;  %v44_v20 = vld [vmem:[%s10073_s0 + $0x58] sm:$0xff]  ;;  %v45_v21 = vld [vmem:[%s10073_s0 + $0x60] sm:$0xff] }
   0x9   :  { %7100 = vmatpush3.msra.mxu0 %v161_v5  ;;  %7712 = vmatprep.subr.mxu1 %v1650_v16 }
   0xa   :  { %7102 = vmatmul.mubr.msk.f32.vlgmr.msra.gmra.mxu0 %vm172_vm0, %v34_v6  ;;  %7293 = vmatprep.subr.mxu0 %v1653_v4 }
   0xb   :  { %7294 = vmatpush3.msra.mxu0 %v1653_v4  ;;  %7104 = vmatprep.mubr.msk.f32.mxu0 %vm172_vm0, %v35_v7 }
   0xc   :  { %7295 = vmatprep.subr.mxu0 %v1652_v8  ;;  %7720 = vmatpush3.msra.mxu1 %v1650_v16 }
   0xd   :  { %7296 = vmatpush3.msra.mxu0 %v1652_v8  ;;  %7713 = vmatprep.subr.mxu1 %v1649_v19 }
   0xe   :  { %7105 = vmatmul.mubr.msk.f32.gmra.mxu0 %vm172_vm0, %v36_v9  ;;  %7297 = vmatprep.subr.mxu0 %v1651_v11 }
   0xf   :  { %7107 = vmatprep.mubr.msk.f32.mxu0 %vm172_vm0, %v37_v10  ;;  %7298 = vmatpush3.msra.mxu0 %v1651_v11 }
  0x10   :  { %7299 = vmatprep.subr.mxu0 %v1650_v16  ;;  %7721 = vmatpush3.msra.mxu1 %v1649_v19 }
  0x11   :  { %7300 = vmatpush3.msra.mxu0 %v1650_v16 }
  0x12   :  { %7108 = vmatmul.mubr.msk.f32.gmra.mxu0 %vm172_vm0, %v38_v12  ;;  %7301 = vmatprep.subr.mxu0 %v1649_v19 }
  0x13   :  { %7110 = vmatprep.mubr.msk.f32.mxu0 %vm172_vm0, %v39_v13  ;;  %7302 = vmatpush3.msra.mxu0 %v1649_v19 }
  0x16   :  { %7111 = vmatmul.mubr.msk.f32.gmra.mxu0 %vm172_vm0, %v40_v14 }
  0x17   :  { %7113 = vmatprep.mubr.msk.f32.mxu0 %vm172_vm0, %v41_v15 }
  0x1a   :  { %7114 = vmatmul.mubr.msk.f32.gmra.mxu0 %vm172_vm0, %v42_v17 }
  0x1b   :  { %7116 = vmatprep.mubr.msk.f32.mxu0 %vm172_vm0, %v43_v18 }
  0x1c   :  { %14 = vsyncpa [#allocation3], 0  ;;  %v46_v22 = vld [vmem:[%s10073_s0 + $0x68] sm:$0xff]  ;;  %v47_v23 = vld [vmem:[%s10073_s0 + $0x70] sm:$0xff]  ;;  %vm1661_vm2 = vcmask 523264  }
  0x1d   :  { %v48_v24 = vld [vmem:[%s10073_s0 + $0x78] sm:$0xff]  ;;  %v49_v25 = vld [vmem:[%s10073_s0 + $0x80] sm:$0xff]  ;;  %v50_v26 = vld [vmem:[%s10073_s0 + $0x88] sm:$0xff] }
  0x1e   :  { %7117 = vmatmul.mubr.msk.f32.gmra.mxu0 %vm172_vm0, %v44_v20  ;;  %v51_v27 = vld [vmem:[%s10073_s0 + $0x90] sm:$0xff]  ;;  %v52_v29 = vld [vmem:[%s10073_s0 + $0x98] sm:$0xff]  ;;  %v53_v30 = vld [vmem:[%s10073_s0 + $0xa0] sm:$0xff] }
  0x1f   :  { %7119 = vmatprep.mubr.msk.f32.mxu0 %vm172_vm0, %v45_v21  ;;  %v1648_v28 = vld [vmem:[%s10076_s3 + $0x10] sm:$0xff]  ;;  %v54_v31 = vld [vmem:[%s10073_s0 + $0xa8] sm:$0xff]  ;;  %v56_v33 = vld [vmem:[%s10073_s0 + $0xb8] sm:$0xff] }
  0x20   :  { %7303 = vmatprep.subr.mxu0 %v1648_v28  ;;  %7714 = vmatprep.subr.mxu1 %v1648_v28  ;;  %v55_v32 = vld [vmem:[%s10073_s0 + $0xb0] sm:$0xff]  ;;  %v57_v34 = vld [vmem:[%s10073_s0 + $0xc0] sm:$0xff]  ;;  %v58_v35 = vld [vmem:[%s10073_s0 + $0xc8] sm:$0xff] }
  0x21   :  { %7304 = vmatpush3.msra.mxu0 %v1648_v28  ;;  %7722 = vmatpush3.msra.mxu1 %v1648_v28  ;;  %v59_v36 = vld [vmem:[%s10073_s0 + $0xd0] sm:$0xff]  ;;  %v60_v37 = vld [vmem:[%s10073_s0 + $0xd8] sm:$0xff]  ;;  %v61_v38 = vld [vmem:[%s10073_s0 + $0xe0] sm:$0xff] }
  0x22   :  { %7120 = vmatmul.mubr.msk.f32.gmra.mxu0 %vm172_vm0, %v46_v22  ;;  %v62_v39 = vld [vmem:[%s10073_s0 + $0xe8] sm:$0xff]  ;;  %v63_v40 = vld [vmem:[%s10073_s0 + $0xf0] sm:$0xff]  ;;  %v64_v41 = vld [vmem:[%s10073_s0 + $0xf8] sm:$0xff] }
  0x23   :  { %7122 = vmatprep.mubr.msk.f32.mxu0 %vm172_vm0, %v47_v23  ;;  %v65_v42 = vld [vmem:[%s10073_s0 + $0x100] sm:$0xff]  ;;  %v66_v43 = vld [vmem:[%s10073_s0 + $0x108] sm:$0xff]  ;;  %v67_v44 = vld [vmem:[%s10073_s0 + $0x110] sm:$0xff] }
  0x24   :  { %v68_v45 = vld [vmem:[%s10073_s0 + $0x118] sm:$0xff]  ;;  %v69_v46 = vld [vmem:[%s10073_s0 + $0x120] sm:$0xff]  ;;  %v70_v47 = vld [vmem:[%s10073_s0 + $0x128] sm:$0xff] }
  0x25   :  { %v1647_v48 = vld [vmem:[%s10076_s3 + $0x8] sm:$0xff]  ;;  %v71_v49 = vld [vmem:[%s10073_s0 + $0x130] sm:$0xff]  ;;  %v72_v50 = vld [vmem:[%s10073_s0 + $0x138] sm:$0xff] }
  0x26   :  { %7123 = vmatmul.mubr.msk.f32.gmra.mxu0 %vm172_vm0, %v48_v24  ;;  %7305 = vmatprep.subr.mxu0 %v1647_v48  ;;  %v73_v51 = vld [vmem:[%s10073_s0 + $0x140] sm:$0xff]  ;;  %v74_v52 = vld [vmem:[%s10073_s0 + $0x148] sm:$0xff]  ;;  %v75_v53 = vld [vmem:[%s10073_s0 + $0x150] sm:$0xff] }
  0x27   :  { %7125 = vmatprep.mubr.msk.f32.mxu0 %vm172_vm0, %v49_v25  ;;  %7715 = vmatprep.subr.mxu1 %v1647_v48  ;;  %v76_v54 = vld [vmem:[%s10073_s0 + $0x158] sm:$0xff]  ;;  %v77_v55 = vld [vmem:[%s10073_s0 + $0x160] sm:$0xff]  ;;  %v78_v56 = vld [vmem:[%s10073_s0 + $0x168] sm:$0xff] }
  0x28   :  { %7306 = vmatpush3.msra.mxu0 %v1647_v48  ;;  %7723 = vmatpush3.msra.mxu1 %v1647_v48  ;;  %v79_v57 = vld [vmem:[%s10073_s0 + $0x170] sm:$0xff]  ;;  %v80_v58 = vld [vmem:[%s10073_s0 + $0x178] sm:$0xff]  ;;  %v81_v59 = vld [vmem:[%s10073_s0 + $0x180] sm:$0xff] }
  0x29   :  { %v82_v60 = vld [vmem:[%s10073_s0 + $0x188] sm:$0xff]  ;;  %v83_v61 = vld [vmem:[%s10073_s0 + $0x190] sm:$0xff]  ;;  %v84_v62 = vld [vmem:[%s10073_s0 + $0x198] sm:$0xff] }
  0x2a   :  { %7126 = vmatmul.mubr.msk.f32.gmra.mxu0 %vm172_vm0, %v50_v26  ;;  %v85_v63 = vld [vmem:[%s10073_s0 + $0x1a0] sm:$0xff]  ;;  %v86_v0 = vld [vmem:[%s10073_s0 + $0x1a8] sm:$0xff]  ;;  %v87_v2 = vld [vmem:[%s10073_s0 + $0x1b0] sm:$0xff] }
  0x2b   :  { %7128 = vmatprep.mubr.msk.f32.mxu0 %vm172_vm0, %v51_v27  ;;  %v1646_v1 = vld [vmem:[%s10076_s3] sm:$0xff]  ;;  %v88_v3 = vld [vmem:[%s10073_s0 + $0x1b8] sm:$0xff]  ;;  %v90_v5 = vld [vmem:[%s10073_s0 + $0x1c8] sm:$0xff] }
  0x2c   :  { %7307 = vmatprep.subr.mxu0 %v1646_v1  ;;  %7716 = vmatprep.subr.mxu1 %v1646_v1  ;;  %v89_v4 = vld [vmem:[%s10073_s0 + $0x1c0] sm:$0xff]  ;;  %v91_v6 = vld [vmem:[%s10073_s0 + $0x1d0] sm:$0xff]  ;;  %v92_v7 = vld [vmem:[%s10073_s0 + $0x1d8] sm:$0xff] }
  0x2d   :  { %7308 = vmatpush3.msra.mxu0 %v1646_v1  ;;  %7724 = vmatpush3.msra.mxu1 %v1646_v1  ;;  %v93_v8 = vld [vmem:[%s10073_s0 + $0x1e0] sm:$0xff]  ;;  %v94_v9 = vld [vmem:[%s10073_s0 + $0x1e8] sm:$0xff]  ;;  %v95_v10 = vld [vmem:[%s10073_s0 + $0x1f0] sm:$0xff] }
  0x2e   :  { %7129 = vmatmul.mubr.msk.f32.gmra.mxu0 %vm172_vm0, %v52_v29  ;;  %v96_v11 = vld [vmem:[%s10073_s0 + $0x1f8] sm:$0xff]  ;;  %v97_v12 = vld [vmem:[%s10073_s0 + $0x200] sm:$0xff]  ;;  %v98_v13 = vld [vmem:[%s10073_s0 + $0x208] sm:$0xff] }
  0x2f   :  { %7131 = vmatprep.mubr.msk.f32.mxu0 %vm172_vm0, %v53_v30  ;;  %v99_v14 = vld [vmem:[%s10073_s0 + $0x210] sm:$0xff]  ;;  %v100_v15 = vld [vmem:[%s10073_s0 + $0x218] sm:$0xff]  ;;  %v101_v16 = vld [vmem:[%s10073_s0 + $0x220] sm:$0xff] }
  0x30   :  { %v102_v17 = vld [vmem:[%s10073_s0 + $0x228] sm:$0xff]  ;;  %v103_v18 = vld [vmem:[%s10073_s0 + $0x230] sm:$0xff]  ;;  %v104_v19 = vld [vmem:[%s10073_s0 + $0x238] sm:$0xff] }
  0x31   :  { %v105_v20 = vld [vmem:[%s10073_s0 + $0x240] sm:$0xff]  ;;  %v106_v21 = vld [vmem:[%s10073_s0 + $0x248] sm:$0xff]  ;;  %v107_v22 = vld [vmem:[%s10073_s0 + $0x250] sm:$0xff] }
  0x32   :  { %7132 = vmatmul.mubr.msk.f32.gmra.mxu0 %vm172_vm0, %v54_v31  ;;  %v108_v23 = vld [vmem:[%s10073_s0 + $0x258] sm:$0xff]  ;;  %v109_v24 = vld [vmem:[%s10073_s0 + $0x260] sm:$0xff]  ;;  %v110_v25 = vld [vmem:[%s10073_s0 + $0x268] sm:$0xff] }
  0x33   :  { %7134 = vmatprep.mubr.msk.f32.mxu0 %vm172_vm0, %v55_v32  ;;  %v111_v26 = vld [vmem:[%s10073_s0 + $0x270] sm:$0xff]  ;;  %v112_v27 = vld [vmem:[%s10073_s0 + $0x278] sm:$0xff]  ;;  %v113_v28 = vld [vmem:[%s10073_s0 + $0x280] sm:$0xff] }
  0x34   :  { %v114_v29 = vld [vmem:[%s10073_s0 + $0x288] sm:$0xff]  ;;  %v115_v30 = vld [vmem:[%s10073_s0 + $0x290] sm:$0xff]  ;;  %v116_v31 = vld [vmem:[%s10073_s0 + $0x298] sm:$0xff] }
  0x35   :  { %v117_v32 = vld [vmem:[%s10073_s0 + $0x2a0] sm:$0xff]  ;;  %v132_v48 = vld [vmem:[%s10073_s0 + $0x318] sm:$0xff] }
  0x36   :  { %7135 = vmatmul.mubr.msk.f32.gmra.mxu0 %vm172_vm0, %v56_v33  ;;  %v118_v33 = vld [vmem:[%s10073_s0 + $0x2a8] sm:$0xff]  ;;  %v140_v1 = vld [vmem:[%s10073_s0 + $0x358] sm:$0xff] }
  0x37   :  { %7137 = vmatprep.mubr.msk.f32.mxu0 %vm172_vm0, %v57_v34  ;;  %v119_v34 = vld [vmem:[%s10073_s0 + $0x2b0] sm:$0xff] }
  0x3a   :  { %7138 = vmatmul.mubr.msk.f32.gmra.mxu0 %vm172_vm0, %v58_v35  ;;  %v120_v35 = vld [vmem:[%s10073_s0 + $0x2b8] sm:$0xff] }
  0x3b   :  { %7140 = vmatprep.mubr.msk.f32.mxu0 %vm172_vm0, %v59_v36  ;;  %v121_v36 = vld [vmem:[%s10073_s0 + $0x2c0] sm:$0xff] }
  0x3e   :  { %7141 = vmatmul.mubr.msk.f32.gmra.mxu0 %vm172_vm0, %v60_v37  ;;  %v122_v37 = vld [vmem:[%s10073_s0 + $0x2c8] sm:$0xff] }
  0x3f   :  { %7143 = vmatprep.mubr.msk.f32.mxu0 %vm172_vm0, %v61_v38  ;;  %v123_v38 = vld [vmem:[%s10073_s0 + $0x2d0] sm:$0xff] }
  0x42   :  { %7144 = vmatmul.mubr.msk.f32.gmra.mxu0 %vm172_vm0, %v62_v39  ;;  %v124_v39 = vld [vmem:[%s10073_s0 + $0x2d8] sm:$0xff] }
  0x43   :  { %7146 = vmatprep.mubr.msk.f32.mxu0 %vm172_vm0, %v63_v40  ;;  %v125_v40 = vld [vmem:[%s10073_s0 + $0x2e0] sm:$0xff] }
  0x46   :  { %7147 = vmatmul.mubr.msk.f32.gmra.mxu0 %vm172_vm0, %v64_v41  ;;  %v126_v41 = vld [vmem:[%s10073_s0 + $0x2e8] sm:$0xff] }
  0x47   :  { %7149 = vmatprep.mubr.msk.f32.mxu0 %vm172_vm0, %v65_v42  ;;  %v127_v42 = vld [vmem:[%s10073_s0 + $0x2f0] sm:$0xff] }
  0x4a   :  { %7150 = vmatmul.mubr.msk.f32.gmra.mxu0 %vm172_vm0, %v66_v43  ;;  %v128_v43 = vld [vmem:[%s10073_s0 + $0x2f8] sm:$0xff] }
  0x4b   :  { %7152 = vmatprep.mubr.msk.f32.mxu0 %vm172_vm0, %v67_v44  ;;  %v129_v44 = vld [vmem:[%s10073_s0 + $0x300] sm:$0xff] }
  0x4e   :  { %7153 = vmatmul.mubr.msk.f32.gmra.mxu0 %vm172_vm0, %v68_v45  ;;  %v130_v45 = vld [vmem:[%s10073_s0 + $0x308] sm:$0xff] }
  0x4f   :  { %7155 = vmatprep.mubr.msk.f32.mxu0 %vm172_vm0, %v69_v46  ;;  %v131_v46 = vld [vmem:[%s10073_s0 + $0x310] sm:$0xff] }
  0x52   :  { %7156 = vmatmul.mubr.msk.f32.gmra.mxu0 %vm172_vm0, %v70_v47 }
  0x53   :  { %7158 = vmatprep.mubr.msk.f32.mxu0 %vm172_vm0, %v71_v49 }
  0x56   :  { %7159 = vmatmul.mubr.msk.f32.gmra.mxu0 %vm172_vm0, %v72_v50  ;;  %v133_v50 = vld [vmem:[%s10073_s0 + $0x320] sm:$0xff] }
  0x57   :  { %7161 = vmatprep.mubr.msk.f32.mxu0 %vm172_vm0, %v73_v51 }
  0x5a   :  { %7162 = vmatmul.mubr.msk.f32.gmra.mxu0 %vm172_vm0, %v74_v52  ;;  %v134_v52 = vld [vmem:[%s10073_s0 + $0x328] sm:$0xff] }
  0x5b   :  { %7164 = vmatprep.mubr.msk.f32.mxu0 %vm172_vm0, %v75_v53 }
  0x5e   :  { %7165 = vmatmul.mubr.msk.f32.gmra.mxu0 %vm172_vm0, %v76_v54  ;;  %v135_v54 = vld [vmem:[%s10073_s0 + $0x330] sm:$0xff] }
  0x5f   :  { %7167 = vmatprep.mubr.msk.f32.mxu0 %vm172_vm0, %v77_v55  ;;  %v8264_v55 = vld [vmem:[%s10078_s5 + $0x38] sm:$0xff] }
  0x60   :  { %7501 = vmatprep.subr.mxu0 %v8264_v55 }
  0x62   :  { %7168 = vmatmul.mubr.msk.f32.gmra.mxu0 %vm172_vm0, %v78_v56 }
  0x63   :  { %7170 = vmatprep.mubr.msk.f32.mxu0 %vm172_vm0, %v79_v57  ;;  %v136_v57 = vld [vmem:[%s10073_s0 + $0x338] sm:$0xff] }
  0x66   :  { %7171 = vmatmul.mubr.msk.f32.gmra.mxu0 %vm172_vm0, %v80_v58 }
  0x67   :  { %7173 = vmatprep.mubr.msk.f32.mxu0 %vm172_vm0, %v81_v59  ;;  %v137_v59 = vld [vmem:[%s10073_s0 + $0x340] sm:$0xff] }
  0x6a   :  { %7174 = vmatmul.mubr.msk.f32.gmra.mxu0 %vm172_vm0, %v82_v60 }
  0x6b   :  { %7176 = vmatprep.mubr.msk.f32.mxu0 %vm172_vm0, %v83_v61  ;;  %v138_v61 = vld [vmem:[%s10073_s0 + $0x348] sm:$0xff] }
  0x6e   :  { %7177 = vmatmul.mubr.msk.f32.gmra.mxu0 %vm172_vm0, %v84_v62 }
  0x6f   :  { %7179 = vmatprep.mubr.msk.f32.mxu0 %vm172_vm0, %v85_v63  ;;  %v139_v63 = vld [vmem:[%s10073_s0 + $0x350] sm:$0xff] }
  0x72   :  { %7180 = vmatmul.mubr.msk.f32.gmra.mxu0 %vm172_vm0, %v86_v0 }
  0x73   :  { %7182 = vmatprep.mubr.msk.f32.mxu0 %vm172_vm0, %v87_v2 }
  0x76   :  { %7183 = vmatmul.mubr.msk.f32.gmra.mxu0 %vm172_vm0, %v88_v3  ;;  %v141_v3 = vld [vmem:[%s10073_s0 + $0x360] sm:$0xff] }
  0x77   :  { %7185 = vmatprep.mubr.msk.f32.mxu0 %vm172_vm0, %v89_v4 }
  0x7a   :  { %7186 = vmatmul.mubr.msk.f32.gmra.mxu0 %vm172_vm0, %v90_v5  ;;  %v142_v5 = vld [vmem:[%s10073_s0 + $0x368] sm:$0xff] }
  0x7b   :  { %7188 = vmatprep.mubr.msk.f32.mxu0 %vm172_vm0, %v91_v6 }
  0x7e   :  { %7189 = vmatmul.mubr.msk.f32.gmra.mxu0 %vm172_vm0, %v92_v7  ;;  %v143_v7 = vld [vmem:[%s10073_s0 + $0x370] sm:$0xff] }
  0x7f   :  { %7191 = vmatprep.mubr.msk.f32.mxu0 %vm172_vm0, %v93_v8 }
  0x82   :  { %7192 = vmatmul.mubr.msk.f32.gmra.mxu0 %vm172_vm0, %v94_v9  ;;  %v144_v9 = vld [vmem:[%s10073_s0 + $0x378] sm:$0xff] }
  0x83   :  { %7194 = vmatprep.mubr.msk.f32.mxu0 %vm172_vm0, %v95_v10 }
  0x86   :  { %7195 = vmatmul.mubr.msk.f32.gmra.mxu0 %vm172_vm0, %v96_v11  ;;  %v145_v11 = vld [vmem:[%s10073_s0 + $0x380] sm:$0xff] }
  0x87   :  { %7197 = vmatprep.mubr.msk.f32.mxu0 %vm172_vm0, %v97_v12 }
  0x8a   :  { %7198 = vmatmul.mubr.msk.f32.gmra.mxu0 %vm172_vm0, %v98_v13  ;;  %v146_v13 = vld [vmem:[%s10073_s0 + $0x388] sm:$0xff] }
  0x8b   :  { %7200 = vmatprep.mubr.msk.f32.mxu0 %vm172_vm0, %v99_v14 }
  0x8e   :  { %7201 = vmatmul.mubr.msk.f32.gmra.mxu0 %vm172_vm0, %v100_v15  ;;  %v147_v15 = vld [vmem:[%s10073_s0 + $0x390] sm:$0xff] }
  0x8f   :  { %7203 = vmatprep.mubr.msk.f32.mxu0 %vm172_vm0, %v101_v16 }
  0x92   :  { %7204 = vmatmul.mubr.msk.f32.gmra.mxu0 %vm172_vm0, %v102_v17  ;;  %v148_v17 = vld [vmem:[%s10073_s0 + $0x398] sm:$0xff] }
  0x93   :  { %7206 = vmatprep.mubr.msk.f32.mxu0 %vm172_vm0, %v103_v18 }
  0x96   :  { %7207 = vmatmul.mubr.msk.f32.gmra.mxu0 %vm172_vm0, %v104_v19  ;;  %v149_v19 = vld [vmem:[%s10073_s0 + $0x3a0] sm:$0xff] }
  0x97   :  { %7209 = vmatprep.mubr.msk.f32.mxu0 %vm172_vm0, %v105_v20 }
  0x9a   :  { %7210 = vmatmul.mubr.msk.f32.gmra.mxu0 %vm172_vm0, %v106_v21  ;;  %v150_v21 = vld [vmem:[%s10073_s0 + $0x3a8] sm:$0xff] }
  0x9b   :  { %7212 = vmatprep.mubr.msk.f32.mxu0 %vm172_vm0, %v107_v22 }
  0x9e   :  { %7213 = vmatmul.mubr.msk.f32.gmra.mxu0 %vm172_vm0, %v108_v23  ;;  %v151_v23 = vld [vmem:[%s10073_s0 + $0x3b0] sm:$0xff] }
  0x9f   :  { %7215 = vmatprep.mubr.msk.f32.mxu0 %vm172_vm0, %v109_v24 }
  0xa2   :  { %7216 = vmatmul.mubr.msk.f32.gmra.mxu0 %vm172_vm0, %v110_v25  ;;  %v152_v25 = vld [vmem:[%s10073_s0 + $0x3b8] sm:$0xff] }
  0xa3   :  { %7218 = vmatprep.mubr.msk.f32.mxu0 %vm172_vm0, %v111_v26 }
  0xa6   :  { %7219 = vmatmul.mubr.msk.f32.gmra.mxu0 %vm172_vm0, %v112_v27  ;;  %v153_v27 = vld [vmem:[%s10073_s0 + $0x3c0] sm:$0xff] }
  0xa7   :  { %7221 = vmatprep.mubr.msk.f32.mxu0 %vm172_vm0, %v113_v28 }
  0xaa   :  { %7222 = vmatmul.mubr.msk.f32.gmra.mxu0 %vm172_vm0, %v114_v29  ;;  %v154_v29 = vld [vmem:[%s10073_s0 + $0x3c8] sm:$0xff] }
  0xab   :  { %7224 = vmatprep.mubr.msk.f32.mxu0 %vm172_vm0, %v115_v30 }
  0xae   :  { %7225 = vmatmul.mubr.msk.f32.gmra.mxu0 %vm172_vm0, %v116_v31  ;;  %v155_v31 = vld [vmem:[%s10073_s0 + $0x3d0] sm:$0xff] }
  0xaf   :  { %7227 = vmatprep.mubr.msk.f32.mxu0 %vm172_vm0, %v117_v32 }
  0xb2   :  { %7228 = vmatmul.mubr.msk.f32.gmra.mxu0 %vm172_vm0, %v118_v33  ;;  %v156_v33 = vld [vmem:[%s10073_s0 + $0x3d8] sm:$0xff] }
  0xb3   :  { %7230 = vmatprep.mubr.msk.f32.mxu0 %vm172_vm0, %v119_v34 }
  0xb6   :  { %7231 = vmatmul.mubr.msk.f32.gmra.mxu0 %vm172_vm0, %v120_v35  ;;  %v157_v35 = vld [vmem:[%s10073_s0 + $0x3e0] sm:$0xff] }
  0xb7   :  { %7233 = vmatprep.mubr.msk.f32.mxu0 %vm172_vm0, %v121_v36  ;;  %v8402_v36 = vld [vmem:[%s10075_s2] ss:$0 sm:$0xff] }
  0xba   :  { %7234 = vmatmul.mubr.msk.f32.gmra.mxu0 %vm172_vm0, %v122_v37 }
  0xbb   :  { %7236 = vmatprep.mubr.msk.f32.mxu0 %vm172_vm0, %v123_v38 }
  0xbe   :  { %7237 = vmatmul.mubr.msk.f32.gmra.mxu0 %vm172_vm0, %v124_v39  ;;  %v158_v39 = vld [vmem:[%s10073_s0 + $0x3e8] sm:$0xff] }
  0xbf   :  { %7239 = vmatprep.mubr.msk.f32.mxu0 %vm172_vm0, %v125_v40 }
  0xc2   :  { %7240 = vmatmul.mubr.msk.f32.gmra.mxu0 %vm172_vm0, %v126_v41  ;;  %v159_v41 = vld [vmem:[%s10073_s0 + $0x3f0] sm:$0xff] }
  0xc3   :  { %7242 = vmatprep.mubr.msk.f32.mxu0 %vm172_vm0, %v127_v42 }
  0xc6   :  { %7243 = vmatmul.mubr.msk.f32.gmra.mxu0 %vm172_vm0, %v128_v43 }
  0xc7   :  { %7245 = vmatprep.mubr.msk.f32.mxu0 %vm172_vm0, %v129_v44 }
  0xca   :  { %v8237_v47 = vpop.f32.mrf.mxu0  ;;  %7246 = vmatmul.mubr.msk.f32.gmra.mxu0 %vm172_vm0, %v130_v45 }
  0xcb   :  { %7248 = vmatprep.mubr.msk.f32.mxu0 %vm172_vm0, %v131_v46  ;;  %v629_v42 = vadd.f32 %v8237_v47, %v8402_v36  ;;  %v160_v46 = vld [vmem:[%s10073_s0 + $0x3f8] sm:$0xff] }
  0xcc   :  { %v8244_v49 = vpop.f32.mrf.mxu0 }
  0xcd   :  { %v624_v37 = vadd.f32 %v8402_v36, %v8244_v49  ;;  %v1391_v49 = vmul.f32 0.2, %v629_v42  ;;  %vm1263_vm3 = vcmp.gt.f32.partialorder %v629_v42, 0.0 }
  0xce   :  { %v8249_v51 = vpop.f32.mrf.mxu0  ;;  %7249 = vmatmul.mubr.msk.f32.gmra.mxu0 %vm172_vm0, %v132_v48 }
  0xcf   :  { %7251 = vmatprep.mubr.msk.f32.mxu0 %vm172_vm0, %v133_v50  ;;  %v1390_v43 = vmul.f32 0.2, %v624_v37  ;;  %vm1262_vm1 = vcmp.gt.f32.partialorder %v624_v37, 0.0  ;;  %v639_v47 = vadd.f32 %v8249_v51, %v8402_v36 }
  0xd0   :  { %v8256_v53 = vpop.f32.mrf.mxu0 }
  0xd1   :  { %v634_v44 = vadd.f32 %v8402_v36, %v8256_v53  ;;  %vm1265_vm5 = vcmp.gt.f32.partialorder %v639_v47, 0.0 }
  0xd2   :  { %v8266_v56 = vpop.f32.mrf.mxu0  ;;  %7252 = vmatmul.mubr.msk.f32.gmra.mxu0 %vm172_vm0, %v134_v52 }
  0xd3   :  { %7254 = vmatprep.mubr.msk.f32.mxu0 %vm172_vm0, %v135_v54  ;;  %v1392_v50 = vmul.f32 0.2, %v634_v44  ;;  %v1518_v54 = vsel %vm1262_vm1, %v624_v37, %v1390_v43  ;;  %vm1264_vm4 = vcmp.gt.f32.partialorder %v634_v44, 0.0  ;;  %v649_v51 = vadd.f32 %v8266_v56, %v8402_v36  ;;  %v3140_v56 = vld [vmem:[%s10078_s5 + $0x28] sm:$0xff] }
  0xd4   :  { %v8274_v58 = vpop.f32.mrf.mxu0 }
  0xd5   :  { %v644_v52 = vadd.f32 %v8402_v36, %v8274_v58  ;;  %vm1267_vm7 = vcmp.gt.f32.partialorder %v649_v51, 0.0 }
  0xd6   :  { %v8279_v60 = vpop.f32.mrf.mxu0  ;;  %7255 = vmatmul.mubr.msk.f32.gmra.mxu0 %vm172_vm0, %v136_v57 }
  0xd7   :  { %7257 = vmatprep.mubr.msk.f32.mxu0 %vm172_vm0, %v137_v59  ;;  %v1519_v59 = vsel %vm1263_vm3, %v629_v42, %v1391_v49  ;;  %v1394_v58 = vmul.f32 0.2, %v644_v52  ;;  %vm1266_vm6 = vcmp.gt.f32.partialorder %v644_v52, 0.0 }
  0xd8   :  { %v8286_v62 = vpop.f32.mrf.mxu0 }
  0xda   :  { %v8291_v0 = vpop.f32.mrf.mxu0  ;;  %7258 = vmatmul.mubr.msk.f32.gmra.mxu0 %vm172_vm0, %v138_v61  ;;  %v1393_v61 = vmul.f32 0.2, %v639_v47 }
  0xdb   :  { %7260 = vmatprep.mubr.msk.f32.mxu0 %vm172_vm0, %v139_v63  ;;  %v3141_v63 = vld [vmem:[%s10078_s5 + $0x30] sm:$0xff] }
  0xdc   :  { %v8298_v2 = vpop.f32.mrf.mxu0 }
  0xde   :  { %v8303_v4 = vpop.f32.mrf.mxu0  ;;  %7261 = vmatmul.mubr.msk.f32.gmra.mxu0 %vm172_vm0, %v140_v1  ;;  %v654_v1 = vadd.f32 %v8402_v36, %v8286_v62  ;;  %v659_v62 = vadd.f32 %v8279_v60, %v8402_v36 }
  0xdf   :  { %7263 = vmatprep.mubr.msk.f32.mxu0 %vm172_vm0, %v141_v3 }
  0xe0   :  { %v8310_v6 = vpop.f32.mrf.mxu0  ;;  %vm1268_vm8 = vcmp.gt.f32.partialorder %v654_v1, 0.0  ;;  %vm1269_vm9 = vcmp.gt.f32.partialorder %v659_v62, 0.0 }
  0xe2   :  { %v8315_v8 = vpop.f32.mrf.mxu0  ;;  %7264 = vmatmul.mubr.msk.f32.gmra.mxu0 %vm172_vm0, %v142_v5  ;;  %v1520_v5 = vsel %vm1264_vm4, %v634_v44, %v1392_v50 }
  0xe3   :  { %7266 = vmatprep.mubr.msk.f32.mxu0 %vm172_vm0, %v143_v7 }
  0xe4   :  { %v8322_v10 = vpop.f32.mrf.mxu0 }
  0xe6   :  { %v8327_v12 = vpop.f32.mrf.mxu0  ;;  %7267 = vmatmul.mubr.msk.f32.gmra.mxu0 %vm172_vm0, %v144_v9  ;;  %v1521_v9 = vsel %vm1265_vm5, %v639_v47, %v1393_v61 }
  0xe7   :  { %7269 = vmatprep.mubr.msk.f32.mxu0 %vm172_vm0, %v145_v11  ;;  %v1395_v11 = vmul.f32 0.2, %v649_v51 }
  0xe8   :  { %v8334_v14 = vpop.f32.mrf.mxu0 }
  0xea   :  { %v8339_v16 = vpop.f32.mrf.mxu0  ;;  %7270 = vmatmul.mubr.msk.f32.gmra.mxu0 %vm172_vm0, %v146_v13  ;;  %v3139_v13 = vld [vmem:[%s10078_s5 + $0x20] sm:$0xff] }
  0xeb   :  { %7272 = vmatprep.mubr.msk.f32.mxu0 %vm172_vm0, %v147_v15  ;;  %v1396_v15 = vmul.f32 0.2, %v654_v1 }
  0xec   :  { %v8346_v18 = vpop.f32.mrf.mxu0 }
  0xee   :  { %v8351_v20 = vpop.f32.mrf.mxu0  ;;  %7273 = vmatmul.mubr.msk.f32.gmra.mxu0 %vm172_vm0, %v148_v17 }
  0xef   :  { %7275 = vmatprep.mubr.msk.f32.mxu0 %vm172_vm0, %v149_v19  ;;  %v1522_v19 = vsel %vm1266_vm6, %v644_v52, %v1394_v58 }
  0xf0   :  { %v8358_v22 = vpop.f32.mrf.mxu0 }
  0xf2   :  { %v8363_v24 = vpop.f32.mrf.mxu0  ;;  %7276 = vmatmul.mubr.msk.f32.gmra.mxu0 %vm172_vm0, %v150_v21  ;;  %v1523_v21 = vsel %vm1267_vm7, %v649_v51, %v1395_v11 }
  0xf3   :  { %7278 = vmatprep.mubr.msk.f32.mxu0 %vm172_vm0, %v151_v23  ;;  %v1397_v23 = vmul.f32 0.2, %v659_v62 }
  0xf4   :  { %v8370_v26 = vpop.f32.mrf.mxu0 }
  0xf6   :  { %v8375_v28 = vpop.f32.mrf.mxu0  ;;  %7279 = vmatmul.mubr.msk.f32.gmra.mxu0 %vm172_vm0, %v152_v25  ;;  %v669_v25 = vadd.f32 %v8291_v0, %v8402_v36  ;;  %v1525_v0 = vsel %vm1269_vm9, %v659_v62, %v1397_v23 }
  0xf7   :  { %7281 = vmatprep.mubr.msk.f32.mxu0 %vm172_vm0, %v153_v27  ;;  %v674_v27 = vadd.f32 %v8402_v36, %v8310_v6  ;;  %v679_v6 = vadd.f32 %v8303_v4, %v8402_v36  ;;  %v689_v4 = vadd.f32 %v8315_v8, %v8402_v36  ;;  %v699_v8 = vadd.f32 %v8327_v12, %v8402_v36 }
  0xf8   :  { %v8382_v30 = vpop.f32.mrf.mxu0  ;;  %v1399_v37 = vmul.f32 0.2, %v669_v25  ;;  %vm1271_vm11 = vcmp.gt.f32.partialorder %v669_v25, 0.0  ;;  %v709_v12 = vadd.f32 %v8339_v16, %v8402_v36  ;;  %v719_v16 = vadd.f32 %v8351_v20, %v8402_v36 }
  0xf9   :  { %vm1272_vm12 = vcmp.gt.f32.partialorder %v674_v27, 0.0  ;;  %v1401_v49 = vmul.f32 0.2, %v679_v6  ;;  %vm1273_vm13 = vcmp.gt.f32.partialorder %v679_v6, 0.0  ;;  %v1403_v61 = vmul.f32 0.2, %v689_v4 }
  0xfa   :  { %v8387_v32 = vpop.f32.mrf.mxu0  ;;  %7282 = vmatmul.mubr.msk.f32.gmra.mxu0 %vm172_vm0, %v154_v29  ;;  %vm1275_vm15 = vcmp.gt.f32.partialorder %v689_v4, 0.0  ;;  %vm1277_vm1 = vcmp.gt.f32.partialorder %v699_v8, 0.0  ;;  %vm1279_vm4 = vcmp.gt.f32.partialorder %v709_v12, 0.0  ;;  %vm1281_vm6 = vcmp.gt.f32.partialorder %v719_v16, 0.0 }
  0xfb   :  { %7284 = vmatprep.mubr.msk.f32.mxu0 %vm172_vm0, %v155_v31  ;;  %v1524_v31 = vsel %vm1268_vm8, %v654_v1, %v1396_v15 }
  0xfc   :  { %v8394_v34 = vpop.f32.mrf.mxu0 }
  0xfe   :  { %v8406_v38 = vpop.f32.mrf.mxu0  ;;  %7285 = vmatmul.mubr.msk.f32.gmra.mxu0 %vm172_vm0, %v156_v33  ;;  %v3138_v33 = vld [vmem:[%s10078_s5 + $0x18] sm:$0xff] }
  0xff   :  { %7287 = vmatprep.mubr.msk.f32.mxu0 %vm172_vm0, %v157_v35 }
 0x100   :  { %v8413_v40 = vpop.f32.mrf.mxu0 }
 0x102   :  { %v8422_v45 = vpop.f32.mrf.mxu0  ;;  %7288 = vmatmul.mubr.msk.f32.gmra.mxu0 %vm172_vm0, %v158_v39  ;;  %v1400_v39 = vmul.f32 0.2, %v674_v27 }
 0x103   :  { %7290 = vmatprep.mubr.msk.f32.mxu0 %vm172_vm0, %v159_v41  ;;  %v684_v41 = vadd.f32 %v8402_v36, %v8322_v10  ;;  %v694_v10 = vadd.f32 %v8402_v36, %v8334_v14  ;;  %v704_v14 = vadd.f32 %v8402_v36, %v8346_v18  ;;  %v714_v18 = vadd.f32 %v8402_v36, %v8358_v22 }
 0x104   :  { %v8429_v48 = vpop.f32.mrf.mxu0  ;;  %v1528_v52 = vsel %vm1272_vm12, %v674_v27, %v1400_v39  ;;  %v1409_v27 = vmul.f32 0.2, %v719_v16 }
 0x105   :  { %v1402_v47 = vmul.f32 0.2, %v684_v41  ;;  %vm1274_vm14 = vcmp.gt.f32.partialorder %v684_v41, 0.0  ;;  %v1404_v51 = vmul.f32 0.2, %v694_v10  ;;  %vm1278_vm3 = vcmp.gt.f32.partialorder %v704_v14, 0.0 }
 0x106   :  { %v8435_v53 = vpop.f32.mrf.mxu0  ;;  %7291 = vmatmul.mubr.msk.f32.gmra.mxu0 %vm172_vm0, %v160_v46  ;;  %v1527_v46 = vsel %vm1271_vm11, %v669_v25, %v1399_v37  ;;  %vm1276_vm0 = vcmp.gt.f32.partialorder %v694_v10, 0.0  ;;  %v1408_v22 = vmul.f32 0.2, %v714_v18  ;;  %vm1280_vm5 = vcmp.gt.f32.partialorder %v714_v18, 0.0 }
 0x107   :  { %7309 = vmatprep.mubr.msk.f32.mxu0 %vm1661_vm2, %v1518_v54  ;;  %v1530_v58 = vsel %vm1274_vm14, %v684_v41, %v1402_v47  ;;  %v1532_v62 = vsel %vm1276_vm0, %v694_v10, %v1404_v51  ;;  %v1537_v39 = vsel %vm1281_vm6, %v719_v16, %v1409_v27 }
 0x108   :  { %v8439_v57 = vpop.f32.mrf.mxu0  ;;  %v1536_v37 = vsel %vm1280_vm5, %v714_v18, %v1408_v22 }
 0x10a   :  { %v8448_v3 = vpop.f32.mrf.mxu0  ;;  %7310 = vmatmul.mubr.msk.f32.vlgmr.msra.gmra.mxu0 %vm1661_vm2, %v1519_v59  ;;  %v1529_v59 = vsel %vm1273_vm13, %v679_v6, %v1401_v49 }
 0x10b   :  { %7312 = vmatprep.mubr.msk.f32.mxu0 %vm1661_vm2, %v1520_v5  ;;  %7502 = vmatpush3.msra.mxu0 %v8264_v55  ;;  %v664_v55 = vadd.f32 %v8402_v36, %v8298_v2  ;;  %v1531_v5 = vsel %vm1275_vm15, %v689_v4, %v1403_v61 }
 0x10c   :  { %v8456_v7 = vpop.f32.mrf.mxu0  ;;  %7503 = vmatprep.subr.mxu0 %v3141_v63 }
 0x10d   :  { %7504 = vmatpush3.msra.mxu0 %v3141_v63  ;;  %v1398_v2 = vmul.f32 0.2, %v664_v55  ;;  %vm1270_vm10 = vcmp.gt.f32.partialorder %v664_v55, 0.0 }
 0x10e   :  { %v8465_v17 = vpop.f32.mrf.mxu0  ;;  %7313 = vmatmul.mubr.msk.f32.gmra.mxu0 %vm1661_vm2, %v1521_v9  ;;  %7505 = vmatprep.subr.mxu0 %v3140_v56  ;;  %v1406_v9 = vmul.f32 0.2, %v704_v14 }
 0x10f   :  { %7315 = vmatprep.mubr.msk.f32.mxu0 %vm1661_vm2, %v1522_v19  ;;  %7506 = vmatpush3.msra.mxu0 %v3140_v56  ;;  %v1526_v43 = vsel %vm1270_vm10, %v664_v55, %v1398_v2  ;;  %v1405_v56 = vmul.f32 0.2, %v699_v8  ;;  %v1407_v55 = vmul.f32 0.2, %v709_v12  ;;  %v3137_v19 = vld [vmem:[%s10078_s5 + $0x10] sm:$0xff] }
 0x110   :  { %v8469_v60 = vpop.f32.mrf.mxu0  ;;  %7507 = vmatprep.subr.mxu0 %v3139_v13  ;;  %v1534_v25 = vsel %vm1278_vm3, %v704_v14, %v1406_v9 }
 0x111   :  { %7508 = vmatpush3.msra.mxu0 %v3139_v13  ;;  %v1533_v15 = vsel %vm1277_vm1, %v699_v8, %v1405_v56  ;;  %v1535_v2 = vsel %vm1279_vm4, %v709_v12, %v1407_v55 }
 0x112   :  { %v8475_v29 = vpop.f32.mrf.mxu0  ;;  %7316 = vmatmul.mubr.msk.f32.gmra.mxu0 %vm1661_vm2, %v1523_v21  ;;  %7509 = vmatprep.subr.mxu0 %v3138_v33  ;;  %v724_v21 = vadd.f32 %v8402_v36, %v8370_v26  ;;  %v734_v26 = vadd.f32 %v8402_v36, %v8382_v30  ;;  %v744_v30 = vadd.f32 %v8402_v36, %v8394_v34 }
 0x113   :  { %7318 = vmatprep.mubr.msk.f32.mxu0 %vm1661_vm2, %v1524_v31  ;;  %7510 = vmatpush3.msra.mxu0 %v3138_v33  ;;  %v729_v31 = vadd.f32 %v8363_v24, %v8402_v36  ;;  %v739_v24 = vadd.f32 %v8375_v28, %v8402_v36  ;;  %v749_v28 = vadd.f32 %v8387_v32, %v8402_v36 }
 0x114   :  { %v8482_v35 = vpop.f32.mrf.mxu0  ;;  %7511 = vmatprep.subr.mxu0 %v3137_v19  ;;  %v1410_v33 = vmul.f32 0.2, %v724_v21  ;;  %vm1282_vm7 = vcmp.gt.f32.partialorder %v724_v21, 0.0  ;;  %vm1284_vm9 = vcmp.gt.f32.partialorder %v734_v26, 0.0  ;;  %v754_v34 = vadd.f32 %v8402_v36, %v8413_v40 }
 0x115   :  { %7512 = vmatpush3.msra.mxu0 %v3137_v19  ;;  %v1411_v41 = vmul.f32 0.2, %v729_v31  ;;  %vm1283_vm8 = vcmp.gt.f32.partialorder %v729_v31, 0.0  ;;  %v1413_v10 = vmul.f32 0.2, %v739_v24  ;;  %vm1285_vm10 = vcmp.gt.f32.partialorder %v739_v24, 0.0 }
 0x116   :  { %v8488_v42 = vpop.f32.mrf.mxu0  ;;  %7319 = vmatmul.mubr.msk.f32.gmra.mxu0 %vm1661_vm2, %v1525_v0  ;;  %v1538_v49 = vsel %vm1282_vm7, %v724_v21, %v1410_v33  ;;  %vm1286_vm11 = vcmp.gt.f32.partialorder %v744_v30, 0.0  ;;  %v1415_v14 = vmul.f32 0.2, %v749_v28  ;;  %v759_v32 = vadd.f32 %v8406_v38, %v8402_v36 }
 0x117   :  { %7321 = vmatprep.mubr.msk.f32.mxu0 %vm1661_vm2, %v1526_v43  ;;  %v1412_v43 = vmul.f32 0.2, %v734_v26  ;;  %v1539_v47 = vsel %vm1283_vm8, %v729_v31, %v1411_v41  ;;  %v1541_v51 = vsel %vm1285_vm10, %v739_v24, %v1413_v10  ;;  %vm1287_vm12 = vcmp.gt.f32.partialorder %v749_v28, 0.0 }
 0x118   :  { %v8492_v44 = vpop.f32.mrf.mxu0  ;;  %v1416_v40 = vmul.f32 0.2, %v754_v34  ;;  %vm1288_vm13 = vcmp.gt.f32.partialorder %v754_v34, 0.0  ;;  %v1543_v9 = vsel %vm1287_vm12, %v749_v28, %v1415_v14  ;;  %v1417_v18 = vmul.f32 0.2, %v759_v32 }
 0x119   :  { %v1540_v61 = vsel %vm1284_vm9, %v734_v26, %v1412_v43  ;;  %vm1289_vm14 = vcmp.gt.f32.partialorder %v759_v32, 0.0 }
 0x11a   :  { %v8498_v50 = vpop.f32.mrf.mxu0  ;;  %7322 = vmatmul.mubr.msk.f32.gmra.mxu0 %vm1661_vm2, %v1527_v46  ;;  %v1544_v16 = vsel %vm1288_vm13, %v754_v34, %v1416_v40  ;;  %v1545_v22 = vsel %vm1289_vm14, %v759_v32, %v1417_v18 }
 0x11b   :  { %7324 = vmatprep.mubr.msk.f32.mxu0 %vm1661_vm2, %v1528_v52  ;;  %v1414_v52 = vmul.f32 0.2, %v744_v30 }
 0x11c   :  { %v8502_v54 = vpop.f32.mrf.mxu0 }
 0x11d   :  { %v1542_v12 = vsel %vm1286_vm11, %v744_v30, %v1414_v52 }
 0x11e   :  { %v8508_v63 = vpop.f32.mrf.mxu0  ;;  %7325 = vmatmul.mubr.msk.f32.gmra.mxu0 %vm1661_vm2, %v1529_v59 }
 0x11f   :  { %7327 = vmatprep.mubr.msk.f32.mxu0 %vm1661_vm2, %v1530_v58  ;;  %v3136_v58 = vld [vmem:[%s10078_s5 + $0x8] sm:$0xff] }
 0x120   :  { %v8512_v1 = vpop.f32.mrf.mxu0  ;;  %7513 = vmatprep.subr.mxu0 %v3136_v58 }
 0x121   :  { %7514 = vmatpush3.msra.mxu0 %v3136_v58  ;;  %v819_v58 = vadd.f32 %v8488_v42, %v8402_v36  ;;  %v829_v42 = vadd.f32 %v8498_v50, %v8402_v36 }
 0x122   :  { %v8518_v11 = vpop.f32.mrf.mxu0  ;;  %7328 = vmatmul.mubr.msk.f32.gmra.mxu0 %vm1661_vm2, %v1531_v5  ;;  %v764_v5 = vadd.f32 %v8402_v36, %v8429_v48  ;;  %v774_v48 = vadd.f32 %v8402_v36, %v8439_v57  ;;  %v784_v57 = vadd.f32 %v8402_v36, %v8456_v7  ;;  %v794_v7 = vadd.f32 %v8402_v36, %v8469_v60 }
 0x123   :  { %7330 = vmatprep.mubr.msk.f32.mxu0 %vm1661_vm2, %v1532_v62  ;;  %v769_v62 = vadd.f32 %v8422_v45, %v8402_v36  ;;  %v779_v45 = vadd.f32 %v8435_v53, %v8402_v36  ;;  %v789_v53 = vadd.f32 %v8448_v3, %v8402_v36  ;;  %v799_v3 = vadd.f32 %v8465_v17, %v8402_v36 }
 0x124   :  { %v8522_v13 = vpop.f32.mrf.mxu0  ;;  %vm1290_vm15 = vcmp.gt.f32.partialorder %v764_v5, 0.0  ;;  %vm1292_vm1 = vcmp.gt.f32.partialorder %v774_v48, 0.0  ;;  %vm1294_vm4 = vcmp.gt.f32.partialorder %v784_v57, 0.0  ;;  %v1424_v60 = vmul.f32 0.2, %v794_v7 }
 0x125   :  { %v1419_v21 = vmul.f32 0.2, %v769_v62  ;;  %vm1291_vm0 = vcmp.gt.f32.partialorder %v769_v62, 0.0  ;;  %v1421_v26 = vmul.f32 0.2, %v779_v45  ;;  %vm1293_vm3 = vcmp.gt.f32.partialorder %v779_v45, 0.0 }
 0x126   :  { %v8531_v23 = vpop.f32.mrf.mxu0  ;;  %7331 = vmatmul.mubr.msk.f32.gmra.mxu0 %vm1661_vm2, %v1533_v15  ;;  %v1418_v15 = vmul.f32 0.2, %v764_v5  ;;  %v1423_v30 = vmul.f32 0.2, %v789_v53  ;;  %vm1295_vm5 = vcmp.gt.f32.partialorder %v789_v53, 0.0  ;;  %vm1296_vm6 = vcmp.gt.f32.partialorder %v794_v7, 0.0 }
 0x127   :  { %7333 = vmatprep.mubr.msk.f32.mxu0 %vm1661_vm2, %v1534_v25  ;;  %v1420_v25 = vmul.f32 0.2, %v774_v48  ;;  %v1547_v33 = vsel %vm1291_vm0, %v769_v62, %v1419_v21  ;;  %v1549_v43 = vsel %vm1293_vm3, %v779_v45, %v1421_v26  ;;  %v1425_v34 = vmul.f32 0.2, %v799_v3 }
 0x128   :  { %v8535_v20 = vpop.f32.mrf.mxu0  ;;  %v1546_v27 = vsel %vm1290_vm15, %v764_v5, %v1418_v15  ;;  %v1551_v52 = vsel %vm1295_vm5, %v789_v53, %v1423_v30  ;;  %vm1297_vm7 = vcmp.gt.f32.partialorder %v799_v3, 0.0  ;;  %v1552_v32 = vsel %vm1296_vm6, %v794_v7, %v1424_v60 }
 0x129   :  { %v1548_v41 = vsel %vm1292_vm1, %v774_v48, %v1420_v25  ;;  %v1553_v5 = vsel %vm1297_vm7, %v799_v3, %v1425_v34  ;;  %v1429_v15 = vmul.f32 0.2, %v819_v58  ;;  %vm1301_vm11 = vcmp.gt.f32.partialorder %v819_v58, 0.0 }
 0x12a   :  { %v8541_v0 = vpop.f32.mrf.mxu0  ;;  %7334 = vmatmul.mubr.msk.f32.gmra.mxu0 %vm1661_vm2, %v1535_v2  ;;  %vm1303_vm15 = vcmp.gt.f32.partialorder %v829_v42, 0.0  ;;  %v1431_v26 = vmul.f32 0.2, %v829_v42  ;;  %v844_v7 = vadd.f32 %v8402_v36, %v8522_v13 }
 0x12b   :  { %7336 = vmatprep.mubr.msk.f32.mxu0 %vm1661_vm2, %v1536_v37  ;;  %v1422_v37 = vmul.f32 0.2, %v784_v57 }
 0x12c   :  { %v8545_v6 = vpop.f32.mrf.mxu0  ;;  %v1559_v13 = vsel %vm1303_vm15, %v829_v42, %v1431_v26  ;;  %vm1306_vm5 = vcmp.gt.f32.partialorder %v844_v7, 0.0 }
 0x12d   :  { %v1550_v28 = vsel %vm1294_vm4, %v784_v57, %v1422_v37 }
 0x12e   :  { %v8551_v46 = vpop.f32.mrf.mxu0  ;;  %7337 = vmatmul.mubr.msk.f32.gmra.mxu0 %vm1661_vm2, %v1537_v39 }
 0x12f   :  { %7339 = vmatprep.mubr.msk.f32.mxu0 %vm1661_vm2, %v1538_v49  ;;  %v3135_v49 = vld [vmem:[%s10078_s5] sm:$0xff] }
 0x130   :  { %v8555_v4 = vpop.f32.mrf.mxu0  ;;  %7515 = vmatprep.subr.mxu0 %v3135_v49 }
 0x131   :  { %7516 = vmatpush3.msra.mxu0 %v3135_v49  ;;  %v874_v26 = vadd.f32 %v8402_v36, %v8555_v4 }
 0x132   :  { %v8561_v59 = vpop.f32.mrf.mxu0  ;;  %7340 = vmatmul.mubr.msk.f32.gmra.mxu0 %vm1661_vm2, %v1539_v47  ;;  %v804_v47 = vadd.f32 %v8402_v36, %v8482_v35  ;;  %v814_v35 = vadd.f32 %v8402_v36, %v8492_v44  ;;  %v824_v44 = vadd.f32 %v8402_v36, %v8502_v54 }
 0x133   :  { %7342 = vmatprep.mubr.msk.f32.mxu0 %vm1661_vm2, %v1540_v61  ;;  %v809_v61 = vadd.f32 %v8475_v29, %v8402_v36 }
 0x134   :  { %v8565_v8 = vpop.f32.mrf.mxu0  ;;  %vm1298_vm8 = vcmp.gt.f32.partialorder %v804_v47, 0.0  ;;  %vm1300_vm10 = vcmp.gt.f32.partialorder %v814_v35, 0.0  ;;  %v1430_v21 = vmul.f32 0.2, %v824_v44  ;;  %vm1302_vm12 = vcmp.gt.f32.partialorder %v824_v44, 0.0 }
 0x135   :  { %v1427_v29 = vmul.f32 0.2, %v809_v61  ;;  %vm1299_vm9 = vcmp.gt.f32.partialorder %v809_v61, 0.0 }
 0x136   :  { %v8574_v56 = vpop.f32.mrf.mxu0  ;;  %7343 = vmatmul.mubr.msk.f32.gmra.mxu0 %vm1661_vm2, %v1541_v51  ;;  %v1426_v51 = vmul.f32 0.2, %v804_v47  ;;  %v1558_v49 = vsel %vm1302_vm12, %v824_v44, %v1430_v21 }
 0x137   :  { %7345 = vmatprep.mubr.msk.f32.mxu0 %vm1661_vm2, %v1542_v12  ;;  %v1428_v12 = vmul.f32 0.2, %v814_v35 }
 0x138   :  { %v8578_v38 = vpop.f32.mrf.mxu0  ;;  %v1554_v18 = vsel %vm1298_vm8, %v804_v47, %v1426_v51 }
 0x139   :  { %v1556_v57 = vsel %vm1300_vm10, %v814_v35, %v1428_v12 }
 0x13a   :  { %v8584_v55 = vpop.f32.mrf.mxu0  ;;  %7346 = vmatmul.mubr.msk.f32.gmra.mxu0 %vm1661_vm2, %v1543_v9 }
 0x13b   :  { %7348 = vmatprep.mubr.msk.f32.mxu0 %vm1661_vm2, %v1544_v16  ;;  %v1555_v16 = vsel %vm1299_vm9, %v809_v61, %v1427_v29  ;;  %v1434_v61 = vmul.f32 0.2, %v844_v7 }
 0x13c   :  { %v8588_v19 = vpop.f32.mrf.mxu0 }
 0x13e   :  { %v8594_v2 = vpop.f32.mrf.mxu0  ;;  %7349 = vmatmul.mubr.msk.f32.gmra.mxu0 %vm1661_vm2, %v1545_v22  ;;  %v834_v22 = vadd.f32 %v8402_v36, %v8512_v1  ;;  %v839_v1 = vadd.f32 %v8508_v63, %v8402_v36 }
 0x13f   :  { %7351 = vmatprep.mubr.msk.f32.mxu0 %vm1661_vm2, %v1546_v27 }
 0x140   :  { %v8598_v31 = vpop.f32.mrf.mxu0  ;;  %v1432_v37 = vmul.f32 0.2, %v834_v22  ;;  %vm1304_vm0 = vcmp.gt.f32.partialorder %v834_v22, 0.0  ;;  %vm1305_vm4 = vcmp.gt.f32.partialorder %v839_v1, 0.0 }
 0x142   :  { %v8604_v39 = vpop.f32.mrf.mxu0  ;;  %7352 = vmatmul.mubr.msk.f32.gmra.mxu0 %vm1661_vm2, %v1547_v33  ;;  %v1557_v33 = vsel %vm1301_vm11, %v819_v58, %v1429_v15  ;;  %v854_v58 = vadd.f32 %v8402_v36, %v8535_v20  ;;  %v864_v15 = vadd.f32 %v8402_v36, %v8545_v6 }
 0x143   :  { %7354 = vmatprep.mubr.msk.f32.mxu0 %vm1661_vm2, %v1548_v41 }
 0x144   :  { %v8608_v24 = vpop.f32.mrf.mxu0  ;;  %vm1308_vm9 = vcmp.gt.f32.partialorder %v854_v58, 0.0 }
 0x146   :  { %v8617_v10 = vpop.f32.mrf.mxu0  ;;  %7355 = vmatmul.mubr.msk.f32.gmra.mxu0 %vm1661_vm2, %v1549_v43 }
 0x147   :  { %7357 = vmatprep.mubr.msk.f32.mxu0 %vm1661_vm2, %v1550_v28  ;;  %v1433_v28 = vmul.f32 0.2, %v839_v1 }
 0x148   :  { %v8621_v17 = vpop.f32.mrf.mxu0 }
 0x149   :  { %v1561_v20 = vsel %vm1305_vm4, %v839_v1, %v1433_v28 }
 0x14a   :  { %v8627_v14 = vpop.f32.mrf.mxu0  ;;  %7358 = vmatmul.mubr.msk.f32.gmra.mxu0 %vm1661_vm2, %v1551_v52  ;;  %v849_v52 = vadd.f32 %v8518_v11, %v8402_v36 }
 0x14b   :  { %7360 = vmatprep.mubr.msk.f32.mxu0 %vm1661_vm2, %v1552_v32  ;;  %v1560_v32 = vsel %vm1304_vm0, %v834_v22, %v1432_v37  ;;  %v1436_v22 = vmul.f32 0.2, %v854_v58 }
 0x14c   :  { %v8633_v40 = vpop.f32.mrf.mxu0  ;;  %vm1307_vm8 = vcmp.gt.f32.partialorder %v849_v52, 0.0 }
 0x14e   :  { %v7202_v9 = vpop.f32.mrf.mxu0  ;;  %7361 = vmatmul.mubr.msk.f32.gmra.mxu0 %vm1661_vm2, %v1553_v5 }
 0x14f   :  { %v959_v62 = vadd.f32 %v7202_v9, %v8402_v36  ;;  %7363 = vmatprep.mubr.msk.f32.mxu0 %vm1661_vm2, %v1554_v18  ;;  %v1435_v9 = vmul.f32 0.2, %v849_v52  ;;  %v859_v18 = vadd.f32 %v8531_v23, %v8402_v36 }
 0x150   :  { %v953_v48 = vpop.f32.mrf.mxu0 }
 0x151   :  { %v954_v54 = vadd.f32 %v8402_v36, %v953_v48  ;;  %v1457_v45 = vmul.f32 0.2, %v959_v62  ;;  %vm1329_vm13 = vcmp.gt.f32.partialorder %v959_v62, 0.0  ;;  %v1563_v6 = vsel %vm1307_vm8, %v849_v52, %v1435_v9 }
 0x152   :  { %v7205_v25 = vpop.f32.mrf.mxu0  ;;  %7364 = vmatmul.mubr.msk.f32.gmra.mxu0 %vm1661_vm2, %v1555_v16  ;;  %v1562_v16 = vsel %vm1306_vm5, %v844_v7, %v1434_v61  ;;  %vm1309_vm12 = vcmp.gt.f32.partialorder %v859_v18, 0.0  ;;  %v884_v52 = vadd.f32 %v8402_v36, %v8565_v8 }
 0x153   :  { %v969_v27 = vadd.f32 %v7205_v25, %v8402_v36  ;;  %7366 = vmatprep.mubr.msk.f32.mxu0 %vm1661_vm2, %v1556_v57  ;;  %vm1328_vm14 = vcmp.gt.f32.partialorder %v954_v54, 0.0  ;;  %v1456_v50 = vmul.f32 0.2, %v954_v54  ;;  %v1585_v60 = vsel %vm1329_vm13, %v959_v62, %v1457_v45 }
 0x154   :  { %v963_v53 = vpop.f32.mrf.mxu0  ;;  %v1437_v57 = vmul.f32 0.2, %v859_v18  ;;  %vm1310_vm13 = vcmp.gt.f32.partialorder %v864_v15, 0.0 }
 0x155   :  { %v964_v41 = vadd.f32 %v8402_v36, %v963_v53  ;;  %v1584_v43 = vsel %vm1328_vm14, %v954_v54, %v1456_v50  ;;  %v1459_v30 = vmul.f32 0.2, %v969_v27  ;;  %vm1331_vm1 = vcmp.gt.f32.partialorder %v969_v27, 0.0 }
 0x156   :  { %v7208_v3 = vpop.f32.mrf.mxu0  ;;  %7367 = vmatmul.mubr.msk.f32.gmra.mxu0 %vm1661_vm2, %v1557_v33  ;;  %7408 = vmatprep.mubr.msk.f32.mxu1 %vm1661_vm2, %v1584_v43  ;;  %v1438_v33 = vmul.f32 0.2, %v864_v15  ;;  %v1565_v4 = vsel %vm1309_vm12, %v859_v18, %v1437_v57 }
 0x157   :  { %v1458_v63 = vmul.f32 0.2, %v964_v41  ;;  %v979_v47 = vadd.f32 %v7208_v3, %v8402_v36  ;;  %7369 = vmatprep.mubr.msk.f32.mxu0 %vm1661_vm2, %v1558_v49  ;;  %7409 = vmatmul.mubr.msk.f32.vlgmr.msra.gmra.mxu1 %vm1661_vm2, %v1585_v60  ;;  %vm1330_vm3 = vcmp.gt.f32.partialorder %v964_v41, 0.0  ;;  %v1587_v12 = vsel %vm1331_vm1, %v969_v27, %v1459_v30 }
 0x158   :  { %v973_v34 = vpop.f32.mrf.mxu0  ;;  %v869_v27 = vadd.f32 %v8541_v0, %v8402_v36  ;;  %v879_v49 = vadd.f32 %v8551_v46, %v8402_v36  ;;  %v1566_v28 = vsel %vm1310_vm13, %v864_v15, %v1438_v33  ;;  %vm1312_vm1 = vcmp.gt.f32.partialorder %v874_v26, 0.0 }
 0x159   :  { %v974_v51 = vadd.f32 %v8402_v36, %v973_v34  ;;  %v1586_v35 = vsel %vm1330_vm3, %v964_v41, %v1458_v63  ;;  %v1461_v5 = vmul.f32 0.2, %v979_v47  ;;  %vm1333_vm6 = vcmp.gt.f32.partialorder %v979_v47, 0.0 }
 0x15a   :  { %v7211_v29 = vpop.f32.mrf.mxu0  ;;  %7370 = vmatmul.mubr.msk.f32.gmra.mxu0 %vm1661_vm2, %v1559_v13  ;;  %7411 = vmatprep.mubr.msk.f32.mxu1 %vm1661_vm2, %v1586_v35  ;;  %v1564_v41 = vsel %vm1308_vm9, %v854_v58, %v1436_v22  ;;  %vm1311_vm0 = vcmp.gt.f32.partialorder %v869_v27, 0.0  ;;  %v1439_v3 = vmul.f32 0.2, %v869_v27  ;;  %v1440_v63 = vmul.f32 0.2, %v874_v26 }
 0x15b   :  { %v1460_v11 = vmul.f32 0.2, %v974_v51  ;;  %v989_v44 = vadd.f32 %v7211_v29, %v8402_v36  ;;  %7372 = vmatprep.mubr.msk.f32.mxu0 %vm1661_vm2, %v1560_v32  ;;  %7412 = vmatmul.mubr.msk.f32.gmra.mxu1 %vm1661_vm2, %v1587_v12  ;;  %vm1332_vm7 = vcmp.gt.f32.partialorder %v974_v51, 0.0  ;;  %v1589_v45 = vsel %vm1333_vm6, %v979_v47, %v1461_v5 }
 0x15c   :  { %v983_v62 = vpop.f32.mrf.mxu0  ;;  %v1567_v8 = vsel %vm1311_vm0, %v869_v27, %v1439_v3  ;;  %vm1313_vm5 = vcmp.gt.f32.partialorder %v879_v49, 0.0  ;;  %v1441_v32 = vmul.f32 0.2, %v879_v49  ;;  %v889_v58 = vadd.f32 %v8561_v59, %v8402_v36 }
 0x15d   :  { %v984_v42 = vadd.f32 %v8402_v36, %v983_v62  ;;  %v1588_v48 = vsel %vm1332_vm7, %v974_v51, %v1460_v11  ;;  %v1463_v54 = vmul.f32 0.2, %v989_v44  ;;  %vm1335_vm10 = vcmp.gt.f32.partialorder %v989_v44, 0.0 }
 0x15e   :  { %v7214_v21 = vpop.f32.mrf.mxu0  ;;  %7373 = vmatmul.mubr.msk.f32.gmra.mxu0 %vm1661_vm2, %v1561_v20  ;;  %7414 = vmatprep.mubr.msk.f32.mxu1 %vm1661_vm2, %v1588_v48  ;;  %v894_v29 = vadd.f32 %v8402_v36, %v8578_v38  ;;  %v1442_v20 = vmul.f32 0.2, %v884_v52  ;;  %vm1314_vm6 = vcmp.gt.f32.partialorder %v884_v52, 0.0  ;;  %v1569_v38 = vsel %vm1313_vm5, %v879_v49, %v1441_v32 }
 0x15f   :  { %v1462_v23 = vmul.f32 0.2, %v984_v42  ;;  %v999_v25 = vadd.f32 %v7214_v21, %v8402_v36  ;;  %7375 = vmatprep.mubr.msk.f32.mxu0 %vm1661_vm2, %v1562_v16  ;;  %7415 = vmatmul.mubr.msk.f32.gmra.mxu1 %vm1661_vm2, %v1589_v45  ;;  %vm1334_vm11 = vcmp.gt.f32.partialorder %v984_v42, 0.0  ;;  %v1591_v43 = vsel %vm1335_vm10, %v989_v44, %v1463_v54 }
 0x160   :  { %v993_v50 = vpop.f32.mrf.mxu0  ;;  %v1568_v44 = vsel %vm1312_vm1, %v874_v26, %v1440_v63  ;;  %vm1315_vm9 = vcmp.gt.f32.partialorder %v889_v58, 0.0  ;;  %v899_v48 = vadd.f32 %v8574_v56, %v8402_v36  ;;  %v1444_v22 = vmul.f32 0.2, %v894_v29 }
 0x161   :  { %v994_v1 = vadd.f32 %v8402_v36, %v993_v50  ;;  %v1590_v53 = vsel %vm1334_vm11, %v984_v42, %v1462_v23  ;;  %v1465_v37 = vmul.f32 0.2, %v999_v25  ;;  %vm1337_vm14 = vcmp.gt.f32.partialorder %v999_v25, 0.0 }
 0x162   :  { %v7217_v7 = vpop.f32.mrf.mxu0  ;;  %7376 = vmatmul.mubr.msk.f32.gmra.mxu0 %vm1661_vm2, %v1563_v6  ;;  %7417 = vmatprep.mubr.msk.f32.mxu1 %vm1661_vm2, %v1590_v53  ;;  %v1443_v42 = vmul.f32 0.2, %v889_v58  ;;  %v904_v54 = vadd.f32 %v8402_v36, %v8588_v19  ;;  %v1570_v6 = vsel %vm1314_vm6, %v884_v52, %v1442_v20  ;;  %vm1316_vm10 = vcmp.gt.f32.partialorder %v894_v29, 0.0 }
 0x163   :  { %v1464_v0 = vmul.f32 0.2, %v994_v1  ;;  %v1009_v30 = vadd.f32 %v7217_v7, %v8402_v36  ;;  %7378 = vmatprep.mubr.msk.f32.mxu0 %vm1661_vm2, %v1564_v41  ;;  %7418 = vmatmul.mubr.msk.f32.gmra.mxu1 %vm1661_vm2, %v1591_v43  ;;  %vm1336_vm15 = vcmp.gt.f32.partialorder %v994_v1, 0.0  ;;  %v1593_v51 = vsel %vm1337_vm14, %v999_v25, %v1465_v37 }
 0x164   :  { %v1003_v60 = vpop.f32.mrf.mxu0  ;;  %v1571_v19 = vsel %vm1315_vm9, %v889_v58, %v1443_v42  ;;  %vm1317_vm13 = vcmp.gt.f32.partialorder %v899_v48, 0.0  ;;  %v1445_v50 = vmul.f32 0.2, %v899_v48  ;;  %v909_v33 = vadd.f32 %v8584_v55, %v8402_v36 }
 0x165   :  { %v1004_v47 = vadd.f32 %v8402_v36, %v1003_v60  ;;  %v1592_v13 = vsel %vm1336_vm15, %v994_v1, %v1464_v0  ;;  %v1467_v34 = vmul.f32 0.2, %v1009_v30  ;;  %vm1339_vm3 = vcmp.gt.f32.partialorder %v1009_v30, 0.0 }
 0x166   :  { %v7220_v61 = vpop.f32.mrf.mxu0  ;;  %7379 = vmatmul.mubr.msk.f32.gmra.mxu0 %vm1661_vm2, %v1565_v4  ;;  %7420 = vmatprep.mubr.msk.f32.mxu1 %vm1661_vm2, %v1592_v13  ;;  %v1446_v1 = vmul.f32 0.2, %v904_v54  ;;  %v1572_v7 = vsel %vm1316_vm10, %v894_v29, %v1444_v22  ;;  %v914_v41 = vadd.f32 %v8402_v36, %v8598_v31  ;;  %vm1318_vm14 = vcmp.gt.f32.partialorder %v904_v54, 0.0  ;;  %v8778_v22 = vld [vmem:[%s10075_s2] ss:$0 sm:$0xff] }
 0x167   :  { %v1466_v46 = vmul.f32 0.2, %v1004_v47  ;;  %v1019_v35 = vadd.f32 %v7220_v61, %v8402_v36  ;;  %7381 = vmatprep.mubr.msk.f32.mxu0 %vm1661_vm2, %v1566_v28  ;;  %7421 = vmatmul.mubr.msk.f32.gmra.mxu1 %vm1661_vm2, %v1593_v51  ;;  %vm1338_vm4 = vcmp.gt.f32.partialorder %v1004_v47, 0.0  ;;  %v1595_v62 = vsel %vm1339_vm3, %v1009_v30, %v1467_v34 }
 0x168   :  { %v1013_v5 = vpop.f32.mrf.mxu0  ;;  %v1573_v31 = vsel %vm1317_vm13, %v899_v48, %v1445_v50  ;;  %vm1319_vm1 = vcmp.gt.f32.partialorder %v909_v33, 0.0  ;;  %v1447_v3 = vmul.f32 0.2, %v909_v33  ;;  %v919_v49 = vadd.f32 %v8594_v2, %v8402_v36 }
 0x169   :  { %v1014_v12 = vadd.f32 %v8402_v36, %v1013_v5  ;;  %v1594_v11 = vsel %vm1338_vm4, %v1004_v47, %v1466_v46  ;;  %v1469_v9 = vmul.f32 0.2, %v1019_v35  ;;  %vm1341_vm7 = vcmp.gt.f32.partialorder %v1019_v35, 0.0 }
 0x16a   :  { %v7223_v18 = vpop.f32.mrf.mxu0  ;;  %7382 = vmatmul.mubr.msk.f32.gmra.mxu0 %vm1661_vm2, %v1567_v8  ;;  %7423 = vmatprep.mubr.msk.f32.mxu1 %vm1661_vm2, %v1594_v11  ;;  %v924_v63 = vadd.f32 %v8402_v36, %v8608_v24  ;;  %v1574_v28 = vsel %vm1318_vm14, %v904_v54, %v1446_v1  ;;  %v1448_v52 = vmul.f32 0.2, %v914_v41  ;;  %vm1320_vm3 = vcmp.gt.f32.partialorder %v914_v41, 0.0 }
 0x16b   :  { %v1468_v59 = vmul.f32 0.2, %v1014_v12  ;;  %v1029_v15 = vadd.f32 %v7223_v18, %v8402_v36  ;;  %7384 = vmatprep.mubr.msk.f32.mxu0 %vm1661_vm2, %v1568_v44  ;;  %7424 = vmatmul.mubr.msk.f32.gmra.mxu1 %vm1661_vm2, %v1595_v62  ;;  %vm1340_vm8 = vcmp.gt.f32.partialorder %v1014_v12, 0.0  ;;  %v1597_v57 = vsel %vm1341_vm7, %v1019_v35, %v1469_v9 }
 0x16c   :  { %v1023_v16 = vpop.f32.mrf.mxu0  ;;  %v1575_v24 = vsel %vm1319_vm1, %v909_v33, %v1447_v3  ;;  %vm1321_vm6 = vcmp.gt.f32.partialorder %v919_v49, 0.0  ;;  %v1449_v35 = vmul.f32 0.2, %v919_v49  ;;  %v929_v8 = vadd.f32 %v8604_v39, %v8402_v36 }
 0x16d   :  { %v1024_v21 = vadd.f32 %v8402_v36, %v1023_v16  ;;  %v1596_v45 = vsel %vm1340_vm8, %v1014_v12, %v1468_v59  ;;  %v1471_v23 = vmul.f32 0.2, %v1029_v15  ;;  %vm1343_vm11 = vcmp.gt.f32.partialorder %v1029_v15, 0.0 }
 0x16e   :  { %v7226_v25 = vpop.f32.mrf.mxu0  ;;  %7385 = vmatmul.mubr.msk.f32.gmra.mxu0 %vm1661_vm2, %v1569_v38  ;;  %7426 = vmatprep.mubr.msk.f32.mxu1 %vm1661_vm2, %v1596_v45  ;;  %v1450_v58 = vmul.f32 0.2, %v924_v63  ;;  %v934_v5 = vadd.f32 %v8402_v36, %v8621_v17  ;;  %v1576_v20 = vsel %vm1320_vm3, %v914_v41, %v1448_v52  ;;  %vm1322_vm7 = vcmp.gt.f32.partialorder %v924_v63, 0.0 }
 0x16f   :  { %v1470_v56 = vmul.f32 0.2, %v1024_v21  ;;  %v1039_v27 = vadd.f32 %v7226_v25, %v8402_v36  ;;  %7387 = vmatprep.mubr.msk.f32.mxu0 %vm1661_vm2, %v1570_v6  ;;  %7427 = vmatmul.mubr.msk.f32.gmra.mxu1 %vm1661_vm2, %v1597_v57  ;;  %vm1342_vm12 = vcmp.gt.f32.partialorder %v1024_v21, 0.0  ;;  %v1599_v30 = vsel %vm1343_vm11, %v1029_v15, %v1471_v23 }
 0x170   :  { %v1033_v26 = vpop.f32.mrf.mxu0  ;;  %v1577_v17 = vsel %vm1321_vm6, %v919_v49, %v1449_v35  ;;  %vm1323_vm10 = vcmp.gt.f32.partialorder %v929_v8, 0.0  ;;  %v1451_v62 = vmul.f32 0.2, %v929_v8  ;;  %v939_v59 = vadd.f32 %v8617_v10, %v8402_v36 }
 0x171   :  { %v1034_v53 = vadd.f32 %v8402_v36, %v1033_v26  ;;  %v1598_v37 = vsel %vm1342_vm12, %v1024_v21, %v1470_v56  ;;  %v1473_v43 = vmul.f32 0.2, %v1039_v27  ;;  %vm1345_vm15 = vcmp.gt.f32.partialorder %v1039_v27, 0.0 }
 0x172   :  { %v7229_v0 = vpop.f32.mrf.mxu0  ;;  %7388 = vmatmul.mubr.msk.f32.gmra.mxu0 %vm1661_vm2, %v1571_v19  ;;  %7429 = vmatprep.mubr.msk.f32.mxu1 %vm1661_vm2, %v1598_v37  ;;  %v1452_v38 = vmul.f32 0.2, %v934_v5  ;;  %v1578_v16 = vsel %vm1322_vm7, %v924_v63, %v1450_v58  ;;  %v944_v54 = vadd.f32 %v8778_v22, %v8633_v40  ;;  %vm1324_vm11 = vcmp.gt.f32.partialorder %v934_v5, 0.0 }
 0x173   :  { %v1472_v55 = vmul.f32 0.2, %v1034_v53  ;;  %v1049_v4 = vadd.f32 %v7229_v0, %v8402_v36  ;;  %7390 = vmatprep.mubr.msk.f32.mxu0 %vm1661_vm2, %v1572_v7  ;;  %7430 = vmatmul.mubr.msk.f32.gmra.mxu1 %vm1661_vm2, %v1599_v30  ;;  %vm1344_vm0 = vcmp.gt.f32.partialorder %v1034_v53, 0.0  ;;  %v1601_v51 = vsel %vm1345_vm15, %v1039_v27, %v1473_v43 }
 0x174   :  { %v1043_v60 = vpop.f32.mrf.mxu0  ;;  %v1579_v40 = vsel %vm1323_vm10, %v929_v8, %v1451_v62  ;;  %vm1325_vm14 = vcmp.gt.f32.partialorder %v939_v59, 0.0  ;;  %v1453_v25 = vmul.f32 0.2, %v939_v59  ;;  %v949_v57 = vadd.f32 %v8778_v22, %v8627_v14 }
 0x175   :  { %v1044_v47 = vadd.f32 %v8402_v36, %v1043_v60  ;;  %v1600_v13 = vsel %vm1344_vm0, %v1034_v53, %v1472_v55  ;;  %v1475_v34 = vmul.f32 0.2, %v1049_v4  ;;  %vm1347_vm4 = vcmp.gt.f32.partialorder %v1049_v4, 0.0 }
 0x176   :  { %v7232_v61 = vpop.f32.mrf.mxu0  ;;  %7391 = vmatmul.mubr.msk.f32.gmra.mxu0 %vm1661_vm2, %v1573_v31  ;;  %7432 = vmatprep.mubr.msk.f32.mxu1 %vm1661_vm2, %v1600_v13  ;;  %v1580_v19 = vsel %vm1324_vm11, %v934_v5, %v1452_v38  ;;  %v1454_v50 = vmul.f32 0.2, %v944_v54  ;;  %vm1326_vm15 = vcmp.gt.f32.partialorder %v944_v54, 0.0  ;;  %v1581_v7 = vsel %vm1325_vm14, %v939_v59, %v1453_v25 }
 0x177   :  { %v1474_v2 = vmul.f32 0.2, %v1044_v47  ;;  %v1059_v46 = vadd.f32 %v7232_v61, %v8402_v36  ;;  %7393 = vmatprep.mubr.msk.f32.mxu0 %vm1661_vm2, %v1574_v28  ;;  %7433 = vmatmul.mubr.msk.f32.gmra.mxu1 %vm1661_vm2, %v1601_v51  ;;  %vm1346_vm5 = vcmp.gt.f32.partialorder %v1044_v47, 0.0  ;;  %v1603_v9 = vsel %vm1347_vm4, %v1049_v4, %v1475_v34 }
 0x178   :  { %v1053_v32 = vpop.f32.mrf.mxu0  ;;  %v1455_v41 = vmul.f32 0.2, %v949_v57  ;;  %vm1327_vm3 = vcmp.gt.f32.partialorder %v949_v57, 0.0  ;;  %v1582_v4 = vsel %vm1326_vm15, %v944_v54, %v1454_v50 }
 0x179   :  { %v1054_v29 = vadd.f32 %v8402_v36, %v1053_v32  ;;  %v1602_v12 = vsel %vm1346_vm5, %v1044_v47, %v1474_v2  ;;  %v1477_v11 = vmul.f32 0.2, %v1059_v46  ;;  %vm1349_vm8 = vcmp.gt.f32.partialorder %v1059_v46, 0.0 }
 0x17a   :  { %v7235_v44 = vpop.f32.mrf.mxu0  ;;  %7394 = vmatmul.mubr.msk.f32.gmra.mxu0 %vm1661_vm2, %v1575_v24  ;;  %7435 = vmatprep.mubr.msk.f32.mxu1 %vm1661_vm2, %v1602_v12  ;;  %v1583_v63 = vsel %vm1327_vm3, %v949_v57, %v1455_v41 }
 0x17b   :  { %v1476_v39 = vmul.f32 0.2, %v1054_v29  ;;  %v1069_v18 = vadd.f32 %v7235_v44, %v8402_v36  ;;  %7396 = vmatprep.mubr.msk.f32.mxu0 %vm1661_vm2, %v1576_v20  ;;  %7436 = vmatmul.mubr.msk.f32.gmra.mxu1 %vm1661_vm2, %v1603_v9  ;;  %vm1348_vm9 = vcmp.gt.f32.partialorder %v1054_v29, 0.0  ;;  %v1605_v10 = vsel %vm1349_vm8, %v1059_v46, %v1477_v11 }
 0x17c   :  { %v1063_v15 = vpop.f32.mrf.mxu0 }
 0x17d   :  { %v1064_v42 = vadd.f32 %v8402_v36, %v1063_v15  ;;  %v1604_v48 = vsel %vm1348_vm9, %v1054_v29, %v1476_v39  ;;  %v1479_v21 = vmul.f32 0.2, %v1069_v18  ;;  %vm1351_vm12 = vcmp.gt.f32.partialorder %v1069_v18, 0.0 }
 0x17e   :  { %v7238_v45 = vpop.f32.mrf.mxu0  ;;  %7397 = vmatmul.mubr.msk.f32.gmra.mxu0 %vm1661_vm2, %v1577_v17  ;;  %7438 = vmatprep.mubr.msk.f32.mxu1 %vm1661_vm2, %v1604_v48 }
 0x17f   :  { %v1478_v36 = vmul.f32 0.2, %v1064_v42  ;;  %v1079_v23 = vadd.f32 %v8778_v22, %v7238_v45  ;;  %7399 = vmatprep.mubr.msk.f32.mxu0 %vm1661_vm2, %v1578_v16  ;;  %7439 = vmatmul.mubr.msk.f32.gmra.mxu1 %vm1661_vm2, %v1605_v10  ;;  %vm1350_vm13 = vcmp.gt.f32.partialorder %v1064_v42, 0.0  ;;  %v1607_v1 = vsel %vm1351_vm12, %v1069_v18, %v1479_v21 }
 0x180   :  { %v1073_v6 = vpop.f32.mrf.mxu0 }
 0x181   :  { %v1074_v56 = vadd.f32 %v8778_v22, %v1073_v6  ;;  %v1606_v27 = vsel %vm1350_vm13, %v1064_v42, %v1478_v36  ;;  %v1481_v33 = vmul.f32 0.2, %v1079_v23  ;;  %vm1353_vm0 = vcmp.gt.f32.partialorder %v1079_v23, 0.0 }
 0x182   :  { %v7241_v26 = vpop.f32.mrf.mxu0  ;;  %7400 = vmatmul.mubr.msk.f32.gmra.mxu0 %vm1661_vm2, %v1579_v40  ;;  %7441 = vmatprep.mubr.msk.f32.mxu1 %vm1661_vm2, %v1606_v27 }
 0x183   :  { %v1480_v53 = vmul.f32 0.2, %v1074_v56  ;;  %v1089_v37 = vadd.f32 %v8778_v22, %v7241_v26  ;;  %7402 = vmatprep.mubr.msk.f32.mxu0 %vm1661_vm2, %v1580_v19  ;;  %7442 = vmatmul.mubr.msk.f32.gmra.mxu1 %vm1661_vm2, %v1607_v1  ;;  %vm1352_vm1 = vcmp.gt.f32.partialorder %v1074_v56, 0.0  ;;  %v1609_v31 = vsel %vm1353_vm0, %v1079_v23, %v1481_v33 }
 0x184   :  { %v1083_v14 = vpop.f32.mrf.mxu0 }
 0x185   :  { %v1084_v43 = vadd.f32 %v8778_v22, %v1083_v14  ;;  %v1608_v0 = vsel %vm1352_vm1, %v1074_v56, %v1480_v53  ;;  %v1483_v30 = vmul.f32 0.2, %v1089_v37  ;;  %vm1355_vm4 = vcmp.gt.f32.partialorder %v1089_v37, 0.0 }
 0x186   :  { %v7244_v55 = vpop.f32.mrf.mxu0  ;;  %7403 = vmatmul.mubr.msk.f32.gmra.mxu0 %vm1661_vm2, %v1581_v7  ;;  %7444 = vmatprep.mubr.msk.f32.mxu1 %vm1661_vm2, %v1608_v0 }
 0x187   :  { %v1482_v3 = vmul.f32 0.2, %v1084_v43  ;;  %v1099_v49 = vadd.f32 %v8778_v22, %v7244_v55  ;;  %7405 = vmatprep.mubr.msk.f32.mxu0 %vm1661_vm2, %v1582_v4  ;;  %7445 = vmatmul.mubr.msk.f32.gmra.mxu1 %vm1661_vm2, %v1609_v31  ;;  %vm1354_vm5 = vcmp.gt.f32.partialorder %v1084_v43, 0.0  ;;  %v1611_v34 = vsel %vm1355_vm4, %v1089_v37, %v1483_v30  ;;  %v4638_v55 = vld [vmem:[%s10080_s7 + $0x78] sm:$0xff]  ;;  %v4637_v4 = vld [vmem:[%s10080_s7 + $0x70] sm:$0xff] }
 0x188   :  { %v1093_v60 = vpop.f32.mrf.mxu0  ;;  %5051 = vmatprep.subr.mxu1 %v4638_v55 }
 0x189   :  { %v1094_v47 = vadd.f32 %v8778_v22, %v1093_v60  ;;  %v1610_v13 = vsel %vm1354_vm5, %v1084_v43, %v1482_v3  ;;  %v1485_v28 = vmul.f32 0.2, %v1099_v49  ;;  %vm1357_vm6 = vcmp.gt.f32.partialorder %v1099_v49, 0.0  ;;  %5052 = vmatpush1.msra.mxu1 %v4637_v4 }
 0x18a   :  { %v7247_v52 = vpop.f32.mrf.mxu0  ;;  %7406 = vmatmul.mubr.msk.f32.gmra.mxu0 %vm1661_vm2, %v1583_v63  ;;  %7447 = vmatprep.mubr.msk.f32.mxu1 %vm1661_vm2, %v1610_v13 }
 0x18b   :  { %v1484_v61 = vmul.f32 0.2, %v1094_v47  ;;  %v1109_v51 = vadd.f32 %v8778_v22, %v7247_v52  ;;  %7448 = vmatmul.mubr.msk.f32.gmra.mxu1 %vm1661_vm2, %v1611_v34  ;;  %vm1356_vm7 = vcmp.gt.f32.partialorder %v1094_v47, 0.0  ;;  %v1613_v32 = vsel %vm1357_vm6, %v1099_v49, %v1485_v28 }
 0x18c   :  { %v1103_v2 = vpop.f32.mrf.mxu0 }
 0x18d   :  { %v1104_v46 = vadd.f32 %v8778_v22, %v1103_v2  ;;  %v1612_v24 = vsel %vm1356_vm7, %v1094_v47, %v1484_v61  ;;  %v1487_v35 = vmul.f32 0.2, %v1109_v51  ;;  %vm1359_vm8 = vcmp.gt.f32.partialorder %v1109_v51, 0.0 }
 0x18e   :  { %v7250_v8 = vpop.f32.mrf.mxu0  ;;  %7450 = vmatprep.mubr.msk.f32.mxu1 %vm1661_vm2, %v1612_v24 }
 0x18f   :  { %v1486_v58 = vmul.f32 0.2, %v1104_v46  ;;  %v1119_v5 = vadd.f32 %v8778_v22, %v7250_v8  ;;  %7451 = vmatmul.mubr.msk.f32.gmra.mxu1 %vm1661_vm2, %v1613_v32  ;;  %vm1358_vm9 = vcmp.gt.f32.partialorder %v1104_v46, 0.0  ;;  %v1615_v9 = vsel %vm1359_vm8, %v1109_v51, %v1487_v35 }
 0x190   :  { %v1113_v29 = vpop.f32.mrf.mxu0 }
 0x191   :  { %v1114_v12 = vadd.f32 %v8778_v22, %v1113_v29  ;;  %v1614_v11 = vsel %vm1358_vm9, %v1104_v46, %v1486_v58  ;;  %v1489_v44 = vmul.f32 0.2, %v1119_v5  ;;  %vm1361_vm10 = vcmp.gt.f32.partialorder %v1119_v5, 0.0 }
 0x192   :  { %v7253_v20 = vpop.f32.mrf.mxu0  ;;  %7453 = vmatprep.mubr.msk.f32.mxu1 %vm1661_vm2, %v1614_v11 }
 0x193   :  { %v1488_v39 = vmul.f32 0.2, %v1114_v12  ;;  %v1129_v18 = vadd.f32 %v8778_v22, %v7253_v20  ;;  %7454 = vmatmul.mubr.msk.f32.gmra.mxu1 %vm1661_vm2, %v1615_v9  ;;  %vm1360_vm11 = vcmp.gt.f32.partialorder %v1114_v12, 0.0  ;;  %v1617_v42 = vsel %vm1361_vm10, %v1119_v5, %v1489_v44 }
 0x194   :  { %v1123_v17 = vpop.f32.mrf.mxu0 }
 0x195   :  { %v1124_v62 = vadd.f32 %v8778_v22, %v1123_v17  ;;  %v1616_v59 = vsel %vm1360_vm11, %v1114_v12, %v1488_v39  ;;  %v1491_v15 = vmul.f32 0.2, %v1129_v18  ;;  %vm1363_vm12 = vcmp.gt.f32.partialorder %v1129_v18, 0.0 }
 0x196   :  { %v7256_v38 = vpop.f32.mrf.mxu0  ;;  %7456 = vmatprep.mubr.msk.f32.mxu1 %vm1661_vm2, %v1616_v59 }
 0x197   :  { %v1490_v48 = vmul.f32 0.2, %v1124_v62  ;;  %v1139_v16 = vadd.f32 %v8778_v22, %v7256_v38  ;;  %7457 = vmatmul.mubr.msk.f32.gmra.mxu1 %vm1661_vm2, %v1617_v42  ;;  %vm1362_vm13 = vcmp.gt.f32.partialorder %v1124_v62, 0.0  ;;  %v1619_v23 = vsel %vm1363_vm12, %v1129_v18, %v1491_v15  ;;  %v4636_v38 = vld [vmem:[%s10080_s7 + $0x68] sm:$0xff]  ;;  %v4635_v42 = vld [vmem:[%s10080_s7 + $0x60] sm:$0xff] }
 0x198   :  { %v1133_v54 = vpop.f32.mrf.mxu0  ;;  %5053 = vmatprep.subr.mxu1 %v4636_v38 }
 0x199   :  { %v1134_v21 = vadd.f32 %v8778_v22, %v1133_v54  ;;  %v1618_v45 = vsel %vm1362_vm13, %v1124_v62, %v1490_v48  ;;  %v1493_v10 = vmul.f32 0.2, %v1139_v16  ;;  %vm1365_vm14 = vcmp.gt.f32.partialorder %v1139_v16, 0.0  ;;  %5054 = vmatpush1.msra.mxu1 %v4635_v42 }
 0x19a   :  { %v7259_v36 = vpop.f32.mrf.mxu0  ;;  %7459 = vmatprep.mubr.msk.f32.mxu1 %vm1661_vm2, %v1618_v45 }
 0x19b   :  { %v1492_v40 = vmul.f32 0.2, %v1134_v21  ;;  %v1149_v25 = vadd.f32 %v8778_v22, %v7259_v36  ;;  %7460 = vmatmul.mubr.msk.f32.gmra.mxu1 %vm1661_vm2, %v1619_v23  ;;  %vm1364_vm15 = vcmp.gt.f32.partialorder %v1134_v21, 0.0  ;;  %v1621_v50 = vsel %vm1365_vm14, %v1139_v16, %v1493_v10 }
 0x19c   :  { %v1143_v6 = vpop.f32.mrf.mxu0 }
 0x19d   :  { %v1144_v57 = vadd.f32 %v8778_v22, %v1143_v6  ;;  %v1620_v56 = vsel %vm1364_vm15, %v1134_v21, %v1492_v40  ;;  %v1495_v27 = vmul.f32 0.2, %v1149_v25  ;;  %vm1367_vm0 = vcmp.gt.f32.partialorder %v1149_v25, 0.0 }
 0x19e   :  { %v7262_v19 = vpop.f32.mrf.mxu0  ;;  %7462 = vmatprep.mubr.msk.f32.mxu1 %vm1661_vm2, %v1620_v56 }
 0x19f   :  { %v1494_v33 = vmul.f32 0.2, %v1144_v57  ;;  %v1159_v26 = vadd.f32 %v8778_v22, %v7262_v19  ;;  %7463 = vmatmul.mubr.msk.f32.gmra.mxu1 %vm1661_vm2, %v1621_v50  ;;  %vm1366_vm1 = vcmp.gt.f32.partialorder %v1144_v57, 0.0  ;;  %v1623_v41 = vsel %vm1367_vm0, %v1149_v25, %v1495_v27 }
 0x1a0   :  { %v1153_v1 = vpop.f32.mrf.mxu0 }
 0x1a1   :  { %v1154_v53 = vadd.f32 %v8778_v22, %v1153_v1  ;;  %v1622_v37 = vsel %vm1366_vm1, %v1144_v57, %v1494_v33  ;;  %v1497_v14 = vmul.f32 0.2, %v1159_v26  ;;  %vm1369_vm3 = vcmp.gt.f32.partialorder %v1159_v26, 0.0 }
 0x1a2   :  { %v7265_v7 = vpop.f32.mrf.mxu0  ;;  %7465 = vmatprep.mubr.msk.f32.mxu1 %vm1661_vm2, %v1622_v37 }
 0x1a3   :  { %v1496_v43 = vmul.f32 0.2, %v1154_v53  ;;  %v1169_v0 = vadd.f32 %v8778_v22, %v7265_v7  ;;  %7466 = vmatmul.mubr.msk.f32.gmra.mxu1 %vm1661_vm2, %v1623_v41  ;;  %vm1368_vm4 = vcmp.gt.f32.partialorder %v1154_v53, 0.0  ;;  %v1625_v63 = vsel %vm1369_vm3, %v1159_v26, %v1497_v14 }
 0x1a4   :  { %v1163_v30 = vpop.f32.mrf.mxu0 }
 0x1a5   :  { %v1164_v31 = vadd.f32 %v8778_v22, %v1163_v30  ;;  %v1624_v3 = vsel %vm1368_vm4, %v1154_v53, %v1496_v43  ;;  %v1499_v49 = vmul.f32 0.2, %v1169_v0  ;;  %vm1371_vm5 = vcmp.gt.f32.partialorder %v1169_v0, 0.0 }
 0x1a6   :  { %v7268_v60 = vpop.f32.mrf.mxu0  ;;  %7468 = vmatprep.mubr.msk.f32.mxu1 %vm1661_vm2, %v1624_v3 }
 0x1a7   :  { %v1498_v47 = vmul.f32 0.2, %v1164_v31  ;;  %v1179_v13 = vadd.f32 %v8778_v22, %v7268_v60  ;;  %7469 = vmatmul.mubr.msk.f32.gmra.mxu1 %vm1661_vm2, %v1625_v63  ;;  %vm1370_vm6 = vcmp.gt.f32.partialorder %v1164_v31, 0.0  ;;  %v1627_v2 = vsel %vm1371_vm5, %v1169_v0, %v1499_v49  ;;  %v4634_v49 = vld [vmem:[%s10080_s7 + $0x58] sm:$0xff]  ;;  %v4633_v63 = vld [vmem:[%s10080_s7 + $0x50] sm:$0xff] }
 0x1a8   :  { %v1173_v28 = vpop.f32.mrf.mxu0  ;;  %5055 = vmatprep.subr.mxu1 %v4634_v49 }
 0x1a9   :  { %v1174_v52 = vadd.f32 %v8778_v22, %v1173_v28  ;;  %v1626_v34 = vsel %vm1370_vm6, %v1164_v31, %v1498_v47  ;;  %v1501_v61 = vmul.f32 0.2, %v1179_v13  ;;  %vm1373_vm7 = vcmp.gt.f32.partialorder %v1179_v13, 0.0  ;;  %5056 = vmatpush1.msra.mxu1 %v4633_v63 }
 0x1aa   :  { %v7271_v51 = vpop.f32.mrf.mxu0  ;;  %7471 = vmatprep.mubr.msk.f32.mxu1 %vm1661_vm2, %v1626_v34 }
 0x1ab   :  { %v1500_v46 = vmul.f32 0.2, %v1174_v52  ;;  %v1189_v24 = vadd.f32 %v8778_v22, %v7271_v51  ;;  %7472 = vmatmul.mubr.msk.f32.gmra.mxu1 %vm1661_vm2, %v1627_v2  ;;  %vm1372_vm8 = vcmp.gt.f32.partialorder %v1174_v52, 0.0  ;;  %v1629_v29 = vsel %vm1373_vm7, %v1179_v13, %v1501_v61 }
 0x1ac   :  { %v1183_v35 = vpop.f32.mrf.mxu0 }
 0x1ad   :  { %v1184_v8 = vadd.f32 %v8778_v22, %v1183_v35  ;;  %v1628_v32 = vsel %vm1372_vm8, %v1174_v52, %v1500_v46  ;;  %v1503_v58 = vmul.f32 0.2, %v1189_v24  ;;  %vm1375_vm9 = vcmp.gt.f32.partialorder %v1189_v24, 0.0  ;;  %v8893_v46 = vld [vmem:[%s10077_s4] ss:$0 sm:$0xff] }
 0x1ae   :  { %v7274_v5 = vpop.f32.mrf.mxu0  ;;  %7474 = vmatprep.mubr.msk.f32.mxu1 %vm1661_vm2, %v1628_v32 }
 0x1af   :  { %v1502_v12 = vmul.f32 0.2, %v1184_v8  ;;  %v1199_v11 = vadd.f32 %v8778_v22, %v7274_v5  ;;  %7475 = vmatmul.mubr.msk.f32.gmra.mxu1 %vm1661_vm2, %v1629_v29  ;;  %vm1374_vm10 = vcmp.gt.f32.partialorder %v1184_v8, 0.0  ;;  %v1631_v17 = vsel %vm1375_vm9, %v1189_v24, %v1503_v58 }
 0x1b0   :  { %v1193_v44 = vpop.f32.mrf.mxu0 }
 0x1b1   :  { %v1194_v20 = vadd.f32 %v8778_v22, %v1193_v44  ;;  %v1630_v9 = vsel %vm1374_vm10, %v1184_v8, %v1502_v12  ;;  %v1505_v39 = vmul.f32 0.2, %v1199_v11  ;;  %vm1377_vm11 = vcmp.gt.f32.partialorder %v1199_v11, 0.0 }
 0x1b2   :  { %v7277_v18 = vpop.f32.mrf.mxu0  ;;  %7477 = vmatprep.mubr.msk.f32.mxu1 %vm1661_vm2, %v1630_v9 }
 0x1b3   :  { %v1504_v62 = vmul.f32 0.2, %v1194_v20  ;;  %v1209_v59 = vadd.f32 %v8778_v22, %v7277_v18  ;;  %7478 = vmatmul.mubr.msk.f32.gmra.mxu1 %vm1661_vm2, %v1631_v17  ;;  %vm1376_vm12 = vcmp.gt.f32.partialorder %v1194_v20, 0.0  ;;  %v1633_v45 = vsel %vm1377_vm11, %v1199_v11, %v1505_v39 }
 0x1b4   :  { %v1203_v15 = vpop.f32.mrf.mxu0 }
 0x1b5   :  { %v1204_v48 = vadd.f32 %v8778_v22, %v1203_v15  ;;  %v1632_v16 = vsel %vm1376_vm12, %v1194_v20, %v1504_v62  ;;  %v1507_v54 = vmul.f32 0.2, %v1209_v59  ;;  %vm1379_vm13 = vcmp.gt.f32.partialorder %v1209_v59, 0.0  ;;  %v4632_v62 = vld [vmem:[%s10080_s7 + $0x48] sm:$0xff] }
 0x1b6   :  { %v7280_v21 = vpop.f32.mrf.mxu0  ;;  %7480 = vmatprep.mubr.msk.f32.mxu1 %vm1661_vm2, %v1632_v16  ;;  %5057 = vmatprep.subr.mxu1 %v4632_v62 }
 0x1b7   :  { %v1506_v10 = vmul.f32 0.2, %v1204_v48  ;;  %v1219_v36 = vadd.f32 %v8778_v22, %v7280_v21  ;;  %7481 = vmatmul.mubr.msk.f32.gmra.mxu1 %vm1661_vm2, %v1633_v45  ;;  %vm1378_vm14 = vcmp.gt.f32.partialorder %v1204_v48, 0.0  ;;  %v1635_v56 = vsel %vm1379_vm13, %v1209_v59, %v1507_v54  ;;  %v4631_v45 = vld [vmem:[%s10080_s7 + $0x40] sm:$0xff] }
 0x1b8   :  { %v1213_v23 = vpop.f32.mrf.mxu0  ;;  %5058 = vmatpush1.msra.mxu1 %v4631_v45 }
 0x1b9   :  { %v1214_v40 = vadd.f32 %v8778_v22, %v1213_v23  ;;  %v1634_v25 = vsel %vm1378_vm14, %v1204_v48, %v1506_v10  ;;  %v1509_v6 = vmul.f32 0.2, %v1219_v36  ;;  %vm1381_vm15 = vcmp.gt.f32.partialorder %v1219_v36, 0.0 }
 0x1ba   :  { %v7283_v57 = vpop.f32.mrf.mxu0  ;;  %7483 = vmatprep.mubr.msk.f32.mxu1 %vm1661_vm2, %v1634_v25 }
 0x1bb   :  { %v1508_v27 = vmul.f32 0.2, %v1214_v40  ;;  %v1229_v19 = vadd.f32 %v8778_v22, %v7283_v57  ;;  %7484 = vmatmul.mubr.msk.f32.gmra.mxu1 %vm1661_vm2, %v1635_v56  ;;  %vm1380_vm0 = vcmp.gt.f32.partialorder %v1214_v40, 0.0  ;;  %v1637_v37 = vsel %vm1381_vm15, %v1219_v36, %v1509_v6 }
 0x1bc   :  { %v1223_v50 = vpop.f32.mrf.mxu0 }
 0x1bd   :  { %v1224_v33 = vadd.f32 %v8778_v22, %v1223_v50  ;;  %v1636_v26 = vsel %vm1380_vm0, %v1214_v40, %v1508_v27  ;;  %v1511_v1 = vmul.f32 0.2, %v1229_v19  ;;  %vm1383_vm1 = vcmp.gt.f32.partialorder %v1229_v19, 0.0 }
 0x1be   :  { %v7286_v53 = vpop.f32.mrf.mxu0  ;;  %7486 = vmatprep.mubr.msk.f32.mxu1 %vm1661_vm2, %v1636_v26 }
 0x1bf   :  { %v1510_v14 = vmul.f32 0.2, %v1224_v33  ;;  %v1239_v7 = vadd.f32 %v8778_v22, %v7286_v53  ;;  %7487 = vmatmul.mubr.msk.f32.gmra.mxu1 %vm1661_vm2, %v1637_v37  ;;  %vm1382_vm3 = vcmp.gt.f32.partialorder %v1224_v33, 0.0  ;;  %v1639_v4 = vsel %vm1383_vm1, %v1229_v19, %v1511_v1 }
 0x1c0   :  { %v1233_v41 = vpop.f32.mrf.mxu0 }
 0x1c1   :  { %v1234_v43 = vadd.f32 %v8778_v22, %v1233_v41  ;;  %v1638_v0 = vsel %vm1382_vm3, %v1224_v33, %v1510_v14  ;;  %v1513_v30 = vmul.f32 0.2, %v1239_v7  ;;  %vm1385_vm4 = vcmp.gt.f32.partialorder %v1239_v7, 0.0 }
 0x1c2   :  { %v7289_v55 = vpop.f32.mrf.mxu0  ;;  %7489 = vmatprep.mubr.msk.f32.mxu1 %vm1661_vm2, %v1638_v0 }
 0x1c3   :  { %v1512_v31 = vmul.f32 0.2, %v1234_v43  ;;  %v1249_v3 = vadd.f32 %v8778_v22, %v7289_v55  ;;  %7490 = vmatmul.mubr.msk.f32.gmra.mxu1 %vm1661_vm2, %v1639_v4  ;;  %vm1384_vm5 = vcmp.gt.f32.partialorder %v1234_v43, 0.0  ;;  %v1641_v34 = vsel %vm1385_vm4, %v1239_v7, %v1513_v30 }
 0x1c4   :  { %v1243_v60 = vpop.f32.mrf.mxu0 }
 0x1c5   :  { %v1244_v47 = vadd.f32 %v8778_v22, %v1243_v60  ;;  %v1640_v13 = vsel %vm1384_vm5, %v1234_v43, %v1512_v31  ;;  %v1515_v28 = vmul.f32 0.2, %v1249_v3  ;;  %vm1387_vm6 = vcmp.gt.f32.partialorder %v1249_v3, 0.0  ;;  %v4630_v31 = vld [vmem:[%s10080_s7 + $0x38] sm:$0xff] }
 0x1c6   :  { %v7292_v52 = vpop.f32.mrf.mxu0  ;;  %7492 = vmatprep.mubr.msk.f32.mxu1 %vm1661_vm2, %v1640_v13  ;;  %5059 = vmatprep.subr.mxu1 %v4630_v31 }
 0x1c7   :  { %v1514_v61 = vmul.f32 0.2, %v1244_v47  ;;  %v1259_v51 = vadd.f32 %v8778_v22, %v7292_v52  ;;  %7493 = vmatmul.mubr.msk.f32.gmra.mxu1 %vm1661_vm2, %v1641_v34  ;;  %vm1386_vm7 = vcmp.gt.f32.partialorder %v1244_v47, 0.0  ;;  %v1643_v58 = vsel %vm1387_vm6, %v1249_v3, %v1515_v28  ;;  %v4629_v3 = vld [vmem:[%s10080_s7 + $0x30] sm:$0xff] }
 0x1c8   :  { %v1253_v2 = vpop.f32.mrf.mxu0  ;;  %5060 = vmatpush1.msra.mxu1 %v4629_v3 }
 0x1c9   :  { %v1254_v24 = vadd.f32 %v8778_v22, %v1253_v2  ;;  %v1642_v35 = vsel %vm1386_vm7, %v1244_v47, %v1514_v61  ;;  %v1517_v8 = vmul.f32 0.2, %v1259_v51  ;;  %vm1389_vm8 = vcmp.gt.f32.partialorder %v1259_v51, 0.0 }
 0x1ca   :  { %v7311_v32 = vpop.f32.mrf.mxu0  ;;  %7495 = vmatprep.mubr.msk.f32.mxu1 %vm1661_vm2, %v1642_v35 }
 0x1cb   :  { %v1516_v5 = vmul.f32 0.2, %v1254_v24  ;;  %v2118_v29 = vadd.f32 %v7311_v32, %v8893_v46  ;;  %7496 = vmatmul.mubr.msk.f32.gmra.mxu1 %vm1661_vm2, %v1643_v58  ;;  %vm1388_vm9 = vcmp.gt.f32.partialorder %v1254_v24, 0.0  ;;  %v1645_v22 = vsel %vm1389_vm8, %v1259_v51, %v1517_v8 }
 0x1cc   :  { %v2112_v12 = vpop.f32.mrf.mxu0 }
 0x1cd   :  { %v2113_v11 = vadd.f32 %v8893_v46, %v2112_v12  ;;  %v1644_v44 = vsel %vm1388_vm9, %v1254_v24, %v1516_v5  ;;  %v2880_v20 = vmul.f32 0.2, %v2118_v29  ;;  %vm2752_vm10 = vcmp.gt.f32.partialorder %v2118_v29, 0.0 }
 0x1ce   :  { %v7314_v9 = vpop.f32.mrf.mxu0  ;;  %7498 = vmatprep.mubr.msk.f32.mxu1 %vm1661_vm2, %v1644_v44 }
 0x1cf   :  { %v2879_v39 = vmul.f32 0.2, %v2113_v11  ;;  %v2128_v18 = vadd.f32 %v7314_v9, %v8893_v46  ;;  %7499 = vmatmul.mubr.msk.f32.gmra.mxu1 %vm1661_vm2, %v1645_v22  ;;  %vm2751_vm11 = vcmp.gt.f32.partialorder %v2113_v11, 0.0  ;;  %v3008_v38 = vsel %vm2752_vm10, %v2118_v29, %v2880_v20 }
 0x1d0   :  { %v2122_v17 = vpop.f32.mrf.mxu0 }
 0x1d1   :  { %v2123_v59 = vadd.f32 %v8893_v46, %v2122_v17  ;;  %v3007_v15 = vsel %vm2751_vm11, %v2113_v11, %v2879_v39  ;;  %v2882_v42 = vmul.f32 0.2, %v2128_v18  ;;  %vm2754_vm12 = vcmp.gt.f32.partialorder %v2128_v18, 0.0 }
 0x1d2   :  { %v7317_v48 = vpop.f32.mrf.mxu0  ;;  %7517 = vmatprep.mubr.msk.f32.mxu0 %vm1661_vm2, %v3007_v15 }
 0x1d3   :  { %v2881_v16 = vmul.f32 0.2, %v2123_v59  ;;  %v2138_v54 = vadd.f32 %v7317_v48, %v8893_v46  ;;  %7518 = vmatmul.mubr.msk.f32.vlgmr.msra.gmra.mxu0 %vm1661_vm2, %v3008_v38  ;;  %vm2753_vm13 = vcmp.gt.f32.partialorder %v2123_v59, 0.0  ;;  %v3010_v23 = vsel %vm2754_vm12, %v2128_v18, %v2882_v42  ;;  %v4628_v48 = vld [vmem:[%s10080_s7 + $0x28] sm:$0xff] }
 0x1d4   :  { %v2132_v21 = vpop.f32.mrf.mxu0  ;;  %5061 = vmatprep.subr.mxu1 %v4628_v48 }
 0x1d5   :  { %v2133_v10 = vadd.f32 %v8893_v46, %v2132_v21  ;;  %v3009_v36 = vsel %vm2753_vm13, %v2123_v59, %v2881_v16  ;;  %v2884_v40 = vmul.f32 0.2, %v2138_v54  ;;  %vm2756_vm14 = vcmp.gt.f32.partialorder %v2138_v54, 0.0  ;;  %v4627_v16 = vld [vmem:[%s10080_s7 + $0x20] sm:$0xff] }
 0x1d6   :  { %v7320_v25 = vpop.f32.mrf.mxu0  ;;  %7520 = vmatprep.mubr.msk.f32.mxu0 %vm1661_vm2, %v3009_v36  ;;  %5062 = vmatpush1.msra.mxu1 %v4627_v16 }
 0x1d7   :  { %v2883_v6 = vmul.f32 0.2, %v2133_v10  ;;  %v2148_v57 = vadd.f32 %v7320_v25, %v8893_v46  ;;  %7521 = vmatmul.mubr.msk.f32.gmra.mxu0 %vm1661_vm2, %v3010_v23  ;;  %vm2755_vm15 = vcmp.gt.f32.partialorder %v2133_v10, 0.0  ;;  %v3012_v50 = vsel %vm2756_vm14, %v2138_v54, %v2884_v40 }
 0x1d8   :  { %v2142_v56 = vpop.f32.mrf.mxu0 }
 0x1d9   :  { %v2143_v27 = vadd.f32 %v8893_v46, %v2142_v56  ;;  %v3011_v19 = vsel %vm2755_vm15, %v2133_v10, %v2883_v6  ;;  %v2886_v33 = vmul.f32 0.2, %v2148_v57  ;;  %vm2758_vm0 = vcmp.gt.f32.partialorder %v2148_v57, 0.0 }
 0x1da   :  { %v7323_v26 = vpop.f32.mrf.mxu0  ;;  %7523 = vmatprep.mubr.msk.f32.mxu0 %vm1661_vm2, %v3011_v19 }
 0x1db   :  { %v2885_v1 = vmul.f32 0.2, %v2143_v27  ;;  %v2158_v53 = vadd.f32 %v7323_v26, %v8893_v46  ;;  %7524 = vmatmul.mubr.msk.f32.gmra.mxu0 %vm1661_vm2, %v3012_v50  ;;  %vm2757_vm1 = vcmp.gt.f32.partialorder %v2143_v27, 0.0  ;;  %v3014_v41 = vsel %vm2758_vm0, %v2148_v57, %v2886_v33 }
 0x1dc   :  { %v2152_v37 = vpop.f32.mrf.mxu0 }
 0x1dd   :  { %v2153_v14 = vadd.f32 %v8893_v46, %v2152_v37  ;;  %v3013_v7 = vsel %vm2757_vm1, %v2143_v27, %v2885_v1  ;;  %v2888_v43 = vmul.f32 0.2, %v2158_v53  ;;  %vm2760_vm3 = vcmp.gt.f32.partialorder %v2158_v53, 0.0 }
 0x1de   :  { %v7326_v0 = vpop.f32.mrf.mxu0  ;;  %7526 = vmatprep.mubr.msk.f32.mxu0 %vm1661_vm2, %v3013_v7 }
 0x1df   :  { %v2887_v30 = vmul.f32 0.2, %v2153_v14  ;;  %v2168_v55 = vadd.f32 %v7326_v0, %v8893_v46  ;;  %7527 = vmatmul.mubr.msk.f32.gmra.mxu0 %vm1661_vm2, %v3014_v41  ;;  %vm2759_vm4 = vcmp.gt.f32.partialorder %v2153_v14, 0.0  ;;  %v3016_v63 = vsel %vm2760_vm3, %v2158_v53, %v2888_v43 }
 0x1e0   :  { %v2162_v4 = vpop.f32.mrf.mxu0 }
 0x1e1   :  { %v2163_v49 = vadd.f32 %v8893_v46, %v2162_v4  ;;  %v3015_v60 = vsel %vm2759_vm4, %v2153_v14, %v2887_v30  ;;  %v2890_v47 = vmul.f32 0.2, %v2168_v55  ;;  %vm2762_vm5 = vcmp.gt.f32.partialorder %v2168_v55, 0.0 }
 0x1e2   :  { %v7329_v13 = vpop.f32.mrf.mxu0  ;;  %7529 = vmatprep.mubr.msk.f32.mxu0 %vm1661_vm2, %v3015_v60 }
 0x1e3   :  { %v2889_v28 = vmul.f32 0.2, %v2163_v49  ;;  %v2178_v52 = vadd.f32 %v7329_v13, %v8893_v46  ;;  %7530 = vmatmul.mubr.msk.f32.gmra.mxu0 %vm1661_vm2, %v3016_v63  ;;  %vm2761_vm6 = vcmp.gt.f32.partialorder %v2163_v49, 0.0  ;;  %v3018_v2 = vsel %vm2762_vm5, %v2168_v55, %v2890_v47  ;;  %v4626_v47 = vld [vmem:[%s10080_s7 + $0x18] sm:$0xff]  ;;  %v4625_v13 = vld [vmem:[%s10080_s7 + $0x10] sm:$0xff] }
 0x1e4   :  { %v2172_v34 = vpop.f32.mrf.mxu0  ;;  %5063 = vmatprep.subr.mxu1 %v4626_v47 }
 0x1e5   :  { %v2173_v61 = vadd.f32 %v8893_v46, %v2172_v34  ;;  %v3017_v51 = vsel %vm2761_vm6, %v2163_v49, %v2889_v28  ;;  %v2892_v24 = vmul.f32 0.2, %v2178_v52  ;;  %vm2764_vm7 = vcmp.gt.f32.partialorder %v2178_v52, 0.0  ;;  %5064 = vmatpush1.msra.mxu1 %v4625_v13 }
 0x1e6   :  { %v7332_v35 = vpop.f32.mrf.mxu0  ;;  %7532 = vmatprep.mubr.msk.f32.mxu0 %vm1661_vm2, %v3017_v51 }
 0x1e7   :  { %v2891_v8 = vmul.f32 0.2, %v2173_v61  ;;  %v2188_v32 = vadd.f32 %v7332_v35, %v8893_v46  ;;  %7533 = vmatmul.mubr.msk.f32.gmra.mxu0 %vm1661_vm2, %v3018_v2  ;;  %vm2763_vm8 = vcmp.gt.f32.partialorder %v2173_v61, 0.0  ;;  %v3020_v12 = vsel %vm2764_vm7, %v2178_v52, %v2892_v24 }
 0x1e8   :  { %v2182_v58 = vpop.f32.mrf.mxu0 }
 0x1e9   :  { %v2183_v5 = vadd.f32 %v8893_v46, %v2182_v58  ;;  %v3019_v29 = vsel %vm2763_vm8, %v2173_v61, %v2891_v8  ;;  %v2894_v11 = vmul.f32 0.2, %v2188_v32  ;;  %vm2766_vm9 = vcmp.gt.f32.partialorder %v2188_v32, 0.0 }
 0x1ea   :  { %v7335_v44 = vpop.f32.mrf.mxu0  ;;  %7535 = vmatprep.mubr.msk.f32.mxu0 %vm1661_vm2, %v3019_v29 }
 0x1eb   :  { %v2893_v20 = vmul.f32 0.2, %v2183_v5  ;;  %v2198_v9 = vadd.f32 %v7335_v44, %v8893_v46  ;;  %7536 = vmatmul.mubr.msk.f32.gmra.mxu0 %vm1661_vm2, %v3020_v12  ;;  %vm2765_vm10 = vcmp.gt.f32.partialorder %v2183_v5, 0.0  ;;  %v3022_v17 = vsel %vm2766_vm9, %v2188_v32, %v2894_v11 }
 0x1ec   :  { %v2192_v22 = vpop.f32.mrf.mxu0 }
 0x1ed   :  { %v2193_v39 = vadd.f32 %v8893_v46, %v2192_v22  ;;  %v3021_v18 = vsel %vm2765_vm10, %v2183_v5, %v2893_v20  ;;  %v2896_v62 = vmul.f32 0.2, %v2198_v9  ;;  %vm2768_vm11 = vcmp.gt.f32.partialorder %v2198_v9, 0.0 }
 0x1ee   :  { %v7338_v59 = vpop.f32.mrf.mxu0  ;;  %7538 = vmatprep.mubr.msk.f32.mxu0 %vm1661_vm2, %v3021_v18 }
 0x1ef   :  { %v2895_v15 = vmul.f32 0.2, %v2193_v39  ;;  %v2208_v38 = vadd.f32 %v7338_v59, %v8893_v46  ;;  %7539 = vmatmul.mubr.msk.f32.gmra.mxu0 %vm1661_vm2, %v3022_v17  ;;  %vm2767_vm12 = vcmp.gt.f32.partialorder %v2193_v39, 0.0  ;;  %v3024_v45 = vsel %vm2768_vm11, %v2198_v9, %v2896_v62 }
 0x1f0   :  { %v2202_v42 = vpop.f32.mrf.mxu0 }
 0x1f1   :  { %v2203_v54 = vadd.f32 %v8893_v46, %v2202_v42  ;;  %v3023_v21 = vsel %vm2767_vm12, %v2193_v39, %v2895_v15  ;;  %v2898_v10 = vmul.f32 0.2, %v2208_v38  ;;  %vm2770_vm13 = vcmp.gt.f32.partialorder %v2208_v38, 0.0 }
 0x1f2   :  { %v7341_v36 = vpop.f32.mrf.mxu0  ;;  %7541 = vmatprep.mubr.msk.f32.mxu0 %vm1661_vm2, %v3023_v21 }
 0x1f3   :  { %v2897_v23 = vmul.f32 0.2, %v2203_v54  ;;  %v2218_v40 = vadd.f32 %v7341_v36, %v8893_v46  ;;  %7542 = vmatmul.mubr.msk.f32.gmra.mxu0 %vm1661_vm2, %v3024_v45  ;;  %vm2769_vm14 = vcmp.gt.f32.partialorder %v2203_v54, 0.0  ;;  %v3026_v56 = vsel %vm2770_vm13, %v2208_v38, %v2898_v10  ;;  %v4624_v10 = vld [vmem:[%s10080_s7 + $0x8] sm:$0xff]  ;;  %v4623_v36 = vld [vmem:[%s10080_s7] sm:$0xff] }
 0x1f4   :  { %v2212_v25 = vpop.f32.mrf.mxu0  ;;  %5065 = vmatprep.subr.mxu1 %v4624_v10 }
 0x1f5   :  { %v2213_v6 = vadd.f32 %v8893_v46, %v2212_v25  ;;  %v3025_v57 = vsel %vm2769_vm14, %v2203_v54, %v2897_v23  ;;  %v2900_v27 = vmul.f32 0.2, %v2218_v40  ;;  %vm2772_vm15 = vcmp.gt.f32.partialorder %v2218_v40, 0.0  ;;  %5066 = vmatpush1.msra.mxu1 %v4623_v36 }
 0x1f6   :  { %v7344_v19 = vpop.f32.mrf.mxu0  ;;  %7544 = vmatprep.mubr.msk.f32.mxu0 %vm1661_vm2, %v3025_v57 }
 0x1f7   :  { %v2899_v50 = vmul.f32 0.2, %v2213_v6  ;;  %v2228_v33 = vadd.f32 %v7344_v19, %v8893_v46  ;;  %7545 = vmatmul.mubr.msk.f32.gmra.mxu0 %vm1661_vm2, %v3026_v56  ;;  %vm2771_vm0 = vcmp.gt.f32.partialorder %v2213_v6, 0.0  ;;  %v3028_v37 = vsel %vm2772_vm15, %v2218_v40, %v2900_v27 }
 0x1f8   :  { %v2222_v26 = vpop.f32.mrf.mxu0 }
 0x1f9   :  { %v2223_v1 = vadd.f32 %v8893_v46, %v2222_v26  ;;  %v3027_v53 = vsel %vm2771_vm0, %v2213_v6, %v2899_v50  ;;  %v2902_v14 = vmul.f32 0.2, %v2228_v33  ;;  %vm2774_vm1 = vcmp.gt.f32.partialorder %v2228_v33, 0.0 }
 0x1fa   :  { %v7347_v7 = vpop.f32.mrf.mxu0  ;;  %7547 = vmatprep.mubr.msk.f32.mxu0 %vm1661_vm2, %v3027_v53 }
 0x1fb   :  { %v2901_v41 = vmul.f32 0.2, %v2223_v1  ;;  %v2238_v43 = vadd.f32 %v7347_v7, %v8893_v46  ;;  %7548 = vmatmul.mubr.msk.f32.gmra.mxu0 %vm1661_vm2, %v3028_v37  ;;  %vm2773_vm3 = vcmp.gt.f32.partialorder %v2223_v1, 0.0  ;;  %v3030_v4 = vsel %vm2774_vm1, %v2228_v33, %v2902_v14 }
 0x1fc   :  { %v2232_v0 = vpop.f32.mrf.mxu0 }
 0x1fd   :  { %v2233_v30 = vadd.f32 %v8893_v46, %v2232_v0  ;;  %v3029_v55 = vsel %vm2773_vm3, %v2223_v1, %v2901_v41  ;;  %v2904_v31 = vmul.f32 0.2, %v2238_v43  ;;  %vm2776_vm4 = vcmp.gt.f32.partialorder %v2238_v43, 0.0 }
 0x1fe   :  { %v7350_v3 = vpop.f32.mrf.mxu0  ;;  %7550 = vmatprep.mubr.msk.f32.mxu0 %vm1661_vm2, %v3029_v55 }
 0x1ff   :  { %v2903_v49 = vmul.f32 0.2, %v2233_v30  ;;  %v2248_v60 = vadd.f32 %v7350_v3, %v8893_v46  ;;  %7551 = vmatmul.mubr.msk.f32.gmra.mxu0 %vm1661_vm2, %v3030_v4  ;;  %vm2775_vm5 = vcmp.gt.f32.partialorder %v2233_v30, 0.0  ;;  %v3032_v34 = vsel %vm2776_vm4, %v2238_v43, %v2904_v31 }
 0x200   :  { %v2242_v63 = vpop.f32.mrf.mxu0 }
 0x201   :  { %v2243_v28 = vadd.f32 %v8893_v46, %v2242_v63  ;;  %v3031_v52 = vsel %vm2775_vm5, %v2233_v30, %v2903_v49  ;;  %v2906_v61 = vmul.f32 0.2, %v2248_v60  ;;  %vm2778_vm6 = vcmp.gt.f32.partialorder %v2248_v60, 0.0 }
 0x202   :  { %v7353_v51 = vpop.f32.mrf.mxu0  ;;  %7553 = vmatprep.mubr.msk.f32.mxu0 %vm1661_vm2, %v3031_v52  ;;  %v7754_v63 = vmov 0.0  }
 0x203   :  { %v2905_v2 = vmul.f32 0.2, %v2243_v28  ;;  %v2258_v24 = vadd.f32 %v7353_v51, %v8893_v46  ;;  %7554 = vmatmul.mubr.msk.f32.gmra.mxu0 %vm1661_vm2, %v3032_v34  ;;  %vm2777_vm7 = vcmp.gt.f32.partialorder %v2243_v28, 0.0  ;;  %v3034_v58 = vsel %vm2778_vm6, %v2248_v60, %v2906_v61  ;;  %5099 = vmatprep.mubr.f32.mxu1 %v7754_v63 }
 0x204   :  { %v2252_v35 = vpop.f32.mrf.mxu0 }
 0x205   :  { %v2253_v8 = vadd.f32 %v8893_v46, %v2252_v35  ;;  %v3033_v32 = vsel %vm2777_vm7, %v2243_v28, %v2905_v2  ;;  %v2908_v5 = vmul.f32 0.2, %v2258_v24  ;;  %vm2780_vm8 = vcmp.gt.f32.partialorder %v2258_v24, 0.0 }
 0x206   :  { %v7356_v29 = vpop.f32.mrf.mxu0  ;;  %7556 = vmatprep.mubr.msk.f32.mxu0 %vm1661_vm2, %v3033_v32 }
 0x207   :  { %v2907_v12 = vmul.f32 0.2, %v2253_v8  ;;  %v2268_v11 = vadd.f32 %v7356_v29, %v8893_v46  ;;  %7557 = vmatmul.mubr.msk.f32.gmra.mxu0 %vm1661_vm2, %v3034_v58  ;;  %vm2779_vm9 = vcmp.gt.f32.partialorder %v2253_v8, 0.0  ;;  %v3036_v22 = vsel %vm2780_vm8, %v2258_v24, %v2908_v5 }
 0x208   :  { %v2262_v44 = vpop.f32.mrf.mxu0 }
 0x209   :  { %v2263_v20 = vadd.f32 %v8893_v46, %v2262_v44  ;;  %v3035_v9 = vsel %vm2779_vm9, %v2253_v8, %v2907_v12  ;;  %v2910_v39 = vmul.f32 0.2, %v2268_v11  ;;  %vm2782_vm10 = vcmp.gt.f32.partialorder %v2268_v11, 0.0 }
 0x20a   :  { %v7359_v18 = vpop.f32.mrf.mxu0  ;;  %7559 = vmatprep.mubr.msk.f32.mxu0 %vm1661_vm2, %v3035_v9 }
 0x20b   :  { %v2909_v17 = vmul.f32 0.2, %v2263_v20  ;;  %v2278_v62 = vadd.f32 %v7359_v18, %v8893_v46  ;;  %7560 = vmatmul.mubr.msk.f32.gmra.mxu0 %vm1661_vm2, %v3036_v22  ;;  %vm2781_vm11 = vcmp.gt.f32.partialorder %v2263_v20, 0.0  ;;  %v3038_v42 = vsel %vm2782_vm10, %v2268_v11, %v2910_v39 }
 0x20c   :  { %v2272_v59 = vpop.f32.mrf.mxu0 }
 0x20d   :  { %v2273_v15 = vadd.f32 %v8893_v46, %v2272_v59  ;;  %v3037_v38 = vsel %vm2781_vm11, %v2263_v20, %v2909_v17  ;;  %v2912_v48 = vmul.f32 0.2, %v2278_v62  ;;  %vm2784_vm12 = vcmp.gt.f32.partialorder %v2278_v62, 0.0 }
 0x20e   :  { %v7362_v16 = vpop.f32.mrf.mxu0  ;;  %7562 = vmatprep.mubr.msk.f32.mxu0 %vm1661_vm2, %v3037_v38 }
 0x20f   :  { %v2911_v54 = vmul.f32 0.2, %v2273_v15  ;;  %v2288_v21 = vadd.f32 %v7362_v16, %v8893_v46  ;;  %7563 = vmatmul.mubr.msk.f32.gmra.mxu0 %vm1661_vm2, %v3038_v42  ;;  %vm2783_vm13 = vcmp.gt.f32.partialorder %v2273_v15, 0.0  ;;  %v3040_v25 = vsel %vm2784_vm12, %v2278_v62, %v2912_v48 }
 0x210   :  { %v2282_v45 = vpop.f32.mrf.mxu0 }
 0x211   :  { %v2283_v23 = vadd.f32 %v8893_v46, %v2282_v45  ;;  %v3039_v40 = vsel %vm2783_vm13, %v2273_v15, %v2911_v54  ;;  %v2914_v6 = vmul.f32 0.2, %v2288_v21  ;;  %vm2786_vm14 = vcmp.gt.f32.partialorder %v2288_v21, 0.0 }
 0x212   :  { %v7365_v57 = vpop.f32.mrf.mxu0  ;;  %7565 = vmatprep.mubr.msk.f32.mxu0 %vm1661_vm2, %v3039_v40 }
 0x213   :  { %v2913_v56 = vmul.f32 0.2, %v2283_v23  ;;  %v2298_v27 = vadd.f32 %v7365_v57, %v8893_v46  ;;  %7566 = vmatmul.mubr.msk.f32.gmra.mxu0 %vm1661_vm2, %v3040_v25  ;;  %vm2785_vm15 = vcmp.gt.f32.partialorder %v2283_v23, 0.0  ;;  %v3042_v26 = vsel %vm2786_vm14, %v2288_v21, %v2914_v6 }
 0x214   :  { %v2292_v19 = vpop.f32.mrf.mxu0 }
 0x215   :  { %v2293_v50 = vadd.f32 %v8893_v46, %v2292_v19  ;;  %v3041_v33 = vsel %vm2785_vm15, %v2283_v23, %v2913_v56  ;;  %v2916_v1 = vmul.f32 0.2, %v2298_v27  ;;  %vm2788_vm0 = vcmp.gt.f32.partialorder %v2298_v27, 0.0 }
 0x216   :  { %v7368_v53 = vpop.f32.mrf.mxu0  ;;  %7568 = vmatprep.mubr.msk.f32.mxu0 %vm1661_vm2, %v3041_v33 }
 0x217   :  { %v2915_v37 = vmul.f32 0.2, %v2293_v50  ;;  %v2308_v14 = vadd.f32 %v7368_v53, %v8893_v46  ;;  %v9004_v7 = vpop.f32.mrf.mxu1  ;;  %7569 = vmatmul.mubr.msk.f32.gmra.mxu0 %vm1661_vm2, %v3042_v26  ;;  %vm2787_vm1 = vcmp.gt.f32.partialorder %v2293_v50, 0.0  ;;  %v3044_v55 = vsel %vm2788_vm0, %v2298_v27, %v2916_v1 }
 0x218   :  { %v2302_v41 = vpop.f32.mrf.mxu0 }
 0x219   :  { %v2303_v43 = vadd.f32 %v8893_v46, %v2302_v41  ;;  %v9008_v0 = vpop.f32.mrf.mxu1  ;;  %v3043_v30 = vsel %vm2787_vm1, %v2293_v50, %v2915_v37  ;;  %v2918_v4 = vmul.f32 0.2, %v2308_v14  ;;  %vm2790_vm3 = vcmp.gt.f32.partialorder %v2308_v14, 0.0 }
 0x21a   :  { %v7371_v31 = vpop.f32.mrf.mxu0  ;;  %7571 = vmatprep.mubr.msk.f32.mxu0 %vm1661_vm2, %v3043_v30 }
 0x21b   :  { %v2917_v3 = vmul.f32 0.2, %v2303_v43  ;;  %v2318_v49 = vadd.f32 %v7371_v31, %v8893_v46  ;;  %v9012_v60 = vpop.f32.mrf.mxu1  ;;  %7572 = vmatmul.mubr.msk.f32.gmra.mxu0 %vm1661_vm2, %v3044_v55  ;;  %vm2789_vm4 = vcmp.gt.f32.partialorder %v2303_v43, 0.0  ;;  %v3046_v34 = vsel %vm2790_vm3, %v2308_v14, %v2918_v4 }
 0x21c   :  { %v2312_v47 = vpop.f32.mrf.mxu0 }
 0x21d   :  { %v2313_v13 = vadd.f32 %v8893_v46, %v2312_v47  ;;  %v9017_v28 = vpop.f32.mrf.mxu1  ;;  %v3045_v52 = vsel %vm2789_vm4, %v2303_v43, %v2917_v3  ;;  %v2920_v61 = vmul.f32 0.2, %v2318_v49  ;;  %vm2792_vm5 = vcmp.gt.f32.partialorder %v2318_v49, 0.0 }
 0x21e   :  { %v7374_v51 = vpop.f32.mrf.mxu0  ;;  %7574 = vmatprep.mubr.msk.f32.mxu0 %vm1661_vm2, %v3045_v52 }
 0x21f   :  { %v2919_v2 = vmul.f32 0.2, %v2313_v13  ;;  %v2328_v24 = vadd.f32 %v7374_v51, %v8893_v46  ;;  %v9021_v35 = vpop.f32.mrf.mxu1  ;;  %7575 = vmatmul.mubr.msk.f32.gmra.mxu0 %vm1661_vm2, %v3046_v34  ;;  %vm2791_vm6 = vcmp.gt.f32.partialorder %v2313_v13, 0.0  ;;  %v3048_v29 = vsel %vm2792_vm5, %v2318_v49, %v2920_v61 }
 0x220   :  { %v2322_v8 = vpop.f32.mrf.mxu0 }
 0x221   :  { %v2323_v32 = vadd.f32 %v8893_v46, %v2322_v8  ;;  %v9025_v58 = vpop.f32.mrf.mxu1  ;;  %v3047_v5 = vsel %vm2791_vm6, %v2313_v13, %v2919_v2  ;;  %v2922_v12 = vmul.f32 0.2, %v2328_v24  ;;  %vm2794_vm7 = vcmp.gt.f32.partialorder %v2328_v24, 0.0 }
 0x222   :  { %v7377_v11 = vpop.f32.mrf.mxu0  ;;  %7577 = vmatprep.mubr.msk.f32.mxu0 %vm1661_vm2, %v3047_v5 }
 0x223   :  { %v2921_v44 = vmul.f32 0.2, %v2323_v32  ;;  %v2338_v20 = vadd.f32 %v7377_v11, %v8893_v46  ;;  %v9029_v9 = vpop.f32.mrf.mxu1  ;;  %7578 = vmatmul.mubr.msk.f32.gmra.mxu0 %vm1661_vm2, %v3048_v29  ;;  %vm2793_vm8 = vcmp.gt.f32.partialorder %v2323_v32, 0.0  ;;  %v3050_v62 = vsel %vm2794_vm7, %v2328_v24, %v2922_v12 }
 0x224   :  { %v2332_v22 = vpop.f32.mrf.mxu0 }
 0x225   :  { %v2333_v39 = vadd.f32 %v8893_v46, %v2332_v22  ;;  %v9033_v18 = vpop.f32.mrf.mxu1  ;;  %v3049_v17 = vsel %vm2793_vm8, %v2323_v32, %v2921_v44  ;;  %v2924_v59 = vmul.f32 0.2, %v2338_v20  ;;  %vm2796_vm9 = vcmp.gt.f32.partialorder %v2338_v20, 0.0 }
 0x226   :  { %v7380_v15 = vpop.f32.mrf.mxu0  ;;  %7580 = vmatprep.mubr.msk.f32.mxu0 %vm1661_vm2, %v3049_v17 }
 0x227   :  { %v2923_v38 = vmul.f32 0.2, %v2333_v39  ;;  %v2348_v42 = vadd.f32 %v7380_v15, %v8893_v46  ;;  %v9037_v48 = vpop.f32.mrf.mxu1  ;;  %7581 = vmatmul.mubr.msk.f32.gmra.mxu0 %vm1661_vm2, %v3050_v62  ;;  %vm2795_vm10 = vcmp.gt.f32.partialorder %v2333_v39, 0.0  ;;  %v3052_v10 = vsel %vm2796_vm9, %v2338_v20, %v2924_v59 }
 0x228   :  { %v2342_v16 = vpop.f32.mrf.mxu0 }
 0x229   :  { %v2343_v54 = vadd.f32 %v8893_v46, %v2342_v16  ;;  %v9041_v21 = vpop.f32.mrf.mxu1  ;;  %v3051_v45 = vsel %vm2795_vm10, %v2333_v39, %v2923_v38  ;;  %v2926_v36 = vmul.f32 0.2, %v2348_v42  ;;  %vm2798_vm11 = vcmp.gt.f32.partialorder %v2348_v42, 0.0 }
 0x22a   :  { %v7383_v23 = vpop.f32.mrf.mxu0  ;;  %7583 = vmatprep.mubr.msk.f32.mxu0 %vm1661_vm2, %v3051_v45 }
 0x22b   :  { %v2925_v40 = vmul.f32 0.2, %v2343_v54  ;;  %v2358_v25 = vadd.f32 %v7383_v23, %v8893_v46  ;;  %v9045_v6 = vpop.f32.mrf.mxu1  ;;  %7584 = vmatmul.mubr.msk.f32.gmra.mxu0 %vm1661_vm2, %v3052_v10  ;;  %vm2797_vm12 = vcmp.gt.f32.partialorder %v2343_v54, 0.0  ;;  %v3054_v50 = vsel %vm2798_vm11, %v2348_v42, %v2926_v36 }
 0x22c   :  { %v2352_v57 = vpop.f32.mrf.mxu0 }
 0x22d   :  { %v2353_v56 = vadd.f32 %v8893_v46, %v2352_v57  ;;  %v9049_v27 = vpop.f32.mrf.mxu1  ;;  %v3053_v19 = vsel %vm2797_vm12, %v2343_v54, %v2925_v40  ;;  %v2928_v33 = vmul.f32 0.2, %v2358_v25  ;;  %vm2800_vm13 = vcmp.gt.f32.partialorder %v2358_v25, 0.0 }
 0x22e   :  { %v7386_v26 = vpop.f32.mrf.mxu0  ;;  %7586 = vmatprep.mubr.msk.f32.mxu0 %vm1661_vm2, %v3053_v19 }
 0x22f   :  { %v2927_v1 = vmul.f32 0.2, %v2353_v56  ;;  %v2368_v53 = vadd.f32 %v7386_v26, %v8893_v46  ;;  %v9053_v37 = vpop.f32.mrf.mxu1  ;;  %7587 = vmatmul.mubr.msk.f32.gmra.mxu0 %vm1661_vm2, %v3054_v50  ;;  %vm2799_vm14 = vcmp.gt.f32.partialorder %v2353_v56, 0.0  ;;  %v3056_v55 = vsel %vm2800_vm13, %v2358_v25, %v2928_v33 }
 0x230   :  { %v2362_v14 = vpop.f32.mrf.mxu0 }
 0x231   :  { %v2363_v41 = vadd.f32 %v8893_v46, %v2362_v14  ;;  %v9057_v43 = vpop.f32.mrf.mxu1  ;;  %v3055_v30 = vsel %vm2799_vm14, %v2353_v56, %v2927_v1  ;;  %v2930_v4 = vmul.f32 0.2, %v2368_v53  ;;  %vm2802_vm15 = vcmp.gt.f32.partialorder %v2368_v53, 0.0 }
 0x232   :  { %v7389_v31 = vpop.f32.mrf.mxu0  ;;  %7589 = vmatprep.mubr.msk.f32.mxu0 %vm1661_vm2, %v3055_v30 }
 0x233   :  { %v2929_v3 = vmul.f32 0.2, %v2363_v41  ;;  %v2378_v49 = vadd.f32 %v7389_v31, %v8893_v46  ;;  %v9061_v47 = vpop.f32.mrf.mxu1  ;;  %7590 = vmatmul.mubr.msk.f32.gmra.mxu0 %vm1661_vm2, %v3056_v55  ;;  %vm2801_vm0 = vcmp.gt.f32.partialorder %v2363_v41, 0.0  ;;  %v3058_v51 = vsel %vm2802_vm15, %v2368_v53, %v2930_v4 }
 0x234   :  { %v2372_v13 = vpop.f32.mrf.mxu0 }
 0x235   :  { %v2373_v52 = vadd.f32 %v8893_v46, %v2372_v13  ;;  %v9065_v34 = vpop.f32.mrf.mxu1  ;;  %v3057_v61 = vsel %vm2801_vm0, %v2363_v41, %v2929_v3  ;;  %v2932_v2 = vmul.f32 0.2, %v2378_v49  ;;  %vm2804_vm1 = vcmp.gt.f32.partialorder %v2378_v49, 0.0 }
 0x236   :  { %v7392_v24 = vpop.f32.mrf.mxu0  ;;  %7592 = vmatprep.mubr.msk.f32.mxu0 %vm1661_vm2, %v3057_v61 }
 0x237   :  { %v2931_v8 = vmul.f32 0.2, %v2373_v52  ;;  %v2388_v32 = vadd.f32 %v7392_v24, %v8893_v46  ;;  %v9069_v5 = vpop.f32.mrf.mxu1  ;;  %7593 = vmatmul.mubr.msk.f32.gmra.mxu0 %vm1661_vm2, %v3058_v51  ;;  %vm2803_vm3 = vcmp.gt.f32.partialorder %v2373_v52, 0.0  ;;  %v3060_v20 = vsel %vm2804_vm1, %v2378_v49, %v2932_v2 }
 0x238   :  { %v2382_v29 = vpop.f32.mrf.mxu0 }
 0x239   :  { %v2383_v12 = vadd.f32 %v8893_v46, %v2382_v29  ;;  %v9073_v11 = vpop.f32.mrf.mxu1  ;;  %v3059_v44 = vsel %vm2803_vm3, %v2373_v52, %v2931_v8  ;;  %v2934_v22 = vmul.f32 0.2, %v2388_v32  ;;  %vm2806_vm4 = vcmp.gt.f32.partialorder %v2388_v32, 0.0 }
 0x23a   :  { %v7395_v39 = vpop.f32.mrf.mxu0  ;;  %7595 = vmatprep.mubr.msk.f32.mxu0 %vm1661_vm2, %v3059_v44 }
 0x23b   :  { %v2933_v17 = vmul.f32 0.2, %v2383_v12  ;;  %v2398_v62 = vadd.f32 %v7395_v39, %v8893_v46  ;;  %v9077_v59 = vpop.f32.mrf.mxu1  ;;  %7596 = vmatmul.mubr.msk.f32.gmra.mxu0 %vm1661_vm2, %v3060_v20  ;;  %vm2805_vm5 = vcmp.gt.f32.partialorder %v2383_v12, 0.0  ;;  %v3062_v54 = vsel %vm2806_vm4, %v2388_v32, %v2934_v22 }
 0x23c   :  { %v2392_v15 = vpop.f32.mrf.mxu0  ;;  %v2443_v32 = vadd.f32 %v8893_v46, %v9008_v0 }
 0x23d   :  { %v2393_v38 = vadd.f32 %v8893_v46, %v2392_v15  ;;  %v9081_v42 = vpop.f32.mrf.mxu1  ;;  %v3061_v16 = vsel %vm2805_vm5, %v2383_v12, %v2933_v17  ;;  %v2936_v45 = vmul.f32 0.2, %v2398_v62  ;;  %vm2808_vm6 = vcmp.gt.f32.partialorder %v2398_v62, 0.0 }
 0x23e   :  { %v7398_v10 = vpop.f32.mrf.mxu0  ;;  %7598 = vmatprep.mubr.msk.f32.mxu0 %vm1661_vm2, %v3061_v16  ;;  %v2945_v16 = vmul.f32 0.2, %v2443_v32  ;;  %vm2817_vm0 = vcmp.gt.f32.partialorder %v2443_v32, 0.0 }
 0x23f   :  { %v2935_v36 = vmul.f32 0.2, %v2393_v38  ;;  %v2408_v23 = vadd.f32 %v7398_v10, %v8893_v46  ;;  %v9085_v40 = vpop.f32.mrf.mxu1  ;;  %7599 = vmatmul.mubr.msk.f32.gmra.mxu0 %vm1661_vm2, %v3062_v54  ;;  %vm2807_vm7 = vcmp.gt.f32.partialorder %v2393_v38, 0.0  ;;  %v3064_v50 = vsel %vm2808_vm6, %v2398_v62, %v2936_v45 }
 0x240   :  { %v2402_v25 = vpop.f32.mrf.mxu0  ;;  %v2453_v10 = vadd.f32 %v8893_v46, %v9017_v28 }
 0x241   :  { %v2403_v57 = vadd.f32 %v8893_v46, %v2402_v25  ;;  %v9089_v56 = vpop.f32.mrf.mxu1  ;;  %v3063_v19 = vsel %vm2807_vm7, %v2393_v38, %v2935_v36  ;;  %v2938_v33 = vmul.f32 0.2, %v2408_v23  ;;  %vm2810_vm8 = vcmp.gt.f32.partialorder %v2408_v23, 0.0 }
 0x242   :  { %v7401_v26 = vpop.f32.mrf.mxu0  ;;  %7601 = vmatprep.mubr.msk.f32.mxu0 %vm1661_vm2, %v3063_v19  ;;  %v2448_v38 = vadd.f32 %v9004_v7, %v8893_v46  ;;  %v2458_v19 = vadd.f32 %v9012_v60, %v8893_v46  ;;  %v2947_v28 = vmul.f32 0.2, %v2453_v10  ;;  %vm2819_vm3 = vcmp.gt.f32.partialorder %v2453_v10, 0.0 }
 0x243   :  { %v2937_v1 = vmul.f32 0.2, %v2403_v57  ;;  %v2418_v53 = vadd.f32 %v7401_v26, %v8893_v46  ;;  %v9093_v14 = vpop.f32.mrf.mxu1  ;;  %7602 = vmatmul.mubr.msk.f32.gmra.mxu0 %vm1661_vm2, %v3064_v50  ;;  %vm2809_vm9 = vcmp.gt.f32.partialorder %v2403_v57, 0.0  ;;  %v3066_v31 = vsel %vm2810_vm8, %v2408_v23, %v2938_v33 }
 0x244   :  { %v2412_v41 = vpop.f32.mrf.mxu0  ;;  %v2946_v7 = vmul.f32 0.2, %v2448_v38  ;;  %vm2818_vm1 = vcmp.gt.f32.partialorder %v2448_v38, 0.0  ;;  %v2463_v33 = vadd.f32 %v8893_v46, %v9025_v58  ;;  %v2948_v60 = vmul.f32 0.2, %v2458_v19 }
 0x245   :  { %v2413_v30 = vadd.f32 %v8893_v46, %v2412_v41  ;;  %v9097_v55 = vpop.f32.mrf.mxu1  ;;  %v3065_v4 = vsel %vm2809_vm9, %v2403_v57, %v2937_v1  ;;  %v2940_v3 = vmul.f32 0.2, %v2418_v53  ;;  %vm2812_vm10 = vcmp.gt.f32.partialorder %v2418_v53, 0.0 }
 0x246   :  { %v7404_v49 = vpop.f32.mrf.mxu0  ;;  %7604 = vmatprep.mubr.msk.f32.mxu0 %vm1661_vm2, %v3065_v4  ;;  %v3073_v1 = vsel %vm2817_vm0, %v2443_v32, %v2945_v16  ;;  %v3074_v41 = vsel %vm2818_vm1, %v2448_v38, %v2946_v7  ;;  %vm2820_vm4 = vcmp.gt.f32.partialorder %v2458_v19, 0.0  ;;  %v2949_v4 = vmul.f32 0.2, %v2463_v33 }
 0x247   :  { %v2939_v13 = vmul.f32 0.2, %v2413_v30  ;;  %v2428_v52 = vadd.f32 %v7404_v49, %v8893_v46  ;;  %v9101_v61 = vpop.f32.mrf.mxu1  ;;  %7605 = vmatmul.mubr.msk.f32.gmra.mxu0 %vm1661_vm2, %v3066_v31  ;;  %vm2811_vm11 = vcmp.gt.f32.partialorder %v2413_v30, 0.0  ;;  %v3068_v29 = vsel %vm2812_vm10, %v2418_v53, %v2940_v3 }
 0x248   :  { %v2422_v51 = vpop.f32.mrf.mxu0  ;;  %v2473_v58 = vadd.f32 %v8893_v46, %v9033_v18  ;;  %v3075_v3 = vsel %vm2819_vm3, %v2453_v10, %v2947_v28  ;;  %vm2821_vm5 = vcmp.gt.f32.partialorder %v2463_v33, 0.0  ;;  %v2483_v18 = vadd.f32 %v8893_v46, %v9041_v21 }
 0x249   :  { %v2423_v2 = vadd.f32 %v8893_v46, %v2422_v51  ;;  %v9105_v24 = vpop.f32.mrf.mxu1  ;;  %v3067_v8 = vsel %vm2811_vm11, %v2413_v30, %v2939_v13  ;;  %v2942_v12 = vmul.f32 0.2, %v2428_v52  ;;  %vm2814_vm12 = vcmp.gt.f32.partialorder %v2428_v52, 0.0 }
 0x24a   :  { %v7407_v44 = vpop.f32.mrf.mxu0  ;;  %7607 = vmatprep.mubr.msk.f32.mxu0 %vm1661_vm2, %v3067_v8  ;;  %v2468_v30 = vadd.f32 %v9021_v35, %v8893_v46  ;;  %v3076_v13 = vsel %vm2820_vm4, %v2458_v19, %v2948_v60  ;;  %v2478_v35 = vadd.f32 %v9029_v9, %v8893_v46  ;;  %v2951_v51 = vmul.f32 0.2, %v2473_v58 }
 0x24b   :  { %v2941_v20 = vmul.f32 0.2, %v2423_v2  ;;  %v2438_v22 = vadd.f32 %v7407_v44, %v8893_v46  ;;  %v9111_v39 = vpop.f32.mrf.mxu1  ;;  %7608 = vmatmul.mubr.msk.f32.gmra.mxu0 %vm1661_vm2, %v3068_v29  ;;  %vm2813_vm13 = vcmp.gt.f32.partialorder %v2423_v2, 0.0  ;;  %v3070_v54 = vsel %vm2814_vm12, %v2428_v52, %v2942_v12 }
 0x24c   :  { %v2432_v17 = vpop.f32.mrf.mxu0  ;;  %v2950_v52 = vmul.f32 0.2, %v2468_v30  ;;  %vm2822_vm6 = vcmp.gt.f32.partialorder %v2468_v30, 0.0  ;;  %v3077_v8 = vsel %vm2821_vm5, %v2463_v33, %v2949_v4  ;;  %vm2823_vm7 = vcmp.gt.f32.partialorder %v2473_v58, 0.0 }
 0x24d   :  { %v2433_v62 = vadd.f32 %v8893_v46, %v2432_v17  ;;  %v9115_v15 = vpop.f32.mrf.mxu1  ;;  %v3069_v0 = vsel %vm2813_vm13, %v2423_v2, %v2941_v20  ;;  %v2944_v45 = vmul.f32 0.2, %v2438_v22  ;;  %vm2816_vm14 = vcmp.gt.f32.partialorder %v2438_v22, 0.0 }
 0x24e   :  { %7610 = vmatprep.mubr.msk.f32.mxu0 %vm1661_vm2, %v3069_v0  ;;  %v3078_v29 = vsel %vm2822_vm6, %v2468_v30, %v2950_v52  ;;  %v2952_v12 = vmul.f32 0.2, %v2478_v35  ;;  %v2488_v9 = vadd.f32 %v9037_v48, %v8893_v46  ;;  %vm2824_vm8 = vcmp.gt.f32.partialorder %v2478_v35, 0.0  ;;  %v9171_v48 = vld [vmem:[%s10077_s4] ss:$0 sm:$0xff] }
 0x24f   :  { %v2943_v36 = vmul.f32 0.2, %v2433_v62  ;;  %v9122_v23 = vpop.f32.mrf.mxu1  ;;  %7611 = vmatmul.mubr.msk.f32.gmra.mxu0 %vm1661_vm2, %v3070_v54  ;;  %vm2815_vm15 = vcmp.gt.f32.partialorder %v2433_v62, 0.0  ;;  %v3072_v50 = vsel %vm2816_vm14, %v2438_v22, %v2944_v45  ;;  %v2953_v44 = vmul.f32 0.2, %v2483_v18 }
 0x250   :  { %v2493_v21 = vadd.f32 %v8893_v46, %v9049_v27  ;;  %v3079_v22 = vsel %vm2823_vm7, %v2473_v58, %v2951_v51  ;;  %vm2825_vm9 = vcmp.gt.f32.partialorder %v2483_v18, 0.0  ;;  %v2954_v0 = vmul.f32 0.2, %v2488_v9 }
 0x251   :  { %v9125_v25 = vpop.f32.mrf.mxu1  ;;  %v3071_v57 = vsel %vm2815_vm15, %v2433_v62, %v2943_v36  ;;  %v3080_v62 = vsel %vm2824_vm8, %v2478_v35, %v2952_v12  ;;  %v2498_v46 = vadd.f32 %v9171_v48, %v9045_v6  ;;  %vm2826_vm10 = vcmp.gt.f32.partialorder %v2488_v9, 0.0 }
 0x252   :  { %7613 = vmatprep.mubr.msk.f32.mxu0 %vm1661_vm2, %v3071_v57  ;;  %v2955_v27 = vmul.f32 0.2, %v2493_v21  ;;  %v2503_v38 = vadd.f32 %v9171_v48, %v9057_v43  ;;  %v3081_v16 = vsel %vm2825_vm9, %v2483_v18, %v2953_v44  ;;  %vm2827_vm11 = vcmp.gt.f32.partialorder %v2493_v21, 0.0 }
 0x253   :  { %v9132_v26 = vpop.f32.mrf.mxu1  ;;  %7614 = vmatmul.mubr.msk.f32.gmra.mxu0 %vm1661_vm2, %v3072_v50  ;;  %v3082_v45 = vsel %vm2826_vm10, %v2488_v9, %v2954_v0  ;;  %v2956_v10 = vmul.f32 0.2, %v2498_v46  ;;  %v2508_v36 = vadd.f32 %v9171_v48, %v9053_v37  ;;  %vm2828_vm12 = vcmp.gt.f32.partialorder %v2498_v46, 0.0 }
 0x254   :  { %7616 = vmatprep.mubr.msk.f32.mxu0 %vm1661_vm2, %v3073_v1  ;;  %v2957_v6 = vmul.f32 0.2, %v2503_v38  ;;  %v2513_v57 = vadd.f32 %v9171_v48, %v9065_v34  ;;  %v3083_v43 = vsel %vm2827_vm11, %v2493_v21, %v2955_v27  ;;  %vm2829_vm13 = vcmp.gt.f32.partialorder %v2503_v38, 0.0 }
 0x255   :  { %v9136_v53 = vpop.f32.mrf.mxu1  ;;  %v3084_v19 = vsel %vm2828_vm12, %v2498_v46, %v2956_v10  ;;  %v2958_v50 = vmul.f32 0.2, %v2508_v36  ;;  %v2518_v28 = vadd.f32 %v9171_v48, %v9061_v47  ;;  %vm2830_vm14 = vcmp.gt.f32.partialorder %v2508_v36, 0.0 }
 0x256   :  { %v2959_v37 = vmul.f32 0.2, %v2513_v57  ;;  %v2523_v33 = vadd.f32 %v9171_v48, %v9073_v11  ;;  %v3085_v34 = vsel %vm2829_vm13, %v2503_v38, %v2957_v6  ;;  %vm2831_vm15 = vcmp.gt.f32.partialorder %v2513_v57, 0.0 }
 0x257   :  { %v9142_v31 = vpop.f32.mrf.mxu1  ;;  %7617 = vmatmul.mubr.msk.f32.gmra.mxu0 %vm1661_vm2, %v3074_v41  ;;  %v3086_v41 = vsel %vm2830_vm14, %v2508_v36, %v2958_v50  ;;  %v2960_v60 = vmul.f32 0.2, %v2518_v28  ;;  %v2528_v30 = vadd.f32 %v9171_v48, %v9069_v5  ;;  %vm2832_vm0 = vcmp.gt.f32.partialorder %v2518_v28, 0.0 }
 0x258   :  { %7619 = vmatprep.mubr.msk.f32.mxu0 %vm1661_vm2, %v3075_v3  ;;  %v2961_v47 = vmul.f32 0.2, %v2523_v33  ;;  %v2533_v4 = vadd.f32 %v9171_v48, %v9081_v42  ;;  %v3087_v11 = vsel %vm2831_vm15, %v2513_v57, %v2959_v37  ;;  %vm2833_vm1 = vcmp.gt.f32.partialorder %v2523_v33, 0.0 }
 0x259   :  { %v9146_v49 = vpop.f32.mrf.mxu1  ;;  %v3088_v3 = vsel %vm2832_vm0, %v2518_v28, %v2960_v60  ;;  %v2538_v52 = vadd.f32 %v9171_v48, %v9077_v59  ;;  %vm2834_vm3 = vcmp.gt.f32.partialorder %v2528_v30, 0.0  ;;  %v2543_v35 = vadd.f32 %v9171_v48, %v9089_v56 }
 0x25a   :  { %v2963_v5 = vmul.f32 0.2, %v2533_v4  ;;  %v3089_v42 = vsel %vm2833_vm1, %v2523_v33, %v2961_v47  ;;  %vm2835_vm4 = vcmp.gt.f32.partialorder %v2533_v4, 0.0  ;;  %v2553_v12 = vadd.f32 %v9171_v48, %v9097_v55 }
 0x25b   :  { %v9152_v2 = vpop.f32.mrf.mxu1  ;;  %7620 = vmatmul.mubr.msk.f32.gmra.mxu0 %vm1661_vm2, %v3076_v13  ;;  %v2962_v13 = vmul.f32 0.2, %v2528_v30  ;;  %vm2836_vm5 = vcmp.gt.f32.partialorder %v2538_v52, 0.0  ;;  %v2965_v59 = vmul.f32 0.2, %v2543_v35  ;;  %vm2837_vm6 = vcmp.gt.f32.partialorder %v2543_v35, 0.0 }
 0x25c   :  { %7622 = vmatprep.mubr.msk.f32.mxu0 %vm1661_vm2, %v3077_v8  ;;  %v2964_v8 = vmul.f32 0.2, %v2538_v52  ;;  %v3091_v56 = vsel %vm2835_vm4, %v2533_v4, %v2963_v5  ;;  %vm2839_vm8 = vcmp.gt.f32.partialorder %v2553_v12, 0.0  ;;  %v2568_v38 = vadd.f32 %v9171_v48, %v9101_v61 }
 0x25d   :  { %v9156_v32 = vpop.f32.mrf.mxu1  ;;  %v3090_v18 = vsel %vm2834_vm3, %v2528_v30, %v2962_v13  ;;  %v3093_v55 = vsel %vm2837_vm6, %v2543_v35, %v2965_v59  ;;  %v2578_v6 = vadd.f32 %v9171_v48, %v9111_v39  ;;  %v2583_v57 = vadd.f32 %v9171_v48, %v9125_v25 }
 0x25e   :  { %v3092_v44 = vsel %vm2836_vm5, %v2538_v52, %v2964_v8  ;;  %v2970_v36 = vmul.f32 0.2, %v2568_v38  ;;  %vm2842_vm11 = vcmp.gt.f32.partialorder %v2568_v38, 0.0  ;;  %v2588_v28 = vadd.f32 %v9171_v48, %v9122_v23 }
 0x25f   :  { %v9162_v20 = vpop.f32.mrf.mxu1  ;;  %7623 = vmatmul.mubr.msk.f32.gmra.mxu0 %vm1661_vm2, %v3078_v29  ;;  %v2548_v29 = vadd.f32 %v9171_v48, %v9085_v40  ;;  %v2967_v40 = vmul.f32 0.2, %v2553_v12  ;;  %v2972_v50 = vmul.f32 0.2, %v2578_v6  ;;  %vm2844_vm13 = vcmp.gt.f32.partialorder %v2578_v6, 0.0 }
 0x260   :  { %7625 = vmatprep.mubr.msk.f32.mxu0 %vm1661_vm2, %v3079_v22  ;;  %v2558_v22 = vadd.f32 %v9171_v48, %v9093_v14  ;;  %v2973_v39 = vmul.f32 0.2, %v2583_v57  ;;  %v2593_v37 = vadd.f32 %v9171_v48, %v9136_v53  ;;  %vm2845_vm14 = vcmp.gt.f32.partialorder %v2583_v57, 0.0 }
 0x261   :  { %v9166_v17 = vpop.f32.mrf.mxu1  ;;  %v2966_v21 = vmul.f32 0.2, %v2548_v29  ;;  %vm2838_vm7 = vcmp.gt.f32.partialorder %v2548_v29, 0.0  ;;  %v2598_v60 = vadd.f32 %v9171_v48, %v9132_v26  ;;  %vm2846_vm15 = vcmp.gt.f32.partialorder %v2588_v28, 0.0 }
 0x262   :  { %v2968_v27 = vmul.f32 0.2, %v2558_v22  ;;  %vm2840_vm9 = vcmp.gt.f32.partialorder %v2558_v22, 0.0  ;;  %v2975_v23 = vmul.f32 0.2, %v2593_v37  ;;  %v2603_v30 = vadd.f32 %v9171_v48, %v9146_v49 }
 0x263   :  { %7626 = vmatmul.mubr.msk.f32.gmra.mxu0 %vm1661_vm2, %v3080_v62  ;;  %v9178_v54 = vpop.f32.mrf.mxu1  ;;  %v2563_v62 = vadd.f32 %v9171_v48, %v9105_v24  ;;  %v3094_v46 = vsel %vm2838_vm7, %v2548_v29, %v2966_v21  ;;  %v3095_v24 = vsel %vm2839_vm8, %v2553_v12, %v2967_v40  ;;  %v3101_v53 = vsel %vm2845_vm14, %v2583_v57, %v2973_v39 }
 0x264   :  { %7628 = vmatprep.mubr.msk.f32.mxu0 %vm1661_vm2, %v3081_v16  ;;  %v2573_v16 = vadd.f32 %v9171_v48, %v9115_v15  ;;  %v3096_v10 = vsel %vm2840_vm9, %v2558_v22, %v2968_v27  ;;  %vm2847_vm0 = vcmp.gt.f32.partialorder %v2593_v37, 0.0  ;;  %vm2848_vm1 = vcmp.gt.f32.partialorder %v2598_v60, 0.0 }
 0x265   :  { %v9186_v7 = vpop.f32.mrf.mxu1  ;;  %v2969_v14 = vmul.f32 0.2, %v2563_v62  ;;  %vm2841_vm10 = vcmp.gt.f32.partialorder %v2563_v62, 0.0  ;;  %v2977_v26 = vmul.f32 0.2, %v2603_v30  ;;  %v2613_v13 = vadd.f32 %v9171_v48, %v9156_v32 }
 0x266   :  { %v2971_v61 = vmul.f32 0.2, %v2573_v16  ;;  %vm2843_vm12 = vcmp.gt.f32.partialorder %v2573_v16, 0.0  ;;  %v3103_v49 = vsel %vm2847_vm0, %v2593_v37, %v2975_v23  ;;  %vm2849_vm3 = vcmp.gt.f32.partialorder %v2603_v30, 0.0  ;;  %v9276_v32 = vld [vmem:[%s10079_s6] ss:$0 sm:$0xff] }
 0x267   :  { %7629 = vmatmul.mubr.msk.f32.gmra.mxu0 %vm1661_vm2, %v3082_v45  ;;  %v9194_v1 = vpop.f32.mrf.mxu1  ;;  %v3097_v15 = vsel %vm2841_vm10, %v2563_v62, %v2969_v14  ;;  %v2618_v5 = vadd.f32 %v9171_v48, %v9152_v2  ;;  %v3105_v29 = vsel %vm2849_vm3, %v2603_v30, %v2977_v26  ;;  %vm2851_vm5 = vcmp.gt.f32.partialorder %v2613_v13, 0.0 }
 0x268   :  { %7631 = vmatprep.mubr.msk.f32.mxu0 %vm1661_vm2, %v3083_v43  ;;  %v3099_v25 = vsel %vm2843_vm12, %v2573_v16, %v2971_v61  ;;  %v2628_v12 = vadd.f32 %v9171_v48, %v9162_v20  ;;  %v2633_v40 = vadd.f32 %v9171_v48, %v9186_v7  ;;  %v2638_v14 = vadd.f32 %v9171_v48, %v9178_v54 }
 0x269   :  { %v9202_v58 = vpop.f32.mrf.mxu1  ;;  %v2980_v2 = vmul.f32 0.2, %v2618_v5  ;;  %vm2852_vm6 = vcmp.gt.f32.partialorder %v2618_v5, 0.0 }
 0x26a   :  { %vm2854_vm9 = vcmp.gt.f32.partialorder %v2628_v12, 0.0  ;;  %vm2856_vm12 = vcmp.gt.f32.partialorder %v2638_v14, 0.0 }
 0x26b   :  { %7632 = vmatmul.mubr.msk.f32.gmra.mxu0 %vm1661_vm2, %v3084_v19  ;;  %v9210_v51 = vpop.f32.mrf.mxu1  ;;  %v3098_v19 = vsel %vm2842_vm11, %v2568_v38, %v2970_v36  ;;  %v3108_v20 = vsel %vm2852_vm6, %v2618_v5, %v2980_v2  ;;  %v2982_v38 = vmul.f32 0.2, %v2628_v12  ;;  %v2983_v36 = vmul.f32 0.2, %v2633_v40 }
 0x26c   :  { %7634 = vmatprep.mubr.msk.f32.mxu0 %vm1661_vm2, %v3085_v34  ;;  %v3100_v34 = vsel %vm2844_vm13, %v2578_v6, %v2972_v50  ;;  %v2643_v6 = vadd.f32 %v9171_v48, %v9202_v58  ;;  %vm2855_vm11 = vcmp.gt.f32.partialorder %v2633_v40, 0.0  ;;  %v2648_v50 = vadd.f32 %v9171_v48, %v9194_v1 }
 0x26d   :  { %v9218_v9 = vpop.f32.mrf.mxu1  ;;  %v3110_v54 = vsel %vm2854_vm9, %v2628_v12, %v2982_v38  ;;  %v2658_v30 = vadd.f32 %v9171_v48, %v9210_v51 }
 0x26e   :  { %v2985_v37 = vmul.f32 0.2, %v2643_v6  ;;  %vm2857_vm14 = vcmp.gt.f32.partialorder %v2643_v6, 0.0  ;;  %v2986_v23 = vmul.f32 0.2, %v2648_v50 }
 0x26f   :  { %7635 = vmatmul.mubr.msk.f32.gmra.mxu0 %vm1661_vm2, %v3086_v41  ;;  %v9226_v0 = vpop.f32.mrf.mxu1  ;;  %v2974_v41 = vmul.f32 0.2, %v2588_v28  ;;  %v2988_v5 = vmul.f32 0.2, %v2658_v30  ;;  %vm2860_vm3 = vcmp.gt.f32.partialorder %v2658_v30, 0.0 }
 0x270   :  { %7637 = vmatprep.mubr.msk.f32.mxu0 %vm1661_vm2, %v3087_v11  ;;  %v2976_v11 = vmul.f32 0.2, %v2598_v60 }
 0x271   :  { %v9234_v45 = vpop.f32.mrf.mxu1  ;;  %v3102_v4 = vsel %vm2846_vm15, %v2588_v28, %v2974_v41  ;;  %v3111_v41 = vsel %vm2855_vm11, %v2633_v40, %v2983_v36  ;;  %vm2858_vm15 = vcmp.gt.f32.partialorder %v2648_v50, 0.0 }
 0x272   :  { %v3104_v35 = vsel %vm2848_vm1, %v2598_v60, %v2976_v11  ;;  %v3114_v51 = vsel %vm2858_vm15, %v2648_v50, %v2986_v23 }
 0x273   :  { %7638 = vmatmul.mubr.msk.f32.gmra.mxu0 %vm1661_vm2, %v3088_v3  ;;  %v9242_v43 = vpop.f32.mrf.mxu1  ;;  %v2608_v3 = vadd.f32 %v9171_v48, %v9142_v31  ;;  %v2979_v31 = vmul.f32 0.2, %v2613_v13 }
 0x274   :  { %7640 = vmatprep.mubr.msk.f32.mxu0 %vm1661_vm2, %v3089_v42 }
 0x275   :  { %v9250_v33 = vpop.f32.mrf.mxu1  ;;  %v2978_v42 = vmul.f32 0.2, %v2608_v3  ;;  %vm2850_vm4 = vcmp.gt.f32.partialorder %v2608_v3, 0.0 }
 0x277   :  { %7641 = vmatmul.mubr.msk.f32.gmra.mxu0 %vm1661_vm2, %v3090_v18  ;;  %v9258_v47 = vpop.f32.mrf.mxu1  ;;  %v2623_v18 = vadd.f32 %v9171_v48, %v9166_v17  ;;  %v3106_v17 = vsel %vm2850_vm4, %v2608_v3, %v2978_v42  ;;  %v2663_v3 = vadd.f32 %v9171_v48, %v9234_v45 }
 0x278   :  { %7643 = vmatprep.mubr.msk.f32.mxu0 %vm1661_vm2, %v3091_v56  ;;  %v2688_v38 = vadd.f32 %v9171_v48, %v9258_v47 }
 0x279   :  { %v9266_v52 = vpop.f32.mrf.mxu1  ;;  %v2981_v22 = vmul.f32 0.2, %v2623_v18  ;;  %vm2853_vm8 = vcmp.gt.f32.partialorder %v2623_v18, 0.0 }
 0x27a   :  { %v2683_v40 = vadd.f32 %v9171_v48, %v9266_v52 }
 0x27b   :  { %7644 = vmatmul.mubr.msk.f32.gmra.mxu0 %vm1661_vm2, %v3092_v44  ;;  %v9279_v59 = vpop.f32.mrf.mxu1  ;;  %v3109_v57 = vsel %vm2853_vm8, %v2623_v18, %v2981_v22  ;;  %v2989_v18 = vmul.f32 0.2, %v2663_v3 }
 0x27c   :  { %7646 = vmatprep.mubr.msk.f32.mxu0 %vm1661_vm2, %v3093_v55  ;;  %v3107_v55 = vsel %vm2851_vm5, %v2613_v13, %v2979_v31  ;;  %v3113_v13 = vsel %vm2857_vm14, %v2643_v6, %v2985_v37  ;;  %vm2861_vm5 = vcmp.gt.f32.partialorder %v2663_v3, 0.0  ;;  %vm2865_vm11 = vcmp.gt.f32.partialorder %v2683_v40, 0.0 }
 0x27f   :  { %7647 = vmatmul.mubr.msk.f32.gmra.mxu0 %vm1661_vm2, %v3094_v46  ;;  %v9289_v46 = vpop.f32.mrf.mxu1 }
 0x280   :  { %7649 = vmatprep.mubr.msk.f32.mxu0 %vm1661_vm2, %v3095_v24 }
 0x283   :  { %7650 = vmatmul.mubr.msk.f32.gmra.mxu0 %vm1661_vm2, %v3096_v10 }
 0x284   :  { %7652 = vmatprep.mubr.msk.f32.mxu0 %vm1661_vm2, %v3097_v15  ;;  %v9299_v15 = vpop.f32.mrf.mxu1 }
 0x286   :  { %v9310_v60 = vpop.f32.mrf.mxu1 }
 0x287   :  { %7653 = vmatmul.mubr.msk.f32.gmra.mxu0 %vm1661_vm2, %v3098_v19  ;;  %v2984_v19 = vmul.f32 0.2, %v2638_v14 }
 0x288   :  { %7655 = vmatprep.mubr.msk.f32.mxu0 %vm1661_vm2, %v3099_v25  ;;  %v2653_v25 = vadd.f32 %v9171_v48, %v9218_v9 }
 0x289   :  { %v3112_v1 = vsel %vm2856_vm12, %v2638_v14, %v2984_v19  ;;  %vm2866_vm12 = vcmp.gt.f32.partialorder %v2688_v38, 0.0 }
 0x28a   :  { %v2987_v11 = vmul.f32 0.2, %v2653_v25  ;;  %vm2859_vm1 = vcmp.gt.f32.partialorder %v2653_v25, 0.0 }
 0x28b   :  { %7656 = vmatmul.mubr.msk.f32.gmra.mxu0 %vm1661_vm2, %v3100_v34 }
 0x28c   :  { %7658 = vmatprep.mubr.msk.f32.mxu0 %vm1661_vm2, %v3101_v53  ;;  %v3115_v2 = vsel %vm2859_vm1, %v2653_v25, %v2987_v11 }
 0x28f   :  { %7659 = vmatmul.mubr.msk.f32.gmra.mxu0 %vm1661_vm2, %v3102_v4 }
 0x290   :  { %7661 = vmatprep.mubr.msk.f32.mxu0 %vm1661_vm2, %v3103_v49  ;;  %v9321_v49 = vpop.f32.mrf.mxu1 }
 0x292   :  { %v9332_v12 = vpop.f32.mrf.mxu1 }
 0x293   :  { %v7519_v8 = vpop.f32.mrf.mxu0  ;;  %7662 = vmatmul.mubr.msk.f32.gmra.mxu0 %vm1661_vm2, %v3104_v35  ;;  %v2668_v35 = vadd.f32 %v9171_v48, %v9226_v0  ;;  %v3116_v0 = vsel %vm2860_vm3, %v2658_v30, %v2988_v5  ;;  %v2713_v30 = vadd.f32 %v9171_v48, %v9332_v12 }
 0x294   :  { %7664 = vmatprep.mubr.msk.f32.mxu0 %vm1661_vm2, %v3105_v29  ;;  %v3606_v44 = vadd.f32 %v7519_v8, %v9276_v32  ;;  %v2673_v8 = vadd.f32 %v9171_v48, %v9250_v33 }
 0x295   :  { %v3600_v56 = vpop.f32.mrf.mxu0  ;;  %vm2862_vm6 = vcmp.gt.f32.partialorder %v2668_v35, 0.0  ;;  %v2999_v5 = vmul.f32 0.2, %v2713_v30 }
 0x296   :  { %v3601_v21 = vadd.f32 %v9276_v32, %v3600_v56  ;;  %v4368_v24 = vmul.f32 0.2, %v3606_v44  ;;  %vm4240_vm10 = vcmp.gt.f32.partialorder %v3606_v44, 0.0  ;;  %v2990_v56 = vmul.f32 0.2, %v2668_v35 }
 0x297   :  { %v7522_v62 = vpop.f32.mrf.mxu0  ;;  %7665 = vmatmul.mubr.msk.f32.gmra.mxu0 %vm1661_vm2, %v3106_v17  ;;  %v2678_v17 = vadd.f32 %v9171_v48, %v9242_v43  ;;  %v2991_v22 = vmul.f32 0.2, %v2673_v8  ;;  %vm2863_vm8 = vcmp.gt.f32.partialorder %v2673_v8, 0.0 }
 0x298   :  { %vm4239_vm7 = vcmp.gt.f32.partialorder %v3601_v21, 0.0  ;;  %v4367_v27 = vmul.f32 0.2, %v3601_v21  ;;  %7667 = vmatprep.mubr.msk.f32.mxu0 %vm1661_vm2, %v3107_v55  ;;  %v3616_v58 = vadd.f32 %v7522_v62, %v9276_v32  ;;  %v4496_v39 = vsel %vm4240_vm10, %v3606_v44, %v4368_v24 }
 0x299   :  { %v3610_v16 = vpop.f32.mrf.mxu0  ;;  %v3117_v55 = vsel %vm2861_vm5, %v2663_v3, %v2989_v18  ;;  %v3118_v43 = vsel %vm2862_vm6, %v2668_v35, %v2990_v56  ;;  %vm2864_vm9 = vcmp.gt.f32.partialorder %v2678_v17, 0.0  ;;  %v2993_v24 = vmul.f32 0.2, %v2683_v40 }
 0x29a   :  { %v4495_v7 = vsel %vm4239_vm7, %v3601_v21, %v4367_v27  ;;  %v3611_v10 = vadd.f32 %v9276_v32, %v3610_v16  ;;  %v4370_v9 = vmul.f32 0.2, %v3616_v58  ;;  %vm4242_vm0 = vcmp.gt.f32.partialorder %v3616_v58, 0.0  ;;  %v9343_v27 = vpop.f32.mrf.mxu1 }
 0x29b   :  { %v7525_v61 = vpop.f32.mrf.mxu0  ;;  %7668 = vmatmul.mubr.msk.f32.gmra.mxu0 %vm1661_vm2, %v3108_v20  ;;  %6561 = vmatmul.mubr.msk.f32.vlgmr.msra.gmra.mxu1 %vm1661_vm2, %v4495_v7  ;;  %v2992_v20 = vmul.f32 0.2, %v2678_v17  ;;  %v2693_v7 = vadd.f32 %v9171_v48, %v9289_v46  ;;  %v3119_v36 = vsel %vm2863_vm8, %v2673_v8, %v2991_v22  ;;  %v2718_v3 = vadd.f32 %v9171_v48, %v9321_v49 }
 0x29c   :  { %7670 = vmatprep.mubr.msk.f32.mxu0 %vm1661_vm2, %v3109_v57  ;;  %5105 = vmatprep.mubr.f32.mxu1 %v7754_v63  ;;  %v4369_v28 = vmul.f32 0.2, %v3611_v10  ;;  %vm4241_vm13 = vcmp.gt.f32.partialorder %v3611_v10, 0.0  ;;  %v3626_v45 = vadd.f32 %v7525_v61, %v9276_v32  ;;  %v4498_v31 = vsel %vm4242_vm0, %v3616_v58, %v4370_v9  ;;  %v2722_v6 = vpop.f32.mrf.mxu1 }
 0x29d   :  { %v3620_v34 = vpop.f32.mrf.mxu0  ;;  %v3120_v47 = vsel %vm2864_vm9, %v2678_v17, %v2992_v20  ;;  %v2994_v61 = vmul.f32 0.2, %v2688_v38  ;;  %v2698_v57 = vadd.f32 %v9171_v48, %v9279_v59  ;;  %v2995_v50 = vmul.f32 0.2, %v2693_v7 }
 0x29e   :  { %v3621_v53 = vadd.f32 %v9276_v32, %v3620_v34  ;;  %v4497_v4 = vsel %vm4241_vm13, %v3611_v10, %v4369_v28  ;;  %v4372_v33 = vmul.f32 0.2, %v3626_v45  ;;  %vm4244_vm7 = vcmp.gt.f32.partialorder %v3626_v45, 0.0  ;;  %v7497_v37 = vpop.f32.mrf.mxu1 }
 0x29f   :  { %7671 = vmatmul.mubr.msk.f32.gmra.mxu0 %vm1661_vm2, %v3110_v54  ;;  %6562 = vmatmul.mubr.msk.f32.gmra.mxu1 %vm1661_vm2, %v4496_v39  ;;  %v7528_v26 = vpop.f32.mrf.mxu0  ;;  %v2703_v58 = vadd.f32 %v9171_v48, %v9310_v60  ;;  %v3121_v39 = vsel %vm2865_vm11, %v2683_v40, %v2993_v24  ;;  %vm2867_vm14 = vcmp.gt.f32.partialorder %v2693_v7, 0.0  ;;  %v3122_v59 = vsel %vm2866_vm12, %v2688_v38, %v2994_v61 }
 0x2a0   :  { %7673 = vmatprep.mubr.msk.f32.mxu0 %vm1661_vm2, %v3111_v41  ;;  %5111 = vmatprep.mubr.f32.mxu1 %v7754_v63  ;;  %v4371_v42 = vmul.f32 0.2, %v3621_v53  ;;  %vm4243_vm4 = vcmp.gt.f32.partialorder %v3621_v53, 0.0  ;;  %v3636_v52 = vadd.f32 %v7528_v26, %v9276_v32  ;;  %v4500_v16 = vsel %vm4244_vm7, %v3626_v45, %v4372_v33 }
 0x2a1   :  { %v3630_v29 = vpop.f32.mrf.mxu0  ;;  %v2996_v25 = vmul.f32 0.2, %v2698_v57  ;;  %v2708_v34 = vadd.f32 %v9171_v48, %v9299_v15  ;;  %vm2868_vm15 = vcmp.gt.f32.partialorder %v2698_v57, 0.0  ;;  %v2997_v23 = vmul.f32 0.2, %v2703_v58 }
 0x2a2   :  { %v3631_v44 = vadd.f32 %v9276_v32, %v3630_v29  ;;  %v4499_v21 = vsel %vm4243_vm4, %v3621_v53, %v4371_v42  ;;  %v4374_v46 = vmul.f32 0.2, %v3636_v52  ;;  %vm4246_vm13 = vcmp.gt.f32.partialorder %v3636_v52, 0.0 }
 0x2a3   :  { %7674 = vmatmul.mubr.msk.f32.gmra.mxu0 %vm1661_vm2, %v3112_v1  ;;  %6563 = vmatmul.mubr.msk.f32.gmra.mxu1 %vm1661_vm2, %v4497_v4  ;;  %v7531_v62 = vpop.f32.mrf.mxu0  ;;  %v3123_v53 = vsel %vm2867_vm14, %v2693_v7, %v2995_v50  ;;  %v2732_v4 = vpop.f32.mrf.mxu1  ;;  %vm2869_vm1 = vcmp.gt.f32.partialorder %v2703_v58, 0.0  ;;  %v3124_v15 = vsel %vm2868_vm15, %v2698_v57, %v2996_v25  ;;  %v2998_v11 = vmul.f32 0.2, %v2708_v34 }
 0x2a4   :  { %7676 = vmatprep.mubr.msk.f32.mxu0 %vm1661_vm2, %v3113_v13  ;;  %5117 = vmatprep.mubr.f32.mxu1 %v7754_v63  ;;  %v4373_v14 = vmul.f32 0.2, %v3631_v44  ;;  %vm4245_vm10 = vcmp.gt.f32.partialorder %v3631_v44, 0.0  ;;  %v3646_v41 = vadd.f32 %v7531_v62, %v9276_v32  ;;  %v4502_v1 = vsel %vm4246_vm13, %v3636_v52, %v4374_v46 }
 0x2a5   :  { %v3640_v10 = vpop.f32.mrf.mxu0  ;;  %vm2870_vm3 = vcmp.gt.f32.partialorder %v2708_v34, 0.0  ;;  %v2723_v35 = vadd.f32 %v9171_v48, %v2722_v6  ;;  %v3125_v42 = vsel %vm2869_vm1, %v2703_v58, %v2997_v23  ;;  %vm2871_vm5 = vcmp.gt.f32.partialorder %v2713_v30, 0.0 }
 0x2a6   :  { %v3641_v54 = vadd.f32 %v9276_v32, %v3640_v10  ;;  %v4501_v19 = vsel %vm4245_vm10, %v3631_v44, %v4373_v14  ;;  %v4376_v26 = vmul.f32 0.2, %v3646_v41  ;;  %vm4248_vm4 = vcmp.gt.f32.partialorder %v3646_v41, 0.0 }
 0x2a7   :  { %7677 = vmatmul.mubr.msk.f32.gmra.mxu0 %vm1661_vm2, %v3114_v51  ;;  %6564 = vmatmul.mubr.msk.f32.gmra.mxu1 %vm1661_vm2, %v4498_v31  ;;  %v7534_v28 = vpop.f32.mrf.mxu0  ;;  %v7500_v31 = vpop.f32.mrf.mxu1  ;;  %v3126_v49 = vsel %vm2870_vm3, %v2708_v34, %v2998_v11  ;;  %v3000_v18 = vmul.f32 0.2, %v2718_v3  ;;  %v2728_v8 = vadd.f32 %v9171_v48, %v9343_v27  ;;  %vm2872_vm6 = vcmp.gt.f32.partialorder %v2718_v3, 0.0 }
 0x2a8   :  { %7679 = vmatprep.mubr.msk.f32.mxu0 %vm1661_vm2, %v3115_v2  ;;  %5123 = vmatprep.mubr.f32.mxu1 %v7754_v63  ;;  %v4375_v60 = vmul.f32 0.2, %v3641_v54  ;;  %vm4247_vm0 = vcmp.gt.f32.partialorder %v3641_v54, 0.0  ;;  %v3656_v29 = vadd.f32 %v7534_v28, %v9276_v32  ;;  %v4504_v12 = vsel %vm4248_vm4, %v3646_v41, %v4376_v26 }
 0x2a9   :  { %v3650_v9 = vpop.f32.mrf.mxu0  ;;  %v2733_v56 = vadd.f32 %v9171_v48, %v2732_v4  ;;  %v3127_v33 = vsel %vm2871_vm5, %v2713_v30, %v2999_v5  ;;  %v2742_v44 = vpop.f32.mrf.mxu1  ;;  %vm2873_vm8 = vcmp.gt.f32.partialorder %v2723_v35, 0.0  ;;  %v3002_v22 = vmul.f32 0.2, %v2728_v8 }
 0x2aa   :  { %v3651_v13 = vadd.f32 %v9276_v32, %v3650_v9  ;;  %v4503_v51 = vsel %vm4247_vm0, %v3641_v54, %v4375_v60  ;;  %v2738_v40 = vadd.f32 %v9171_v48, %v7497_v37  ;;  %vm2874_vm9 = vcmp.gt.f32.partialorder %v2728_v8, 0.0 }
 0x2ab   :  { %7680 = vmatmul.mubr.msk.f32.gmra.mxu0 %vm1661_vm2, %v3116_v0  ;;  %6565 = vmatmul.mubr.msk.f32.gmra.mxu1 %vm1661_vm2, %v4499_v21  ;;  %v7537_v45 = vpop.f32.mrf.mxu0  ;;  %v3001_v0 = vmul.f32 0.2, %v2723_v35  ;;  %v3128_v21 = vsel %vm2872_vm6, %v2718_v3, %v3000_v18  ;;  %v4378_v62 = vmul.f32 0.2, %v3656_v29  ;;  %v2743_v20 = vadd.f32 %v9171_v48, %v2742_v44 }
 0x2ac   :  { %7682 = vmatprep.mubr.msk.f32.mxu0 %vm1661_vm2, %v3117_v55  ;;  %5129 = vmatprep.mubr.f32.mxu1 %v7754_v63  ;;  %v4377_v2 = vmul.f32 0.2, %v3651_v13  ;;  %vm4249_vm7 = vcmp.gt.f32.partialorder %v3651_v13, 0.0  ;;  %vm4250_vm10 = vcmp.gt.f32.partialorder %v3656_v29, 0.0  ;;  %vm2875_vm11 = vcmp.gt.f32.partialorder %v2733_v56, 0.0 }
 0x2ad   :  { %v3660_v17 = vpop.f32.mrf.mxu0  ;;  %v3129_v52 = vsel %vm2873_vm8, %v2723_v35, %v3001_v0  ;;  %v3130_v14 = vsel %vm2874_vm9, %v2728_v8, %v3002_v22  ;;  %vm2876_vm12 = vcmp.gt.f32.partialorder %v2738_v40, 0.0  ;;  %v2748_v24 = vadd.f32 %v9171_v48, %v7500_v31 }
 0x2ae   :  { %v3661_v55 = vadd.f32 %v9276_v32, %v3660_v17  ;;  %v4505_v27 = vsel %vm4249_vm7, %v3651_v13, %v4377_v2  ;;  %v3666_v7 = vadd.f32 %v7537_v45, %v9276_v32  ;;  %v3005_v6 = vmul.f32 0.2, %v2743_v20 }
 0x2af   :  { %7683 = vmatmul.mubr.msk.f32.gmra.mxu0 %vm1661_vm2, %v3118_v43  ;;  %6566 = vmatmul.mubr.msk.f32.gmra.mxu1 %vm1661_vm2, %v4500_v16  ;;  %v3003_v43 = vmul.f32 0.2, %v2733_v56  ;;  %v7540_v38 = vpop.f32.mrf.mxu0  ;;  %v3004_v16 = vmul.f32 0.2, %v2738_v40  ;;  %vm2877_vm14 = vcmp.gt.f32.partialorder %v2743_v20, 0.0  ;;  %vm2878_vm15 = vcmp.gt.f32.partialorder %v2748_v24, 0.0 }
 0x2b0   :  { %7685 = vmatprep.mubr.msk.f32.mxu0 %vm1661_vm2, %v3119_v36  ;;  %5135 = vmatprep.mubr.f32.mxu1 %v7754_v63  ;;  %v4379_v10 = vmul.f32 0.2, %v3661_v55  ;;  %v4506_v36 = vsel %vm4250_vm10, %v3656_v29, %v4378_v62  ;;  %vm4251_vm13 = vcmp.gt.f32.partialorder %v3661_v55, 0.0  ;;  %v3006_v46 = vmul.f32 0.2, %v2748_v24 }
 0x2b1   :  { %v3131_v61 = vsel %vm2875_vm11, %v2733_v56, %v3003_v43  ;;  %v3132_v57 = vsel %vm2876_vm12, %v2738_v40, %v3004_v16  ;;  %v4380_v48 = vmul.f32 0.2, %v3666_v7  ;;  %vm4252_vm0 = vcmp.gt.f32.partialorder %v3666_v7, 0.0 }
 0x2b2   :  { %v3133_v58 = vsel %vm2877_vm14, %v2743_v20, %v3005_v6  ;;  %v3134_v28 = vsel %vm2878_vm15, %v2748_v24, %v3006_v46 }
 0x2b3   :  { %7686 = vmatmul.mubr.msk.f32.gmra.mxu0 %vm1661_vm2, %v3120_v47  ;;  %6567 = vmatmul.mubr.msk.f32.gmra.mxu1 %vm1661_vm2, %v4501_v19  ;;  %v3670_v47 = vpop.f32.mrf.mxu0  ;;  %v4507_v19 = vsel %vm4251_vm13, %v3661_v55, %v4379_v10 }
 0x2b4   :  { %7688 = vmatprep.mubr.msk.f32.mxu0 %vm1661_vm2, %v3121_v39  ;;  %5141 = vmatprep.mubr.f32.mxu1 %v7754_v63  ;;  %v3671_v54 = vadd.f32 %v9276_v32, %v3670_v47  ;;  %v3676_v39 = vadd.f32 %v7540_v38, %v9276_v32 }
 0x2b5   :  { %v7543_v50 = vpop.f32.mrf.mxu0 }
 0x2b6   :  { %v4381_v37 = vmul.f32 0.2, %v3671_v54  ;;  %vm4253_vm1 = vcmp.gt.f32.partialorder %v3671_v54, 0.0  ;;  %v4382_v34 = vmul.f32 0.2, %v3676_v39  ;;  %vm4254_vm3 = vcmp.gt.f32.partialorder %v3676_v39, 0.0 }
 0x2b7   :  { %7689 = vmatmul.mubr.msk.f32.gmra.mxu0 %vm1661_vm2, %v3122_v59  ;;  %6568 = vmatmul.mubr.msk.f32.gmra.mxu1 %vm1661_vm2, %v4502_v1  ;;  %v4508_v59 = vsel %vm4252_vm0, %v3666_v7, %v4380_v48  ;;  %v3680_v25 = vpop.f32.mrf.mxu0  ;;  %v3686_v23 = vadd.f32 %v7543_v50, %v9276_v32 }
 0x2b8   :  { %7691 = vmatprep.mubr.msk.f32.mxu0 %vm1661_vm2, %v3123_v53  ;;  %5147 = vmatprep.mubr.f32.mxu1 %v7754_v63  ;;  %v3681_v41 = vadd.f32 %v9276_v32, %v3680_v25  ;;  %v4509_v60 = vsel %vm4253_vm1, %v3671_v54, %v4381_v37  ;;  %v4510_v9 = vsel %vm4254_vm3, %v3676_v39, %v4382_v34 }
 0x2b9   :  { %v7546_v1 = vpop.f32.mrf.mxu0  ;;  %v4384_v4 = vmul.f32 0.2, %v3686_v23  ;;  %vm4256_vm5 = vcmp.gt.f32.partialorder %v3686_v23, 0.0 }
 0x2ba   :  { %v4383_v30 = vmul.f32 0.2, %v3681_v41  ;;  %vm4255_vm4 = vcmp.gt.f32.partialorder %v3681_v41, 0.0  ;;  %v3696_v26 = vadd.f32 %v7546_v1, %v9276_v32 }
 0x2bb   :  { %7692 = vmatmul.mubr.msk.f32.gmra.mxu0 %vm1661_vm2, %v3124_v15  ;;  %6569 = vmatmul.mubr.msk.f32.gmra.mxu1 %vm1661_vm2, %v4503_v51  ;;  %v3690_v53 = vpop.f32.mrf.mxu0  ;;  %v4512_v51 = vsel %vm4256_vm5, %v3686_v23, %v4384_v4 }
 0x2bc   :  { %7694 = vmatprep.mubr.msk.f32.mxu0 %vm1661_vm2, %v3125_v42  ;;  %5153 = vmatprep.mubr.f32.mxu1 %v7754_v63  ;;  %v3691_v15 = vadd.f32 %v9276_v32, %v3690_v53  ;;  %v4511_v11 = vsel %vm4255_vm4, %v3681_v41, %v4383_v30  ;;  %v4386_v35 = vmul.f32 0.2, %v3696_v26  ;;  %vm4258_vm7 = vcmp.gt.f32.partialorder %v3696_v26, 0.0 }
 0x2bd   :  { %v7549_v3 = vpop.f32.mrf.mxu0 }
 0x2be   :  { %v4385_v13 = vmul.f32 0.2, %v3691_v15  ;;  %vm4257_vm6 = vcmp.gt.f32.partialorder %v3691_v15, 0.0  ;;  %v4514_v8 = vsel %vm4258_vm7, %v3696_v26, %v4386_v35 }
 0x2bf   :  { %7695 = vmatmul.mubr.msk.f32.gmra.mxu0 %vm1661_vm2, %v3126_v49  ;;  %6570 = vmatmul.mubr.msk.f32.gmra.mxu1 %vm1661_vm2, %v4504_v12  ;;  %v3700_v5 = vpop.f32.mrf.mxu0  ;;  %v3706_v49 = vadd.f32 %v7549_v3, %v9276_v32 }
 0x2c0   :  { %7697 = vmatprep.mubr.msk.f32.mxu0 %vm1661_vm2, %v3127_v33  ;;  %5159 = vmatprep.mubr.f32.mxu1 %v7754_v63  ;;  %v3701_v45 = vadd.f32 %v9276_v32, %v3700_v5  ;;  %v4513_v42 = vsel %vm4257_vm6, %v3691_v15, %v4385_v13 }
 0x2c1   :  { %v7552_v31 = vpop.f32.mrf.mxu0  ;;  %v4388_v2 = vmul.f32 0.2, %v3706_v49  ;;  %vm4260_vm9 = vcmp.gt.f32.partialorder %v3706_v49, 0.0 }
 0x2c2   :  { %v4387_v18 = vmul.f32 0.2, %v3701_v45  ;;  %vm4259_vm8 = vcmp.gt.f32.partialorder %v3701_v45, 0.0  ;;  %v3716_v17 = vadd.f32 %v7552_v31, %v9276_v32 }
 0x2c3   :  { %7698 = vmatmul.mubr.msk.f32.gmra.mxu0 %vm1661_vm2, %v3128_v21  ;;  %6571 = vmatmul.mubr.msk.f32.gmra.mxu1 %vm1661_vm2, %v4505_v27  ;;  %v3710_v29 = vpop.f32.mrf.mxu0  ;;  %v4516_v44 = vsel %vm4260_vm9, %v3706_v49, %v4388_v2 }
 0x2c4   :  { %7700 = vmatprep.mubr.msk.f32.mxu0 %vm1661_vm2, %v3129_v52  ;;  %5165 = vmatprep.mubr.f32.mxu1 %v7754_v63  ;;  %v3711_v12 = vadd.f32 %v9276_v32, %v3710_v29  ;;  %v4515_v0 = vsel %vm4259_vm8, %v3701_v45, %v4387_v18  ;;  %v4390_v22 = vmul.f32 0.2, %v3716_v17  ;;  %vm4262_vm11 = vcmp.gt.f32.partialorder %v3716_v17, 0.0 }
 0x2c5   :  { %v7555_v56 = vpop.f32.mrf.mxu0 }
 0x2c6   :  { %v4389_v33 = vmul.f32 0.2, %v3711_v12  ;;  %vm4261_vm10 = vcmp.gt.f32.partialorder %v3711_v12, 0.0  ;;  %v3726_v27 = vadd.f32 %v7555_v56, %v9276_v32  ;;  %v4518_v20 = vsel %vm4262_vm11, %v3716_v17, %v4390_v22 }
 0x2c7   :  { %7701 = vmatmul.mubr.msk.f32.gmra.mxu0 %vm1661_vm2, %v3130_v14  ;;  %6572 = vmatmul.mubr.msk.f32.gmra.mxu1 %vm1661_vm2, %v4506_v36  ;;  %v3720_v21 = vpop.f32.mrf.mxu0 }
 0x2c8   :  { %7703 = vmatprep.mubr.msk.f32.mxu0 %vm1661_vm2, %v3131_v61  ;;  %5171 = vmatprep.mubr.f32.mxu1 %v7754_v63  ;;  %v3721_v40 = vadd.f32 %v9276_v32, %v3720_v21  ;;  %v4517_v62 = vsel %vm4261_vm10, %v3711_v12, %v4389_v33  ;;  %v4392_v52 = vmul.f32 0.2, %v3726_v27  ;;  %vm4264_vm13 = vcmp.gt.f32.partialorder %v3726_v27, 0.0 }
 0x2c9   :  { %v7558_v55 = vpop.f32.mrf.mxu0 }
 0x2ca   :  { %v4391_v43 = vmul.f32 0.2, %v3721_v40  ;;  %vm4263_vm12 = vcmp.gt.f32.partialorder %v3721_v40, 0.0  ;;  %v4520_v7 = vsel %vm4264_vm13, %v3726_v27, %v4392_v52  ;;  %v3736_v10 = vadd.f32 %v7558_v55, %v9276_v32 }
 0x2cb   :  { %7704 = vmatmul.mubr.msk.f32.gmra.mxu0 %vm1661_vm2, %v3132_v57  ;;  %6573 = vmatmul.mubr.msk.f32.gmra.mxu1 %vm1661_vm2, %v4507_v19  ;;  %v3730_v38 = vpop.f32.mrf.mxu0 }
 0x2cc   :  { %7706 = vmatprep.mubr.msk.f32.mxu0 %vm1661_vm2, %v3133_v58  ;;  %5177 = vmatprep.mubr.f32.mxu1 %v7754_v63  ;;  %v3731_v14 = vadd.f32 %v9276_v32, %v3730_v38  ;;  %v4519_v16 = vsel %vm4263_vm12, %v3721_v40, %v4391_v43  ;;  %v4394_v47 = vmul.f32 0.2, %v3736_v10  ;;  %vm4266_vm15 = vcmp.gt.f32.partialorder %v3736_v10, 0.0 }
 0x2cd   :  { %v7561_v24 = vpop.f32.mrf.mxu0 }
 0x2ce   :  { %v4393_v36 = vmul.f32 0.2, %v3731_v14  ;;  %vm4265_vm14 = vcmp.gt.f32.partialorder %v3731_v14, 0.0  ;;  %v4522_v48 = vsel %vm4266_vm15, %v3736_v10, %v4394_v47  ;;  %v3746_v54 = vadd.f32 %v7561_v24, %v9276_v32 }
 0x2cf   :  { %7707 = vmatmul.mubr.msk.f32.gmra.mxu0 %vm1661_vm2, %v3134_v28  ;;  %6574 = vmatmul.mubr.msk.f32.gmra.mxu1 %vm1661_vm2, %v4508_v59  ;;  %v3740_v6 = vpop.f32.mrf.mxu0 }
 0x2d0   :  { %5183 = vmatprep.mubr.f32.mxu1 %v7754_v63  ;;  %v4521_v61 = vsel %vm4265_vm14, %v3731_v14, %v4393_v36  ;;  %v3741_v57 = vadd.f32 %v9276_v32, %v3740_v6  ;;  %v4396_v58 = vmul.f32 0.2, %v3746_v54  ;;  %vm4268_vm1 = vcmp.gt.f32.partialorder %v3746_v54, 0.0 }
 0x2d1   :  { %v7564_v46 = vpop.f32.mrf.mxu0 }
 0x2d2   :  { %v4395_v19 = vmul.f32 0.2, %v3741_v57  ;;  %vm4267_vm0 = vcmp.gt.f32.partialorder %v3741_v57, 0.0  ;;  %v4524_v59 = vsel %vm4268_vm1, %v3746_v54, %v4396_v58  ;;  %v3756_v25 = vadd.f32 %v7564_v46, %v9276_v32 }
 0x2d3   :  { %6575 = vmatmul.mubr.msk.f32.gmra.mxu1 %vm1661_vm2, %v4509_v60  ;;  %v3750_v50 = vpop.f32.mrf.mxu0 }
 0x2d4   :  { %5189 = vmatprep.mubr.f32.mxu1 %v7754_v63  ;;  %v4523_v28 = vsel %vm4267_vm0, %v3741_v57, %v4395_v19  ;;  %v3751_v39 = vadd.f32 %v9276_v32, %v3750_v50  ;;  %v4398_v60 = vmul.f32 0.2, %v3756_v25  ;;  %vm4270_vm4 = vcmp.gt.f32.partialorder %v3756_v25, 0.0 }
 0x2d5   :  { %v7567_v37 = vpop.f32.mrf.mxu0 }
 0x2d6   :  { %v4397_v34 = vmul.f32 0.2, %v3751_v39  ;;  %vm4269_vm3 = vcmp.gt.f32.partialorder %v3751_v39, 0.0  ;;  %v3766_v53 = vadd.f32 %v7567_v37, %v9276_v32 }
 0x2d7   :  { %6576 = vmatmul.mubr.msk.f32.gmra.mxu1 %vm1661_vm2, %v4510_v9  ;;  %v3760_v41 = vpop.f32.mrf.mxu0  ;;  %v4526_v9 = vsel %vm4270_vm4, %v3756_v25, %v4398_v60 }
 0x2d8   :  { %5195 = vmatprep.mubr.f32.mxu1 %v7754_v63  ;;  %v4525_v1 = vsel %vm4269_vm3, %v3751_v39, %v4397_v34  ;;  %v3761_v23 = vadd.f32 %v9276_v32, %v3760_v41  ;;  %vm4272_vm6 = vcmp.gt.f32.partialorder %v3766_v53, 0.0 }
 0x2d9   :  { %v7570_v30 = vpop.f32.mrf.mxu0 }
 0x2da   :  { %v4399_v4 = vmul.f32 0.2, %v3761_v23  ;;  %vm4271_vm5 = vcmp.gt.f32.partialorder %v3761_v23, 0.0  ;;  %v3776_v5 = vadd.f32 %v7570_v30, %v9276_v32 }
 0x2db   :  { %6577 = vmatmul.mubr.msk.f32.gmra.mxu1 %vm1661_vm2, %v4511_v11  ;;  %v3770_v15 = vpop.f32.mrf.mxu0  ;;  %v4400_v11 = vmul.f32 0.2, %v3766_v53 }
 0x2dc   :  { %5201 = vmatprep.mubr.f32.mxu1 %v7754_v63  ;;  %v4527_v3 = vsel %vm4271_vm5, %v3761_v23, %v4399_v4  ;;  %v3771_v26 = vadd.f32 %v9276_v32, %v3770_v15  ;;  %vm4274_vm8 = vcmp.gt.f32.partialorder %v3776_v5, 0.0  ;;  %v4641_v23 = vlaneseq }
 0x2dd   :  { %v7573_v13 = vpop.f32.mrf.mxu0 }
 0x2de   :  { %v4401_v35 = vmul.f32 0.2, %v3771_v26  ;;  %vm4273_vm7 = vcmp.gt.f32.partialorder %v3771_v26, 0.0  ;;  %v3786_v29 = vadd.f32 %v7573_v13, %v9276_v32  ;;  %v9512_v15 = vshrl.u32 %v4641_v23, 7 }
 0x2df   :  { %6578 = vmatmul.mubr.msk.f32.gmra.mxu1 %vm1661_vm2, %v4512_v51  ;;  %v4528_v51 = vsel %vm4272_vm6, %v3766_v53, %v4400_v11  ;;  %v3780_v45 = vpop.f32.mrf.mxu0 }
 0x2e0   :  { %5207 = vmatprep.mubr.f32.mxu1 %v7754_v63  ;;  %v4529_v31 = vsel %vm4273_vm7, %v3771_v26, %v4401_v35  ;;  %v3781_v49 = vadd.f32 %v9276_v32, %v3780_v45  ;;  %vm4276_vm10 = vcmp.gt.f32.partialorder %v3786_v29, 0.0 }
 0x2e1   :  { %v7576_v18 = vpop.f32.mrf.mxu0 }
 0x2e2   :  { %v4403_v2 = vmul.f32 0.2, %v3781_v49  ;;  %vm4275_vm9 = vcmp.gt.f32.partialorder %v3781_v49, 0.0  ;;  %v3796_v21 = vadd.f32 %v7576_v18, %v9276_v32  ;;  %v4647_v18 = vsub.s32 1, %v9512_v15 }
 0x2e3   :  { %6579 = vmatmul.mubr.msk.f32.gmra.mxu1 %vm1661_vm2, %v4513_v42  ;;  %v4402_v42 = vmul.f32 0.2, %v3776_v5  ;;  %v3790_v12 = vpop.f32.mrf.mxu0 }
 0x2e4   :  { %5213 = vmatprep.mubr.f32.mxu1 %v7754_v63  ;;  %v4531_v56 = vsel %vm4275_vm9, %v3781_v49, %v4403_v2  ;;  %v3791_v17 = vadd.f32 %v9276_v32, %v3790_v12  ;;  %vm4278_vm12 = vcmp.gt.f32.partialorder %v3796_v21, 0.0 }
 0x2e5   :  { %v7579_v33 = vpop.f32.mrf.mxu0 }
 0x2e6   :  { %v4405_v22 = vmul.f32 0.2, %v3791_v17  ;;  %vm4277_vm11 = vcmp.gt.f32.partialorder %v3791_v17, 0.0  ;;  %v3806_v38 = vadd.f32 %v7579_v33, %v9276_v32 }
 0x2e7   :  { %6580 = vmatmul.mubr.msk.f32.gmra.mxu1 %vm1661_vm2, %v4514_v8  ;;  %v4530_v8 = vsel %vm4274_vm8, %v3776_v5, %v4402_v42  ;;  %v3800_v40 = vpop.f32.mrf.mxu0  ;;  %v4639_v42 = vld [vmem:[%s10081_s8] sm:$0x3] }
 0x2e8   :  { %5219 = vmatprep.mubr.f32.mxu1 %v7754_v63  ;;  %v4533_v55 = vsel %vm4277_vm11, %v3791_v17, %v4405_v22  ;;  %v3801_v27 = vadd.f32 %v9276_v32, %v3800_v40  ;;  %vm4280_vm14 = vcmp.gt.f32.partialorder %v3806_v38, 0.0  ;;  %v9533_v17 = vrot.slane %v4639_v42, %v4647_v18 }
 0x2e9   :  { %v7582_v43 = vpop.f32.mrf.mxu0 }
 0x2ea   :  { %v4407_v52 = vmul.f32 0.2, %v3801_v27  ;;  %vm4279_vm13 = vcmp.gt.f32.partialorder %v3801_v27, 0.0  ;;  %v3816_v6 = vadd.f32 %v7582_v43, %v9276_v32 }
 0x2eb   :  { %6581 = vmatmul.mubr.msk.f32.gmra.mxu1 %vm1661_vm2, %v4515_v0  ;;  %v4404_v0 = vmul.f32 0.2, %v3786_v29  ;;  %v3810_v14 = vpop.f32.mrf.mxu0 }
 0x2ec   :  { %5225 = vmatprep.mubr.f32.mxu1 %v7754_v63  ;;  %v4535_v24 = vsel %vm4279_vm13, %v3801_v27, %v4407_v52  ;;  %v4410_v57 = vmul.f32 0.2, %v3816_v6  ;;  %vm4282_vm0 = vcmp.gt.f32.partialorder %v3816_v6, 0.0 }
 0x2ed   :  { %v7585_v10 = vpop.f32.mrf.mxu0 }
 0x2ee   :  { %v4538_v19 = vsel %vm4282_vm0, %v3816_v6, %v4410_v57  ;;  %v3826_v50 = vadd.f32 %v7585_v10, %v9276_v32 }
 0x2ef   :  { %6582 = vmatmul.mubr.msk.f32.gmra.mxu1 %vm1661_vm2, %v4516_v44  ;;  %v4532_v44 = vsel %vm4276_vm10, %v3786_v29, %v4404_v0 }
 0x2f0   :  { %5231 = vmatprep.mubr.f32.mxu1 %v7754_v63  ;;  %v4412_v39 = vmul.f32 0.2, %v3826_v50  ;;  %vm4284_vm3 = vcmp.gt.f32.partialorder %v3826_v50, 0.0 }
 0x2f2   :  { %v4540_v34 = vsel %vm4284_vm3, %v3826_v50, %v4412_v39 }
 0x2f3   :  { %6583 = vmatmul.mubr.msk.f32.gmra.mxu1 %vm1661_vm2, %v4517_v62  ;;  %v4406_v62 = vmul.f32 0.2, %v3796_v21 }
 0x2f4   :  { %5237 = vmatprep.mubr.f32.mxu1 %v7754_v63 }
 0x2f7   :  { %6584 = vmatmul.mubr.msk.f32.gmra.mxu1 %vm1661_vm2, %v4518_v20  ;;  %v4534_v20 = vsel %vm4278_vm12, %v3796_v21, %v4406_v62 }
 0x2f8   :  { %5243 = vmatprep.mubr.f32.mxu1 %v7754_v63 }
 0x2fb   :  { %6585 = vmatmul.mubr.msk.f32.gmra.mxu1 %vm1661_vm2, %v4519_v16  ;;  %v4408_v16 = vmul.f32 0.2, %v3806_v38 }
 0x2fc   :  { %5249 = vmatprep.mubr.f32.mxu1 %v7754_v63 }
 0x2fd   :  { %v4536_v36 = vsel %vm4280_vm14, %v3806_v38, %v4408_v16 }
 0x2ff   :  { %6586 = vmatmul.mubr.msk.f32.gmra.mxu1 %vm1661_vm2, %v4520_v7  ;;  %v3811_v7 = vadd.f32 %v9276_v32, %v3810_v14 }
 0x300   :  { %5255 = vmatprep.mubr.f32.mxu1 %v7754_v63 }
 0x301   :  { %v4409_v47 = vmul.f32 0.2, %v3811_v7  ;;  %vm4281_vm15 = vcmp.gt.f32.partialorder %v3811_v7, 0.0 }
 0x303   :  { %6587 = vmatmul.mubr.msk.f32.gmra.mxu1 %vm1661_vm2, %v4521_v61  ;;  %v3820_v61 = vpop.f32.mrf.mxu0  ;;  %v4537_v46 = vsel %vm4281_vm15, %v3811_v7, %v4409_v47 }
 0x304   :  { %5261 = vmatprep.mubr.f32.mxu1 %v7754_v63 }
 0x305   :  { %v7588_v54 = vpop.f32.mrf.mxu0 }
 0x306   :  { %v3836_v41 = vadd.f32 %v7588_v54, %v9276_v32 }
 0x307   :  { %6588 = vmatmul.mubr.msk.f32.gmra.mxu1 %vm1661_vm2, %v4522_v48  ;;  %v3821_v48 = vadd.f32 %v9276_v32, %v3820_v61 }
 0x308   :  { %5267 = vmatprep.mubr.f32.mxu1 %v7754_v63  ;;  %v4414_v30 = vmul.f32 0.2, %v3836_v41  ;;  %vm4286_vm5 = vcmp.gt.f32.partialorder %v3836_v41, 0.0 }
 0x309   :  { %v4411_v58 = vmul.f32 0.2, %v3821_v48  ;;  %vm4283_vm1 = vcmp.gt.f32.partialorder %v3821_v48, 0.0 }
 0x30a   :  { %v4542_v11 = vsel %vm4286_vm5, %v3836_v41, %v4414_v30 }
 0x30b   :  { %6589 = vmatmul.mubr.msk.f32.gmra.mxu1 %vm1661_vm2, %v4523_v28  ;;  %v3830_v28 = vpop.f32.mrf.mxu0  ;;  %v4539_v37 = vsel %vm4283_vm1, %v3821_v48, %v4411_v58 }
 0x30c   :  { %5273 = vmatprep.mubr.f32.mxu1 %v7754_v63 }
 0x30d   :  { %v7591_v25 = vpop.f32.mrf.mxu0 }
 0x30f   :  { %6590 = vmatmul.mubr.msk.f32.gmra.mxu1 %vm1661_vm2, %v4524_v59  ;;  %v3831_v59 = vadd.f32 %v9276_v32, %v3830_v28 }
 0x310   :  { %5279 = vmatprep.mubr.f32.mxu1 %v7754_v63 }
 0x311   :  { %v4413_v60 = vmul.f32 0.2, %v3831_v59  ;;  %vm4285_vm4 = vcmp.gt.f32.partialorder %v3831_v59, 0.0 }
 0x313   :  { %6591 = vmatmul.mubr.msk.f32.gmra.mxu1 %vm1661_vm2, %v4525_v1  ;;  %v3840_v1 = vpop.f32.mrf.mxu0 }
 0x314   :  { %5285 = vmatprep.mubr.f32.mxu1 %v7754_v63  ;;  %v3841_v53 = vadd.f32 %v9276_v32, %v3840_v1 }
 0x315   :  { %v7594_v4 = vpop.f32.mrf.mxu0 }
 0x316   :  { %v4415_v26 = vmul.f32 0.2, %v3841_v53  ;;  %vm4287_vm6 = vcmp.gt.f32.partialorder %v3841_v53, 0.0 }
 0x317   :  { %6592 = vmatmul.mubr.msk.f32.gmra.mxu1 %vm1661_vm2, %v4526_v9  ;;  %v4541_v9 = vsel %vm4285_vm4, %v3831_v59, %v4413_v60  ;;  %v3850_v13 = vpop.f32.mrf.mxu0 }
 0x318   :  { %5291 = vmatprep.mubr.f32.mxu1 %v7754_v63  ;;  %v4543_v35 = vsel %vm4287_vm6, %v3841_v53, %v4415_v26  ;;  %v3851_v45 = vadd.f32 %v9276_v32, %v3850_v13 }
 0x31a   :  { %v4417_v0 = vmul.f32 0.2, %v3851_v45  ;;  %vm4289_vm8 = vcmp.gt.f32.partialorder %v3851_v45, 0.0 }
 0x31b   :  { %6593 = vmatmul.mubr.msk.f32.gmra.mxu1 %vm1661_vm2, %v4527_v3  ;;  %v3846_v3 = vadd.f32 %v7591_v25, %v9276_v32  ;;  %v9530_v32 = vld [vmem:[%s10079_s6] ss:$0 sm:$0xff] }
 0x31c   :  { %5297 = vmatprep.mubr.f32.mxu1 %v7754_v63  ;;  %v3856_v12 = vadd.f32 %v9530_v32, %v7594_v4  ;;  %v4545_v62 = vsel %vm4289_vm8, %v3851_v45, %v4417_v0 }
 0x31d   :  { %v4416_v5 = vmul.f32 0.2, %v3846_v3  ;;  %vm4288_vm7 = vcmp.gt.f32.partialorder %v3846_v3, 0.0 }
 0x31e   :  { %v4418_v40 = vmul.f32 0.2, %v3856_v12  ;;  %vm4290_vm9 = vcmp.gt.f32.partialorder %v3856_v12, 0.0 }
 0x31f   :  { %6594 = vmatmul.mubr.msk.f32.gmra.mxu1 %vm1661_vm2, %v4528_v51  ;;  %v4643_v51 = vsub.s32 0, %v9512_v15  ;;  %v4544_v2 = vsel %vm4288_vm7, %v3846_v3, %v4416_v5 }
 0x320   :  { %5303 = vmatprep.mubr.f32.mxu1 %v7754_v63  ;;  %v4546_v7 = vsel %vm4290_vm9, %v3856_v12, %v4418_v40 }
 0x323   :  { %6595 = vmatmul.mubr.msk.f32.gmra.mxu1 %vm1661_vm2, %v4529_v31  ;;  %v7597_v31 = vpop.f32.mrf.mxu0 }
 0x324   :  { %5309 = vmatprep.mubr.f32.mxu1 %v7754_v63  ;;  %v3866_v10 = vadd.f32 %v9530_v32, %v7597_v31 }
 0x326   :  { %vm4292_vm11 = vcmp.gt.f32.partialorder %v3866_v10, 0.0 }
 0x327   :  { %6596 = vmatmul.mubr.msk.f32.gmra.mxu1 %vm1661_vm2, %v4530_v8  ;;  %v9525_v8 = vrot.slane %v4639_v42, %v4643_v51 }
 0x328   :  { %5315 = vmatprep.mubr.f32.mxu1 %v7754_v63 }
 0x32b   :  { %6597 = vmatmul.mubr.msk.f32.gmra.mxu1 %vm1661_vm2, %v4531_v56  ;;  %v3860_v56 = vpop.f32.mrf.mxu0 }
 0x32c   :  { %5321 = vmatprep.mubr.f32.mxu1 %v7754_v63 }
 0x32d   :  { %v7600_v27 = vpop.f32.mrf.mxu0 }
 0x32e   :  { %v3876_v1 = vadd.f32 %v9530_v32, %v7600_v27 }
 0x32f   :  { %6598 = vmatmul.mubr.msk.f32.gmra.mxu1 %vm1661_vm2, %v4532_v44  ;;  %v3870_v6 = vpop.f32.mrf.mxu0 }
 0x330   :  { %5327 = vmatprep.mubr.f32.mxu1 %v7754_v63  ;;  %v3871_v58 = vadd.f32 %v9530_v32, %v3870_v6  ;;  %v4422_v51 = vmul.f32 0.2, %v3876_v1  ;;  %vm4294_vm13 = vcmp.gt.f32.partialorder %v3876_v1, 0.0 }
 0x331   :  { %v7603_v28 = vpop.f32.mrf.mxu0 }
 0x332   :  { %v4421_v30 = vmul.f32 0.2, %v3871_v58  ;;  %vm4293_vm12 = vcmp.gt.f32.partialorder %v3871_v58, 0.0  ;;  %v4550_v12 = vsel %vm4294_vm13, %v3876_v1, %v4422_v51  ;;  %v3886_v0 = vadd.f32 %v9530_v32, %v7603_v28 }
 0x333   :  { %6599 = vmatmul.mubr.msk.f32.gmra.mxu1 %vm1661_vm2, %v4533_v55  ;;  %v3861_v55 = vadd.f32 %v9530_v32, %v3860_v56 }
 0x334   :  { %5333 = vmatprep.mubr.f32.mxu1 %v7754_v63  ;;  %v4549_v5 = vsel %vm4293_vm12, %v3871_v58, %v4421_v30  ;;  %v4424_v27 = vmul.f32 0.2, %v3886_v0  ;;  %vm4296_vm15 = vcmp.gt.f32.partialorder %v3886_v0, 0.0 }
 0x335   :  { %vm4291_vm10 = vcmp.gt.f32.partialorder %v3861_v55, 0.0 }
 0x337   :  { %6600 = vmatmul.mubr.msk.f32.gmra.mxu1 %vm1661_vm2, %v4534_v20 }
 0x338   :  { %5339 = vmatprep.mubr.f32.mxu1 %v7754_v63 }
 0x33b   :  { %6601 = vmatmul.mubr.msk.f32.gmra.mxu1 %vm1661_vm2, %v4535_v24 }
 0x33c   :  { %5345 = vmatprep.mubr.f32.mxu1 %v7754_v63 }
 0x33f   :  { %6602 = vmatmul.mubr.msk.f32.gmra.mxu1 %vm1661_vm2, %v4536_v36  ;;  %v4419_v36 = vmul.f32 0.2, %v3861_v55 }
 0x340   :  { %5351 = vmatprep.mubr.f32.mxu1 %v7754_v63 }
 0x341   :  { %v4547_v50 = vsel %vm4291_vm10, %v3861_v55, %v4419_v36  ;;  %v4552_v36 = vsel %vm4296_vm15, %v3886_v0, %v4424_v27 }
 0x343   :  { %6603 = vmatmul.mubr.msk.f32.gmra.mxu1 %vm1661_vm2, %v4537_v46 }
 0x344   :  { %5357 = vmatprep.mubr.f32.mxu1 %v7754_v63 }
 0x347   :  { %6604 = vmatmul.mubr.msk.f32.gmra.mxu1 %vm1661_vm2, %v4538_v19  ;;  %v4420_v19 = vmul.f32 0.2, %v3866_v10 }
 0x348   :  { %5363 = vmatprep.mubr.f32.mxu1 %v7754_v63 }
 0x349   :  { %v4548_v60 = vsel %vm4292_vm11, %v3866_v10, %v4420_v19 }
 0x34b   :  { %6605 = vmatmul.mubr.msk.f32.gmra.mxu1 %vm1661_vm2, %v4539_v37 }
 0x34c   :  { %5369 = vmatprep.mubr.f32.mxu1 %v7754_v63 }
 0x34f   :  { %6606 = vmatmul.mubr.msk.f32.gmra.mxu1 %vm1661_vm2, %v4540_v34 }
 0x350   :  { %5375 = vmatprep.mubr.f32.mxu1 %v7754_v63 }
 0x353   :  { %6607 = vmatmul.mubr.msk.f32.gmra.mxu1 %vm1661_vm2, %v4541_v9  ;;  %v3880_v9 = vpop.f32.mrf.mxu0 }
 0x354   :  { %5381 = vmatprep.mubr.f32.mxu1 %v7754_v63 }
 0x355   :  { %v7606_v45 = vpop.f32.mrf.mxu0 }
 0x356   :  { %v3896_v6 = vadd.f32 %v9530_v32, %v7606_v45 }
 0x357   :  { %6608 = vmatmul.mubr.msk.f32.gmra.mxu1 %vm1661_vm2, %v4542_v11 }
 0x358   :  { %5387 = vmatprep.mubr.f32.mxu1 %v7754_v63  ;;  %v4426_v58 = vmul.f32 0.2, %v3896_v6  ;;  %vm4298_vm1 = vcmp.gt.f32.partialorder %v3896_v6, 0.0 }
 0x35a   :  { %v4554_v30 = vsel %vm4298_vm1, %v3896_v6, %v4426_v58 }
 0x35b   :  { %v5101_v49 = vpop.f32.mrf.mxu1  ;;  %6609 = vmatmul.mubr.msk.f32.gmra.mxu1 %vm1661_vm2, %v4543_v35  ;;  %v3881_v35 = vadd.f32 %v9530_v32, %v3880_v9 }
 0x35c   :  { %5393 = vmatprep.mubr.f32.mxu1 %v7754_v63  ;;  %v5102_v44 = vadd.f32 %v5101_v49, %v9525_v8 }
 0x35d   :  { %v5103_v29 = vpop.f32.mrf.mxu1  ;;  %v4423_v56 = vmul.f32 0.2, %v3881_v35  ;;  %vm4295_vm14 = vcmp.gt.f32.partialorder %v3881_v35, 0.0 }
 0x35e   :  { %v5104_v43 = vadd.f32 %v5103_v29, %v9533_v17 }
 0x35f   :  { %v5107_v33 = vpop.f32.mrf.mxu1  ;;  %6610 = vmatmul.mubr.msk.f32.gmra.mxu1 %vm1661_vm2, %v4544_v2 }
 0x360   :  { %5399 = vmatprep.mubr.f32.mxu1 %v7754_v63  ;;  %v5108_v21 = vadd.f32 %v5107_v33, %v9525_v8  ;;  %v3890_v33 = vpop.f32.mrf.mxu0 }
 0x361   :  { %v5109_v22 = vpop.f32.mrf.mxu1 }
 0x362   :  { %v5868_v20 = vadd.f32 %v5108_v21, %v5102_v44  ;;  %v5110_v38 = vadd.f32 %v5109_v22, %v9533_v17 }
 0x363   :  { %v5113_v52 = vpop.f32.mrf.mxu1  ;;  %6611 = vmatmul.mubr.msk.f32.gmra.mxu1 %vm1661_vm2, %v4545_v62 }
 0x364   :  { %5405 = vmatprep.mubr.f32.mxu1 %v7754_v63  ;;  %v6001_v14 = vadd.f32 %v5110_v38, %v5104_v43  ;;  %v5114_v16 = vadd.f32 %v5113_v52, %v9525_v8  ;;  %v4551_v43 = vsel %vm4295_vm14, %v3881_v35, %v4423_v56  ;;  %v7609_v38 = vpop.f32.mrf.mxu0 }
 0x365   :  { %v5115_v24 = vpop.f32.mrf.mxu1  ;;  %v3906_v9 = vadd.f32 %v9530_v32, %v7609_v38 }
 0x366   :  { %v5869_v47 = vadd.f32 %v5868_v20, %v5114_v16  ;;  %v5116_v61 = vadd.f32 %v5115_v24, %v9533_v17  ;;  %v3891_v20 = vadd.f32 %v9530_v32, %v3890_v33 }
 0x367   :  { %v5119_v57 = vpop.f32.mrf.mxu1  ;;  %6612 = vmatmul.mubr.msk.f32.gmra.mxu1 %vm1661_vm2, %v4546_v7  ;;  %v4428_v35 = vmul.f32 0.2, %v3906_v9  ;;  %vm4300_vm4 = vcmp.gt.f32.partialorder %v3906_v9, 0.0 }
 0x368   :  { %5411 = vmatprep.mubr.f32.mxu1 %v7754_v63  ;;  %v6002_v46 = vadd.f32 %v6001_v14, %v5116_v61  ;;  %v5120_v48 = vadd.f32 %v5119_v57, %v9525_v8  ;;  %vm4297_vm0 = vcmp.gt.f32.partialorder %v3891_v20, 0.0  ;;  %v3900_v61 = vpop.f32.mrf.mxu0 }
 0x369   :  { %v5121_v54 = vpop.f32.mrf.mxu1  ;;  %v4556_v56 = vsel %vm4300_vm4, %v3906_v9, %v4428_v35 }
 0x36a   :  { %v5870_v39 = vadd.f32 %v5869_v47, %v5120_v48  ;;  %v5122_v37 = vadd.f32 %v5121_v54, %v9533_v17  ;;  %v4425_v47 = vmul.f32 0.2, %v3891_v20 }
 0x36b   :  { %v5125_v59 = vpop.f32.mrf.mxu1  ;;  %6613 = vmatmul.mubr.msk.f32.gmra.mxu1 %vm1661_vm2, %v4547_v50 }
 0x36c   :  { %5417 = vmatprep.mubr.f32.mxu1 %v7754_v63  ;;  %v6003_v25 = vadd.f32 %v6002_v46, %v5122_v37  ;;  %v5126_v34 = vadd.f32 %v5125_v59, %v9525_v8  ;;  %v4553_v28 = vsel %vm4297_vm0, %v3891_v20, %v4425_v47  ;;  %v7612_v37 = vpop.f32.mrf.mxu0 }
 0x36d   :  { %v5127_v41 = vpop.f32.mrf.mxu1  ;;  %v3916_v33 = vadd.f32 %v9530_v32, %v7612_v37 }
 0x36e   :  { %v5871_v53 = vadd.f32 %v5870_v39, %v5126_v34  ;;  %v5128_v4 = vadd.f32 %v5127_v41, %v9533_v17  ;;  %v3901_v39 = vadd.f32 %v9530_v32, %v3900_v61 }
 0x36f   :  { %v5131_v11 = vpop.f32.mrf.mxu1  ;;  %6614 = vmatmul.mubr.msk.f32.gmra.mxu1 %vm1661_vm2, %v4548_v60  ;;  %v4430_v20 = vmul.f32 0.2, %v3916_v33  ;;  %vm4302_vm6 = vcmp.gt.f32.partialorder %v3916_v33, 0.0 }
 0x370   :  { %5423 = vmatprep.mubr.f32.mxu1 %v7754_v63  ;;  %v6004_v3 = vadd.f32 %v6003_v25, %v5128_v4  ;;  %v5132_v26 = vadd.f32 %v5131_v11, %v9525_v8  ;;  %vm4299_vm3 = vcmp.gt.f32.partialorder %v3901_v39, 0.0  ;;  %v3910_v4 = vpop.f32.mrf.mxu0 }
 0x371   :  { %v5133_v13 = vpop.f32.mrf.mxu1  ;;  %v4558_v61 = vsel %vm4302_vm6, %v3916_v33, %v4430_v20 }
 0x372   :  { %v5872_v42 = vadd.f32 %v5871_v53, %v5132_v26  ;;  %v5134_v31 = vadd.f32 %v5133_v13, %v9533_v17  ;;  %v4427_v53 = vmul.f32 0.2, %v3901_v39 }
 0x373   :  { %v5137_v49 = vpop.f32.mrf.mxu1  ;;  %6615 = vmatmul.mubr.msk.f32.gmra.mxu1 %vm1661_vm2, %v4549_v5 }
 0x374   :  { %5429 = vmatprep.mubr.f32.mxu1 %v7754_v63  ;;  %v6005_v18 = vadd.f32 %v6004_v3, %v5134_v31  ;;  %v5138_v29 = vadd.f32 %v5137_v49, %v9525_v8  ;;  %v4555_v45 = vsel %vm4299_vm3, %v3901_v39, %v4427_v53  ;;  %v7615_v31 = vpop.f32.mrf.mxu0 }
 0x375   :  { %v5139_v2 = vpop.f32.mrf.mxu1 }
 0x376   :  { %v5873_v44 = vadd.f32 %v5872_v42, %v5138_v29  ;;  %v5140_v21 = vadd.f32 %v5139_v2, %v9533_v17  ;;  %v3911_v42 = vadd.f32 %v9530_v32, %v3910_v4 }
 0x377   :  { %v5143_v22 = vpop.f32.mrf.mxu1  ;;  %6616 = vmatmul.mubr.msk.f32.gmra.mxu1 %vm1661_vm2, %v4550_v12 }
 0x378   :  { %5435 = vmatprep.mubr.f32.mxu1 %v7754_v63  ;;  %v6006_v40 = vadd.f32 %v6005_v18, %v5140_v21  ;;  %v5144_v62 = vadd.f32 %v5143_v22, %v9525_v8  ;;  %vm4301_vm5 = vcmp.gt.f32.partialorder %v3911_v42, 0.0  ;;  %v3920_v21 = vpop.f32.mrf.mxu0 }
 0x379   :  { %v5145_v55 = vpop.f32.mrf.mxu1 }
 0x37a   :  { %v5874_v52 = vadd.f32 %v5873_v44, %v5144_v62  ;;  %v5146_v14 = vadd.f32 %v5145_v55, %v9533_v17  ;;  %v4429_v44 = vmul.f32 0.2, %v3911_v42 }
 0x37b   :  { %v5149_v16 = vpop.f32.mrf.mxu1  ;;  %6617 = vmatmul.mubr.msk.f32.gmra.mxu1 %vm1661_vm2, %v4551_v43 }
 0x37c   :  { %5441 = vmatprep.mubr.f32.mxu1 %v7754_v63  ;;  %v6007_v24 = vadd.f32 %v6006_v40, %v5146_v14  ;;  %v5150_v7 = vadd.f32 %v5149_v16, %v9525_v8  ;;  %v4557_v38 = vsel %vm4301_vm5, %v3911_v42, %v4429_v44  ;;  %v7618_v14 = vpop.f32.mrf.mxu0 }
 0x37d   :  { %v5151_v10 = vpop.f32.mrf.mxu1  ;;  %v3936_v9 = vadd.f32 %v9530_v32, %v7618_v14 }
 0x37e   :  { %v5875_v57 = vadd.f32 %v5874_v52, %v5150_v7  ;;  %v5152_v46 = vadd.f32 %v5151_v10, %v9533_v17  ;;  %v3921_v52 = vadd.f32 %v9530_v32, %v3920_v21 }
 0x37f   :  { %v5155_v48 = vpop.f32.mrf.mxu1  ;;  %6618 = vmatmul.mubr.msk.f32.gmra.mxu1 %vm1661_vm2, %v4552_v36  ;;  %v3926_v36 = vadd.f32 %v9530_v32, %v7615_v31  ;;  %vm4306_vm10 = vcmp.gt.f32.partialorder %v3936_v9, 0.0 }
 0x380   :  { %5447 = vmatprep.mubr.f32.mxu1 %v7754_v63  ;;  %v6008_v54 = vadd.f32 %v6007_v24, %v5152_v46  ;;  %v5156_v19 = vadd.f32 %v5155_v48, %v9525_v8  ;;  %vm4303_vm7 = vcmp.gt.f32.partialorder %v3921_v52, 0.0 }
 0x381   :  { %v5157_v50 = vpop.f32.mrf.mxu1  ;;  %vm4304_vm8 = vcmp.gt.f32.partialorder %v3926_v36, 0.0 }
 0x382   :  { %v5876_v59 = vadd.f32 %v5875_v57, %v5156_v19  ;;  %v5158_v25 = vadd.f32 %v5157_v50, %v9533_v17  ;;  %v4431_v57 = vmul.f32 0.2, %v3921_v52 }
 0x383   :  { %v5161_v34 = vpop.f32.mrf.mxu1  ;;  %6619 = vmatmul.mubr.msk.f32.gmra.mxu1 %vm1661_vm2, %v4553_v28  ;;  %v4432_v28 = vmul.f32 0.2, %v3926_v36 }
 0x384   :  { %5453 = vmatprep.mubr.f32.mxu1 %v7754_v63  ;;  %v6009_v41 = vadd.f32 %v6008_v54, %v5158_v25  ;;  %v5162_v60 = vadd.f32 %v5161_v34, %v9525_v8  ;;  %v3930_v54 = vpop.f32.mrf.mxu0  ;;  %v4559_v37 = vsel %vm4303_vm7, %v3921_v52, %v4431_v57 }
 0x385   :  { %v5163_v1 = vpop.f32.mrf.mxu1  ;;  %v4560_v4 = vsel %vm4304_vm8, %v3926_v36, %v4432_v28 }
 0x386   :  { %v5877_v11 = vadd.f32 %v5876_v59, %v5162_v60  ;;  %v5164_v3 = vadd.f32 %v5163_v1, %v9533_v17  ;;  %v3931_v59 = vadd.f32 %v9530_v32, %v3930_v54 }
 0x387   :  { %v5167_v26 = vpop.f32.mrf.mxu1  ;;  %6620 = vmatmul.mubr.msk.f32.gmra.mxu1 %vm1661_vm2, %v4554_v30 }
 0x388   :  { %5459 = vmatprep.mubr.f32.mxu1 %v7754_v63  ;;  %v6010_v13 = vadd.f32 %v6009_v41, %v5164_v3  ;;  %v5168_v51 = vadd.f32 %v5167_v26, %v9525_v8  ;;  %v7621_v41 = vpop.f32.mrf.mxu0  ;;  %vm4305_vm9 = vcmp.gt.f32.partialorder %v3931_v59, 0.0 }
 0x389   :  { %v5169_v5 = vpop.f32.mrf.mxu1  ;;  %v3946_v33 = vadd.f32 %v9530_v32, %v7621_v41 }
 0x38a   :  { %v5878_v49 = vadd.f32 %v5877_v11, %v5168_v51  ;;  %v5170_v18 = vadd.f32 %v5169_v5, %v9533_v17  ;;  %v4433_v11 = vmul.f32 0.2, %v3931_v59 }
 0x38b   :  { %v5173_v29 = vpop.f32.mrf.mxu1  ;;  %6621 = vmatmul.mubr.msk.f32.gmra.mxu1 %vm1661_vm2, %v4555_v45  ;;  %v4434_v45 = vmul.f32 0.2, %v3936_v9  ;;  %vm4308_vm12 = vcmp.gt.f32.partialorder %v3946_v33, 0.0 }
 0x38c   :  { %5465 = vmatprep.mubr.f32.mxu1 %v7754_v63  ;;  %v6011_v2 = vadd.f32 %v6010_v13, %v5170_v18  ;;  %v5174_v12 = vadd.f32 %v5173_v29, %v9525_v8  ;;  %v3940_v13 = vpop.f32.mrf.mxu0  ;;  %v4561_v31 = vsel %vm4305_vm9, %v3931_v59, %v4433_v11 }
 0x38d   :  { %v5175_v0 = vpop.f32.mrf.mxu1  ;;  %v4562_v21 = vsel %vm4306_vm10, %v3936_v9, %v4434_v45 }
 0x38e   :  { %v5879_v22 = vadd.f32 %v5878_v49, %v5174_v12  ;;  %v5176_v40 = vadd.f32 %v5175_v0, %v9533_v17  ;;  %v3941_v49 = vadd.f32 %v9530_v32, %v3940_v13 }
 0x38f   :  { %v5179_v62 = vpop.f32.mrf.mxu1  ;;  %6622 = vmatmul.mubr.msk.f32.gmra.mxu1 %vm1661_vm2, %v4556_v56 }
 0x390   :  { %5471 = vmatprep.mubr.f32.mxu1 %v7754_v63  ;;  %v6012_v55 = vadd.f32 %v6011_v2, %v5176_v40  ;;  %v5180_v27 = vadd.f32 %v5179_v62, %v9525_v8  ;;  %v7624_v2 = vpop.f32.mrf.mxu0  ;;  %vm4307_vm11 = vcmp.gt.f32.partialorder %v3941_v49, 0.0 }
 0x391   :  { %v5181_v43 = vpop.f32.mrf.mxu1 }
 0x392   :  { %v5880_v16 = vadd.f32 %v5879_v22, %v5180_v27  ;;  %v5182_v24 = vadd.f32 %v5181_v43, %v9533_v17  ;;  %v4435_v22 = vmul.f32 0.2, %v3941_v49 }
 0x393   :  { %v5185_v7 = vpop.f32.mrf.mxu1  ;;  %6623 = vmatmul.mubr.msk.f32.gmra.mxu1 %vm1661_vm2, %v4557_v38  ;;  %v4436_v38 = vmul.f32 0.2, %v3946_v33 }
 0x394   :  { %v5186_v10 = vadd.f32 %v5185_v7, %v9525_v8  ;;  %5477 = vmatprep.mubr.f32.mxu1 %v7754_v63  ;;  %v6013_v6 = vadd.f32 %v6012_v55, %v5182_v24  ;;  %v3950_v55 = vpop.f32.mrf.mxu0  ;;  %v4563_v14 = vsel %vm4307_vm11, %v3941_v49, %v4435_v22 }
 0x395   :  { %v5187_v47 = vpop.f32.mrf.mxu1 }
 0x396   :  { %v5881_v46 = vadd.f32 %v5880_v16, %v5186_v10  ;;  %v5188_v48 = vadd.f32 %v5187_v47, %v9533_v17  ;;  %v3951_v16 = vadd.f32 %v9530_v32, %v3950_v55  ;;  %v7627_v10 = vpop.f32.mrf.mxu0 }
 0x397   :  { %v5191_v19 = vpop.f32.mrf.mxu1  ;;  %6624 = vmatmul.mubr.msk.f32.gmra.mxu1 %vm1661_vm2, %v4558_v61  ;;  %v3956_v61 = vadd.f32 %v9530_v32, %v7624_v2 }
 0x398   :  { %v6014_v50 = vadd.f32 %v6013_v6, %v5188_v48  ;;  %v5192_v58 = vadd.f32 %v5191_v19, %v9525_v8  ;;  %5483 = vmatprep.mubr.f32.mxu1 %v7754_v63  ;;  %v4437_v48 = vmul.f32 0.2, %v3951_v16  ;;  %vm4309_vm13 = vcmp.gt.f32.partialorder %v3951_v16, 0.0 }
 0x399   :  { %v5193_v39 = vpop.f32.mrf.mxu1  ;;  %vm4310_vm14 = vcmp.gt.f32.partialorder %v3956_v61, 0.0 }
 0x39a   :  { %v5882_v25 = vadd.f32 %v5881_v46, %v5192_v58  ;;  %v5194_v34 = vadd.f32 %v5193_v39, %v9533_v17  ;;  %v4564_v46 = vsel %vm4308_vm12, %v3946_v33, %v4436_v38 }
 0x39b   :  { %v5197_v60 = vpop.f32.mrf.mxu1  ;;  %6625 = vmatmul.mubr.msk.f32.gmra.mxu1 %vm1661_vm2, %v4559_v37  ;;  %v4438_v37 = vmul.f32 0.2, %v3956_v61 }
 0x39c   :  { %v6015_v1 = vadd.f32 %v6014_v50, %v5194_v34  ;;  %v5198_v30 = vadd.f32 %v5197_v60, %v9525_v8  ;;  %5489 = vmatprep.mubr.f32.mxu1 %v7754_v63  ;;  %v3960_v50 = vpop.f32.mrf.mxu0 }
 0x39d   :  { %v5199_v53 = vpop.f32.mrf.mxu1  ;;  %v3961_v34 = vadd.f32 %v9530_v32, %v3960_v50 }
 0x39e   :  { %v5883_v3 = vadd.f32 %v5882_v25, %v5198_v30  ;;  %v5200_v26 = vadd.f32 %v5199_v53, %v9533_v17  ;;  %v4565_v25 = vsel %vm4309_vm13, %v3951_v16, %v4437_v48 }
 0x39f   :  { %v5203_v51 = vpop.f32.mrf.mxu1  ;;  %6626 = vmatmul.mubr.msk.f32.gmra.mxu1 %vm1661_vm2, %v4560_v4  ;;  %v3966_v4 = vadd.f32 %v9530_v32, %v7627_v10  ;;  %vm4311_vm15 = vcmp.gt.f32.partialorder %v3961_v34, 0.0 }
 0x3a0   :  { %v6016_v5 = vadd.f32 %v6015_v1, %v5200_v26  ;;  %v5204_v35 = vadd.f32 %v5203_v51, %v9525_v8  ;;  %5495 = vmatprep.mubr.f32.mxu1 %v7754_v63  ;;  %v7630_v1 = vpop.f32.mrf.mxu0  ;;  %v4439_v26 = vmul.f32 0.2, %v3961_v34 }
 0x3a1   :  { %v5205_v42 = vpop.f32.mrf.mxu1  ;;  %vm4312_vm0 = vcmp.gt.f32.partialorder %v3966_v4, 0.0 }
 0x3a2   :  { %v5884_v18 = vadd.f32 %v5883_v3, %v5204_v35  ;;  %v5206_v29 = vadd.f32 %v5205_v42, %v9533_v17  ;;  %v4566_v3 = vsel %vm4310_vm14, %v3956_v61, %v4438_v37 }
 0x3a3   :  { %v5209_v12 = vpop.f32.mrf.mxu1  ;;  %6627 = vmatmul.mubr.msk.f32.gmra.mxu1 %vm1661_vm2, %v4561_v31  ;;  %v4440_v31 = vmul.f32 0.2, %v3966_v4 }
 0x3a4   :  { %v6017_v0 = vadd.f32 %v6016_v5, %v5206_v29  ;;  %v5210_v56 = vadd.f32 %v5209_v12, %v9525_v8  ;;  %5501 = vmatprep.mubr.f32.mxu1 %v7754_v63  ;;  %v3970_v5 = vpop.f32.mrf.mxu0 }
 0x3a5   :  { %v5211_v44 = vpop.f32.mrf.mxu1  ;;  %v3971_v29 = vadd.f32 %v9530_v32, %v3970_v5 }
 0x3a6   :  { %v5885_v40 = vadd.f32 %v5884_v18, %v5210_v56  ;;  %v5212_v62 = vadd.f32 %v5211_v44, %v9533_v17  ;;  %v4567_v18 = vsel %vm4311_vm15, %v3961_v34, %v4439_v26 }
 0x3a7   :  { %v5215_v27 = vpop.f32.mrf.mxu1  ;;  %6628 = vmatmul.mubr.msk.f32.gmra.mxu1 %vm1661_vm2, %v4562_v21  ;;  %v3976_v21 = vadd.f32 %v9530_v32, %v7630_v1  ;;  %vm4313_vm1 = vcmp.gt.f32.partialorder %v3971_v29, 0.0 }
 0x3a8   :  { %v6018_v43 = vadd.f32 %v6017_v0, %v5212_v62  ;;  %v5216_v20 = vadd.f32 %v5215_v27, %v9525_v8  ;;  %5507 = vmatprep.mubr.f32.mxu1 %v7754_v63  ;;  %v7633_v0 = vpop.f32.mrf.mxu0  ;;  %v4441_v62 = vmul.f32 0.2, %v3971_v29 }
 0x3a9   :  { %v5217_v52 = vpop.f32.mrf.mxu1  ;;  %vm4314_vm3 = vcmp.gt.f32.partialorder %v3976_v21, 0.0 }
 0x3aa   :  { %v5886_v24 = vadd.f32 %v5885_v40, %v5216_v20  ;;  %v5218_v7 = vadd.f32 %v5217_v52, %v9533_v17  ;;  %v4568_v40 = vsel %vm4312_vm0, %v3966_v4, %v4440_v31 }
 0x3ab   :  { %v5221_v36 = vpop.f32.mrf.mxu1  ;;  %6629 = vmatmul.mubr.msk.f32.gmra.mxu1 %vm1661_vm2, %v4563_v14  ;;  %v4442_v14 = vmul.f32 0.2, %v3976_v21 }
 0x3ac   :  { %v6019_v6 = vadd.f32 %v6018_v43, %v5218_v7  ;;  %v5222_v47 = vadd.f32 %v5221_v36, %v9525_v8  ;;  %5513 = vmatprep.mubr.f32.mxu1 %v7754_v63  ;;  %v3980_v43 = vpop.f32.mrf.mxu0 }
 0x3ad   :  { %v5223_v57 = vpop.f32.mrf.mxu1  ;;  %v3981_v7 = vadd.f32 %v9530_v32, %v3980_v43 }
 0x3ae   :  { %v5887_v54 = vadd.f32 %v5886_v24, %v5222_v47  ;;  %v5224_v19 = vadd.f32 %v5223_v57, %v9533_v17  ;;  %v4569_v24 = vsel %vm4313_vm1, %v3971_v29, %v4441_v62 }
 0x3af   :  { %v5227_v58 = vpop.f32.mrf.mxu1  ;;  %6630 = vmatmul.mubr.msk.f32.gmra.mxu1 %vm1661_vm2, %v4564_v46  ;;  %v3986_v46 = vadd.f32 %v9530_v32, %v7633_v0  ;;  %vm4315_vm4 = vcmp.gt.f32.partialorder %v3981_v7, 0.0 }
 0x3b0   :  { %v6020_v28 = vadd.f32 %v6019_v6, %v5224_v19  ;;  %v5228_v39 = vadd.f32 %v5227_v58, %v9525_v8  ;;  %5519 = vmatprep.mubr.f32.mxu1 %v7754_v63  ;;  %v7636_v6 = vpop.f32.mrf.mxu0  ;;  %v4443_v19 = vmul.f32 0.2, %v3981_v7 }
 0x3b1   :  { %v5229_v59 = vpop.f32.mrf.mxu1  ;;  %vm4316_vm5 = vcmp.gt.f32.partialorder %v3986_v46, 0.0 }
 0x3b2   :  { %v5888_v41 = vadd.f32 %v5887_v54, %v5228_v39  ;;  %v5230_v60 = vadd.f32 %v5229_v59, %v9533_v17  ;;  %v4570_v54 = vsel %vm4314_vm3, %v3976_v21, %v4442_v14 }
 0x3b3   :  { %v5233_v30 = vpop.f32.mrf.mxu1  ;;  %6631 = vmatmul.mubr.msk.f32.gmra.mxu1 %vm1661_vm2, %v4565_v25  ;;  %v4444_v25 = vmul.f32 0.2, %v3986_v46 }
 0x3b4   :  { %v6021_v9 = vadd.f32 %v6020_v28, %v5230_v60  ;;  %v5234_v53 = vadd.f32 %v5233_v30, %v9525_v8  ;;  %5525 = vmatprep.mubr.f32.mxu1 %v7754_v63  ;;  %v3990_v28 = vpop.f32.mrf.mxu0 }
 0x3b5   :  { %v5235_v11 = vpop.f32.mrf.mxu1  ;;  %v3991_v60 = vadd.f32 %v9530_v32, %v3990_v28 }
 0x3b6   :  { %v5889_v13 = vadd.f32 %v5888_v41, %v5234_v53  ;;  %v5236_v51 = vadd.f32 %v5235_v11, %v9533_v17  ;;  %v4571_v41 = vsel %vm4315_vm4, %v3981_v7, %v4443_v19 }
 0x3b7   :  { %v5239_v35 = vpop.f32.mrf.mxu1  ;;  %6632 = vmatmul.mubr.msk.f32.gmra.mxu1 %vm1661_vm2, %v4566_v3  ;;  %v3996_v3 = vadd.f32 %v9530_v32, %v7636_v6  ;;  %vm4317_vm6 = vcmp.gt.f32.partialorder %v3991_v60, 0.0 }
 0x3b8   :  { %v6022_v45 = vadd.f32 %v6021_v9, %v5236_v51  ;;  %v5240_v42 = vadd.f32 %v5239_v35, %v9525_v8  ;;  %5531 = vmatprep.mubr.f32.mxu1 %v7754_v63  ;;  %v7639_v9 = vpop.f32.mrf.mxu0  ;;  %v4445_v51 = vmul.f32 0.2, %v3991_v60 }
 0x3b9   :  { %v5241_v49 = vpop.f32.mrf.mxu1  ;;  %vm4318_vm7 = vcmp.gt.f32.partialorder %v3996_v3, 0.0 }
 0x3ba   :  { %v5890_v2 = vadd.f32 %v5889_v13, %v5240_v42  ;;  %v5242_v12 = vadd.f32 %v5241_v49, %v9533_v17  ;;  %v4572_v13 = vsel %vm4316_vm5, %v3986_v46, %v4444_v25 }
 0x3bb   :  { %v5245_v56 = vpop.f32.mrf.mxu1  ;;  %6633 = vmatmul.mubr.msk.f32.gmra.mxu1 %vm1661_vm2, %v4567_v18  ;;  %v4446_v18 = vmul.f32 0.2, %v3996_v3 }
 0x3bc   :  { %v6023_v33 = vadd.f32 %v6022_v45, %v5242_v12  ;;  %v5246_v44 = vadd.f32 %v5245_v56, %v9525_v8  ;;  %5537 = vmatprep.mubr.f32.mxu1 %v7754_v63  ;;  %v4000_v45 = vpop.f32.mrf.mxu0 }
 0x3bd   :  { %v5247_v22 = vpop.f32.mrf.mxu1  ;;  %v4001_v12 = vadd.f32 %v9530_v32, %v4000_v45 }
 0x3be   :  { %v5891_v55 = vadd.f32 %v5890_v2, %v5246_v44  ;;  %v5248_v27 = vadd.f32 %v5247_v22, %v9533_v17  ;;  %v4573_v2 = vsel %vm4317_vm6, %v3991_v60, %v4445_v51 }
 0x3bf   :  { %v5251_v20 = vpop.f32.mrf.mxu1  ;;  %6634 = vmatmul.mubr.msk.f32.gmra.mxu1 %vm1661_vm2, %v4568_v40  ;;  %v4006_v40 = vadd.f32 %v9530_v32, %v7639_v9  ;;  %vm4319_vm8 = vcmp.gt.f32.partialorder %v4001_v12, 0.0 }
 0x3c0   :  { %v6024_v38 = vadd.f32 %v6023_v33, %v5248_v27  ;;  %v5252_v52 = vadd.f32 %v5251_v20, %v9525_v8  ;;  %5543 = vmatprep.mubr.f32.mxu1 %v7754_v63  ;;  %v7642_v33 = vpop.f32.mrf.mxu0  ;;  %v4447_v27 = vmul.f32 0.2, %v4001_v12 }
 0x3c1   :  { %v5253_v16 = vpop.f32.mrf.mxu1  ;;  %vm4320_vm9 = vcmp.gt.f32.partialorder %v4006_v40, 0.0 }
 0x3c2   :  { %v5892_v10 = vadd.f32 %v5891_v55, %v5252_v52  ;;  %v5254_v36 = vadd.f32 %v5253_v16, %v9533_v17  ;;  %v4574_v55 = vsel %vm4318_vm7, %v3996_v3, %v4446_v18 }
 0x3c3   :  { %v5257_v47 = vpop.f32.mrf.mxu1  ;;  %6635 = vmatmul.mubr.msk.f32.gmra.mxu1 %vm1661_vm2, %v4569_v24  ;;  %v4448_v24 = vmul.f32 0.2, %v4006_v40 }
 0x3c4   :  { %v6025_v61 = vadd.f32 %v6024_v38, %v5254_v36  ;;  %v5258_v57 = vadd.f32 %v5257_v47, %v9525_v8  ;;  %5549 = vmatprep.mubr.f32.mxu1 %v7754_v63  ;;  %v4010_v38 = vpop.f32.mrf.mxu0 }
 0x3c5   :  { %v5259_v48 = vpop.f32.mrf.mxu1  ;;  %v4011_v36 = vadd.f32 %v9530_v32, %v4010_v38 }
 0x3c6   :  { %v5893_v50 = vadd.f32 %v5892_v10, %v5258_v57  ;;  %v5260_v58 = vadd.f32 %v5259_v48, %v9533_v17  ;;  %v4575_v10 = vsel %vm4319_vm8, %v4001_v12, %v4447_v27 }
 0x3c7   :  { %v5263_v39 = vpop.f32.mrf.mxu1  ;;  %6636 = vmatmul.mubr.msk.f32.gmra.mxu1 %vm1661_vm2, %v4570_v54  ;;  %v4016_v54 = vadd.f32 %v9530_v32, %v7642_v33  ;;  %vm4321_vm10 = vcmp.gt.f32.partialorder %v4011_v36, 0.0 }
 0x3c8   :  { %v6026_v37 = vadd.f32 %v6025_v61, %v5260_v58  ;;  %v5264_v59 = vadd.f32 %v5263_v39, %v9525_v8  ;;  %5555 = vmatprep.mubr.f32.mxu1 %v7754_v63  ;;  %v7645_v61 = vpop.f32.mrf.mxu0  ;;  %v4449_v58 = vmul.f32 0.2, %v4011_v36 }
 0x3c9   :  { %v5265_v34 = vpop.f32.mrf.mxu1  ;;  %vm4322_vm11 = vcmp.gt.f32.partialorder %v4016_v54, 0.0 }
 0x3ca   :  { %v5894_v1 = vadd.f32 %v5893_v50, %v5264_v59  ;;  %v5266_v30 = vadd.f32 %v5265_v34, %v9533_v17  ;;  %v4576_v50 = vsel %vm4320_vm9, %v4006_v40, %v4448_v24 }
 0x3cb   :  { %v5269_v53 = vpop.f32.mrf.mxu1  ;;  %6637 = vmatmul.mubr.msk.f32.gmra.mxu1 %vm1661_vm2, %v4571_v41  ;;  %v4450_v41 = vmul.f32 0.2, %v4016_v54 }
 0x3cc   :  { %v6027_v4 = vadd.f32 %v6026_v37, %v5266_v30  ;;  %v5270_v11 = vadd.f32 %v5269_v53, %v9525_v8  ;;  %5561 = vmatprep.mubr.f32.mxu1 %v7754_v63  ;;  %v4020_v37 = vpop.f32.mrf.mxu0 }
 0x3cd   :  { %v5271_v26 = vpop.f32.mrf.mxu1  ;;  %v4021_v30 = vadd.f32 %v9530_v32, %v4020_v37 }
 0x3ce   :  { %v5895_v5 = vadd.f32 %v5894_v1, %v5270_v11  ;;  %v5272_v35 = vadd.f32 %v5271_v26, %v9533_v17  ;;  %v4577_v1 = vsel %vm4321_vm10, %v4011_v36, %v4449_v58 }
 0x3cf   :  { %v5275_v42 = vpop.f32.mrf.mxu1  ;;  %6638 = vmatmul.mubr.msk.f32.gmra.mxu1 %vm1661_vm2, %v4572_v13  ;;  %v4026_v13 = vadd.f32 %v9530_v32, %v7645_v61  ;;  %vm4323_vm12 = vcmp.gt.f32.partialorder %v4021_v30, 0.0 }
 0x3d0   :  { %v6028_v31 = vadd.f32 %v6027_v4, %v5272_v35  ;;  %v5276_v49 = vadd.f32 %v5275_v42, %v9525_v8  ;;  %5567 = vmatprep.mubr.f32.mxu1 %v7754_v63  ;;  %v7648_v4 = vpop.f32.mrf.mxu0  ;;  %v4451_v35 = vmul.f32 0.2, %v4021_v30 }
 0x3d1   :  { %v5277_v29 = vpop.f32.mrf.mxu1  ;;  %vm4324_vm13 = vcmp.gt.f32.partialorder %v4026_v13, 0.0 }
 0x3d2   :  { %v5896_v0 = vadd.f32 %v5895_v5, %v5276_v49  ;;  %v5278_v56 = vadd.f32 %v5277_v29, %v9533_v17  ;;  %v4578_v5 = vsel %vm4322_vm11, %v4016_v54, %v4450_v41 }
 0x3d3   :  { %v5281_v44 = vpop.f32.mrf.mxu1  ;;  %6639 = vmatmul.mubr.msk.f32.gmra.mxu1 %vm1661_vm2, %v4573_v2  ;;  %v4452_v2 = vmul.f32 0.2, %v4026_v13 }
 0x3d4   :  { %v6029_v21 = vadd.f32 %v6028_v31, %v5278_v56  ;;  %v5282_v22 = vadd.f32 %v5281_v44, %v9525_v8  ;;  %5573 = vmatprep.mubr.f32.mxu1 %v7754_v63  ;;  %v4030_v31 = vpop.f32.mrf.mxu0 }
 0x3d5   :  { %v5283_v62 = vpop.f32.mrf.mxu1  ;;  %v4031_v56 = vadd.f32 %v9530_v32, %v4030_v31 }
 0x3d6   :  { %v5897_v43 = vadd.f32 %v5896_v0, %v5282_v22  ;;  %v5284_v20 = vadd.f32 %v5283_v62, %v9533_v17  ;;  %v4579_v0 = vsel %vm4323_vm12, %v4021_v30, %v4451_v35 }
 0x3d7   :  { %v5287_v52 = vpop.f32.mrf.mxu1  ;;  %6640 = vmatmul.mubr.msk.f32.gmra.mxu1 %vm1661_vm2, %v4574_v55  ;;  %v4036_v55 = vadd.f32 %v9530_v32, %v7648_v4  ;;  %vm4325_vm14 = vcmp.gt.f32.partialorder %v4031_v56, 0.0 }
 0x3d8   :  { %v6030_v14 = vadd.f32 %v6029_v21, %v5284_v20  ;;  %v5288_v16 = vadd.f32 %v5287_v52, %v9525_v8  ;;  %5579 = vmatprep.mubr.f32.mxu1 %v7754_v63  ;;  %v7651_v21 = vpop.f32.mrf.mxu0  ;;  %v4453_v20 = vmul.f32 0.2, %v4031_v56 }
 0x3d9   :  { %v5289_v7 = vpop.f32.mrf.mxu1  ;;  %vm4326_vm15 = vcmp.gt.f32.partialorder %v4036_v55, 0.0 }
 0x3da   :  { %v5898_v6 = vadd.f32 %v5897_v43, %v5288_v16  ;;  %v5290_v47 = vadd.f32 %v5289_v7, %v9533_v17  ;;  %v4580_v43 = vsel %vm4324_vm13, %v4026_v13, %v4452_v2 }
 0x3db   :  { %v5293_v57 = vpop.f32.mrf.mxu1  ;;  %6641 = vmatmul.mubr.msk.f32.gmra.mxu1 %vm1661_vm2, %v4575_v10  ;;  %v4454_v10 = vmul.f32 0.2, %v4036_v55 }
 0x3dc   :  { %v6031_v46 = vadd.f32 %v6030_v14, %v5290_v47  ;;  %v5294_v48 = vadd.f32 %v5293_v57, %v9525_v8  ;;  %5585 = vmatprep.mubr.f32.mxu1 %v7754_v63  ;;  %v4040_v14 = vpop.f32.mrf.mxu0 }
 0x3dd   :  { %v5295_v19 = vpop.f32.mrf.mxu1  ;;  %v4041_v47 = vadd.f32 %v9530_v32, %v4040_v14 }
 0x3de   :  { %v5899_v28 = vadd.f32 %v5898_v6, %v5294_v48  ;;  %v5296_v39 = vadd.f32 %v5295_v19, %v9533_v17  ;;  %v4581_v6 = vsel %vm4325_vm14, %v4031_v56, %v4453_v20 }
 0x3df   :  { %v5299_v59 = vpop.f32.mrf.mxu1  ;;  %6642 = vmatmul.mubr.msk.f32.gmra.mxu1 %vm1661_vm2, %v4576_v50  ;;  %v4046_v50 = vadd.f32 %v9530_v32, %v7651_v21  ;;  %vm4327_vm0 = vcmp.gt.f32.partialorder %v4041_v47, 0.0 }
 0x3e0   :  { %v6032_v25 = vadd.f32 %v6031_v46, %v5296_v39  ;;  %v5300_v34 = vadd.f32 %v5299_v59, %v9525_v8  ;;  %5591 = vmatprep.mubr.f32.mxu1 %v7754_v63  ;;  %v7654_v46 = vpop.f32.mrf.mxu0  ;;  %v4455_v39 = vmul.f32 0.2, %v4041_v47 }
 0x3e1   :  { %v5301_v60 = vpop.f32.mrf.mxu1  ;;  %vm4328_vm1 = vcmp.gt.f32.partialorder %v4046_v50, 0.0 }
 0x3e2   :  { %v5900_v9 = vadd.f32 %v5899_v28, %v5300_v34  ;;  %v5302_v53 = vadd.f32 %v5301_v60, %v9533_v17  ;;  %v4582_v28 = vsel %vm4326_vm15, %v4036_v55, %v4454_v10 }
 0x3e3   :  { %v5305_v11 = vpop.f32.mrf.mxu1  ;;  %6643 = vmatmul.mubr.msk.f32.gmra.mxu1 %vm1661_vm2, %v4577_v1  ;;  %v4456_v1 = vmul.f32 0.2, %v4046_v50 }
 0x3e4   :  { %v6033_v3 = vadd.f32 %v6032_v25, %v5302_v53  ;;  %v5306_v26 = vadd.f32 %v5305_v11, %v9525_v8  ;;  %5597 = vmatprep.mubr.f32.mxu1 %v7754_v63  ;;  %v4050_v25 = vpop.f32.mrf.mxu0 }
 0x3e5   :  { %v5307_v51 = vpop.f32.mrf.mxu1  ;;  %v4051_v53 = vadd.f32 %v9530_v32, %v4050_v25 }
 0x3e6   :  { %v5901_v45 = vadd.f32 %v5900_v9, %v5306_v26  ;;  %v5308_v42 = vadd.f32 %v5307_v51, %v9533_v17  ;;  %v4583_v9 = vsel %vm4327_vm0, %v4041_v47, %v4455_v39 }
 0x3e7   :  { %v5311_v49 = vpop.f32.mrf.mxu1  ;;  %6644 = vmatmul.mubr.msk.f32.gmra.mxu1 %vm1661_vm2, %v4578_v5  ;;  %v9738_v5 = vld [vmem:[%s10079_s6] ss:$0 sm:$0xff]  ;;  %vm4329_vm3 = vcmp.gt.f32.partialorder %v4051_v53, 0.0  ;;  %s7756_s6 = smov [#allocation2]  }
 0x3e8   :  { %v6034_v18 = vadd.f32 %v6033_v3, %v5308_v42  ;;  %v5312_v29 = vadd.f32 %v5311_v49, %v9525_v8  ;;  %5603 = vmatprep.mubr.f32.mxu1 %v7754_v63  ;;  %v7657_v3 = vpop.f32.mrf.mxu0  ;;  %v4056_v32 = vadd.f32 %v9738_v5, %v7654_v46  ;;  %v4457_v42 = vmul.f32 0.2, %v4051_v53  ;;  %s6166_s26 = sshll.u32 %s7756_s6, 4  ;;  %s6167_s26 = int_to_ptr.vmem [resolvable:$true] %s6166_s26 }
 0x3e9   :  { %v5313_v12 = vpop.f32.mrf.mxu1  ;;  %s7732_s1 = scalar_lea.vmem %s6167_s26, 32  ;;  %p7737_p1 = scmp.lt.s32.totalorder %s6167_s26, %s6167_s26 }
 0x3ea   :  { %v5902_v33 = vadd.f32 %v5901_v45, %v5312_v29  ;;  %v5314_v44 = vadd.f32 %v5313_v12, %v9533_v17  ;;  %v4584_v45 = vsel %vm4328_vm1, %v4046_v50, %v4456_v1  ;;  %vm4330_vm4 = vcmp.gt.f32.partialorder %v4056_v32, 0.0  ;;  %p7733_p0 = scmp.ne.s32.totalorder %s6167_s26, %s7732_s1  ;;  %p7738_p2 = scmp.lt.s32.totalorder %s7732_s1, %s7732_s1 }
 0x3eb   :  { %v5317_v22 = vpop.f32.mrf.mxu1  ;;  %6645 = vmatmul.mubr.msk.f32.gmra.mxu1 %vm1661_vm2, %v4579_v0  ;;  %v4458_v0 = vmul.f32 0.2, %v4056_v32 }
 0x3ec   :  { %v6035_v40 = vadd.f32 %v6034_v18, %v5314_v44  ;;  %v5318_v62 = vadd.f32 %v5317_v22, %v9525_v8  ;;  %5609 = vmatprep.mubr.f32.mxu1 %v7754_v63  ;;  %v4060_v18 = vpop.f32.mrf.mxu0  ;;  %p7739_p3 = por %p7738_p2, %p7737_p1 }
 0x3ed   :  { %v5319_v27 = vpop.f32.mrf.mxu1  ;;  %v4061_v44 = vadd.f32 %v9738_v5, %v4060_v18 }
 0x3ee   :  { %v5903_v38 = vadd.f32 %v5902_v33, %v5318_v62  ;;  %v5320_v52 = vadd.f32 %v5319_v27, %v9533_v17  ;;  %v4585_v33 = vsel %vm4329_vm3, %v4051_v53, %v4457_v42  ;;  %p7740_p4 = pnand %p7739_p3, %p7733_p0 }
 0x3ef   :  { %v5323_v16 = vpop.f32.mrf.mxu1  ;;  %6646 = vmatmul.mubr.msk.f32.gmra.mxu1 %vm1661_vm2, %v4580_v43  ;;  %v4066_v43 = vadd.f32 %v9738_v5, %v7657_v3  ;;  %vm4331_vm5 = vcmp.gt.f32.partialorder %v4061_v44, 0.0 }
 0x3f0   :  { %v6036_v24 = vadd.f32 %v6035_v40, %v5320_v52  ;;  %v5324_v7 = vadd.f32 %v5323_v16, %v9525_v8  ;;  %5615 = vmatprep.mubr.f32.mxu1 %v7754_v63  ;;  %v7660_v40 = vpop.f32.mrf.mxu0  ;;  %v4459_v52 = vmul.f32 0.2, %v4061_v44 }
 0x3f1   :  { %v5325_v36 = vpop.f32.mrf.mxu1  ;;  %vm4332_vm6 = vcmp.gt.f32.partialorder %v4066_v43, 0.0 }
 0x3f2   :  { %v5904_v61 = vadd.f32 %v5903_v38, %v5324_v7  ;;  %v5326_v57 = vadd.f32 %v5325_v36, %v9533_v17  ;;  %v4586_v38 = vsel %vm4330_vm4, %v4056_v32, %v4458_v0 }
 0x3f3   :  { %v5329_v48 = vpop.f32.mrf.mxu1  ;;  %6647 = vmatmul.mubr.msk.f32.gmra.mxu1 %vm1661_vm2, %v4581_v6  ;;  %v4460_v6 = vmul.f32 0.2, %v4066_v43 }
 0x3f4   :  { %v6037_v54 = vadd.f32 %v6036_v24, %v5326_v57  ;;  %v5330_v19 = vadd.f32 %v5329_v48, %v9525_v8  ;;  %5621 = vmatprep.mubr.f32.mxu1 %v7754_v63  ;;  %v4070_v24 = vpop.f32.mrf.mxu0 }
 0x3f5   :  { %v5331_v58 = vpop.f32.mrf.mxu1  ;;  %v4071_v57 = vadd.f32 %v9738_v5, %v4070_v24 }
 0x3f6   :  { %v5905_v37 = vadd.f32 %v5904_v61, %v5330_v19  ;;  %v5332_v59 = vadd.f32 %v5331_v58, %v9533_v17  ;;  %v4587_v61 = vsel %vm4331_vm5, %v4061_v44, %v4459_v52 }
 0x3f7   :  { %v5335_v34 = vpop.f32.mrf.mxu1  ;;  %6648 = vmatmul.mubr.msk.f32.gmra.mxu1 %vm1661_vm2, %v4582_v28  ;;  %v4076_v28 = vadd.f32 %v9738_v5, %v7660_v40  ;;  %vm4333_vm7 = vcmp.gt.f32.partialorder %v4071_v57, 0.0 }
 0x3f8   :  { %v6038_v41 = vadd.f32 %v6037_v54, %v5332_v59  ;;  %v5336_v60 = vadd.f32 %v5335_v34, %v9525_v8  ;;  %5627 = vmatprep.mubr.f32.mxu1 %v7754_v63  ;;  %v7663_v54 = vpop.f32.mrf.mxu0  ;;  %v4461_v59 = vmul.f32 0.2, %v4071_v57 }
 0x3f9   :  { %v5337_v30 = vpop.f32.mrf.mxu1  ;;  %vm4334_vm8 = vcmp.gt.f32.partialorder %v4076_v28, 0.0 }
 0x3fa   :  { %v5906_v4 = vadd.f32 %v5905_v37, %v5336_v60  ;;  %v5338_v11 = vadd.f32 %v5337_v30, %v9533_v17  ;;  %v4588_v37 = vsel %vm4332_vm6, %v4066_v43, %v4460_v6 }
 0x3fb   :  { %v5341_v26 = vpop.f32.mrf.mxu1  ;;  %6649 = vmatmul.mubr.msk.f32.gmra.mxu1 %vm1661_vm2, %v4583_v9  ;;  %v4462_v9 = vmul.f32 0.2, %v4076_v28 }
 0x3fc   :  { %v6039_v13 = vadd.f32 %v6038_v41, %v5338_v11  ;;  %v5342_v51 = vadd.f32 %v5341_v26, %v9525_v8  ;;  %5633 = vmatprep.mubr.f32.mxu1 %v7754_v63  ;;  %v4080_v41 = vpop.f32.mrf.mxu0 }
 0x3fd   :  { %v5343_v35 = vpop.f32.mrf.mxu1  ;;  %v4081_v11 = vadd.f32 %v9738_v5, %v4080_v41 }
 0x3fe   :  { %v5907_v31 = vadd.f32 %v5906_v4, %v5342_v51  ;;  %v5344_v49 = vadd.f32 %v5343_v35, %v9533_v17  ;;  %v4589_v4 = vsel %vm4333_vm7, %v4071_v57, %v4461_v59 }
 0x3ff   :  { %v5347_v29 = vpop.f32.mrf.mxu1  ;;  %6650 = vmatmul.mubr.msk.f32.gmra.mxu1 %vm1661_vm2, %v4584_v45  ;;  %v4086_v45 = vadd.f32 %v9738_v5, %v7663_v54  ;;  %vm4335_vm9 = vcmp.gt.f32.partialorder %v4081_v11, 0.0 }
 0x400   :  { %v6040_v2 = vadd.f32 %v6039_v13, %v5344_v49  ;;  %v5348_v12 = vadd.f32 %v5347_v29, %v9525_v8  ;;  %5639 = vmatprep.mubr.f32.mxu1 %v7754_v63  ;;  %v7666_v13 = vpop.f32.mrf.mxu0  ;;  %v4463_v49 = vmul.f32 0.2, %v4081_v11 }
 0x401   :  { %v5349_v56 = vpop.f32.mrf.mxu1  ;;  %vm4336_vm10 = vcmp.gt.f32.partialorder %v4086_v45, 0.0 }
 0x402   :  { %v5908_v21 = vadd.f32 %v5907_v31, %v5348_v12  ;;  %v5350_v22 = vadd.f32 %v5349_v56, %v9533_v17  ;;  %v4590_v31 = vsel %vm4334_vm8, %v4076_v28, %v4462_v9 }
 0x403   :  { %v5353_v62 = vpop.f32.mrf.mxu1  ;;  %6651 = vmatmul.mubr.msk.f32.gmra.mxu1 %vm1661_vm2, %v4585_v33  ;;  %v4464_v33 = vmul.f32 0.2, %v4086_v45 }
 0x404   :  { %v6041_v55 = vadd.f32 %v6040_v2, %v5350_v22  ;;  %v5354_v27 = vadd.f32 %v5353_v62, %v9525_v8  ;;  %5645 = vmatprep.mubr.f32.mxu1 %v7754_v63  ;;  %v4090_v2 = vpop.f32.mrf.mxu0 }
 0x405   :  { %v5355_v20 = vpop.f32.mrf.mxu1  ;;  %v4091_v22 = vadd.f32 %v9738_v5, %v4090_v2 }
 0x406   :  { %v5909_v14 = vadd.f32 %v5908_v21, %v5354_v27  ;;  %v5356_v16 = vadd.f32 %v5355_v20, %v9533_v17  ;;  %v4591_v21 = vsel %vm4335_vm9, %v4081_v11, %v4463_v49 }
 0x407   :  { %v5359_v7 = vpop.f32.mrf.mxu1  ;;  %6652 = vmatmul.mubr.msk.f32.gmra.mxu1 %vm1661_vm2, %v4586_v38  ;;  %v4096_v38 = vadd.f32 %v9738_v5, %v7666_v13  ;;  %vm4337_vm11 = vcmp.gt.f32.partialorder %v4091_v22, 0.0 }
 0x408   :  { %v6042_v10 = vadd.f32 %v6041_v55, %v5356_v16  ;;  %v5360_v36 = vadd.f32 %v5359_v7, %v9525_v8  ;;  %5651 = vmatprep.mubr.f32.mxu1 %v7754_v63  ;;  %v7669_v55 = vpop.f32.mrf.mxu0  ;;  %v4465_v16 = vmul.f32 0.2, %v4091_v22 }
 0x409   :  { %v5361_v47 = vpop.f32.mrf.mxu1  ;;  %vm4338_vm12 = vcmp.gt.f32.partialorder %v4096_v38, 0.0 }
 0x40a   :  { %v5910_v46 = vadd.f32 %v5909_v14, %v5360_v36  ;;  %v5362_v48 = vadd.f32 %v5361_v47, %v9533_v17  ;;  %v4592_v14 = vsel %vm4336_vm10, %v4086_v45, %v4464_v33 }
 0x40b   :  { %v5365_v19 = vpop.f32.mrf.mxu1  ;;  %6653 = vmatmul.mubr.msk.f32.gmra.mxu1 %vm1661_vm2, %v4587_v61  ;;  %v4466_v61 = vmul.f32 0.2, %v4096_v38 }
 0x40c   :  { %v6043_v50 = vadd.f32 %v6042_v10, %v5362_v48  ;;  %v5366_v58 = vadd.f32 %v5365_v19, %v9525_v8  ;;  %5657 = vmatprep.mubr.f32.mxu1 %v7754_v63  ;;  %v4100_v10 = vpop.f32.mrf.mxu0 }
 0x40d   :  { %v5367_v39 = vpop.f32.mrf.mxu1  ;;  %v4101_v48 = vadd.f32 %v9738_v5, %v4100_v10 }
 0x40e   :  { %v5911_v25 = vadd.f32 %v5910_v46, %v5366_v58  ;;  %v5368_v34 = vadd.f32 %v5367_v39, %v9533_v17  ;;  %v4593_v46 = vsel %vm4337_vm11, %v4091_v22, %v4465_v16 }
 0x40f   :  { %v5371_v60 = vpop.f32.mrf.mxu1  ;;  %6654 = vmatmul.mubr.msk.f32.gmra.mxu1 %vm1661_vm2, %v4588_v37  ;;  %v4106_v37 = vadd.f32 %v9738_v5, %v7669_v55  ;;  %vm4339_vm13 = vcmp.gt.f32.partialorder %v4101_v48, 0.0 }
 0x410   :  { %v6044_v1 = vadd.f32 %v6043_v50, %v5368_v34  ;;  %v5372_v30 = vadd.f32 %v5371_v60, %v9525_v8  ;;  %5663 = vmatprep.mubr.f32.mxu1 %v7754_v63  ;;  %v7672_v50 = vpop.f32.mrf.mxu0  ;;  %v4467_v34 = vmul.f32 0.2, %v4101_v48 }
 0x411   :  { %v5373_v53 = vpop.f32.mrf.mxu1  ;;  %vm4340_vm14 = vcmp.gt.f32.partialorder %v4106_v37, 0.0 }
 0x412   :  { %v5912_v3 = vadd.f32 %v5911_v25, %v5372_v30  ;;  %v5374_v26 = vadd.f32 %v5373_v53, %v9533_v17  ;;  %v4594_v25 = vsel %vm4338_vm12, %v4096_v38, %v4466_v61 }
 0x413   :  { %v5377_v51 = vpop.f32.mrf.mxu1  ;;  %6655 = vmatmul.mubr.msk.f32.gmra.mxu1 %vm1661_vm2, %v4589_v4  ;;  %v4468_v4 = vmul.f32 0.2, %v4106_v37 }
 0x414   :  { %v6045_v32 = vadd.f32 %v6044_v1, %v5374_v26  ;;  %v5378_v35 = vadd.f32 %v5377_v51, %v9525_v8  ;;  %5669 = vmatprep.mubr.f32.mxu1 %v7754_v63  ;;  %v4110_v1 = vpop.f32.mrf.mxu0 }
 0x415   :  { %v5379_v42 = vpop.f32.mrf.mxu1  ;;  %v4111_v26 = vadd.f32 %v9738_v5, %v4110_v1 }
 0x416   :  { %v5913_v18 = vadd.f32 %v5912_v3, %v5378_v35  ;;  %v5380_v29 = vadd.f32 %v5379_v42, %v9533_v17  ;;  %v4595_v3 = vsel %vm4339_vm13, %v4101_v48, %v4467_v34 }
 0x417   :  { %v5383_v12 = vpop.f32.mrf.mxu1  ;;  %6656 = vmatmul.mubr.msk.f32.gmra.mxu1 %vm1661_vm2, %v4590_v31  ;;  %v4116_v31 = vadd.f32 %v9738_v5, %v7672_v50  ;;  %vm4341_vm15 = vcmp.gt.f32.partialorder %v4111_v26, 0.0 }
 0x418   :  { %v6046_v0 = vadd.f32 %v6045_v32, %v5380_v29  ;;  %v5384_v56 = vadd.f32 %v5383_v12, %v9525_v8  ;;  %5675 = vmatprep.mubr.f32.mxu1 %v7754_v63  ;;  %v7675_v32 = vpop.f32.mrf.mxu0  ;;  %v4469_v29 = vmul.f32 0.2, %v4111_v26 }
 0x419   :  { %v5385_v44 = vpop.f32.mrf.mxu1  ;;  %vm4342_vm0 = vcmp.gt.f32.partialorder %v4116_v31, 0.0 }
 0x41a   :  { %v5914_v40 = vadd.f32 %v5913_v18, %v5384_v56  ;;  %v5386_v62 = vadd.f32 %v5385_v44, %v9533_v17  ;;  %v4596_v18 = vsel %vm4340_vm14, %v4106_v37, %v4468_v4 }
 0x41b   :  { %v5389_v27 = vpop.f32.mrf.mxu1  ;;  %6657 = vmatmul.mubr.msk.f32.gmra.mxu1 %vm1661_vm2, %v4591_v21  ;;  %v4470_v21 = vmul.f32 0.2, %v4116_v31 }
 0x41c   :  { %v6047_v43 = vadd.f32 %v6046_v0, %v5386_v62  ;;  %v5390_v20 = vadd.f32 %v5389_v27, %v9525_v8  ;;  %5681 = vmatprep.mubr.f32.mxu1 %v7754_v63  ;;  %v4120_v0 = vpop.f32.mrf.mxu0 }
 0x41d   :  { %v5391_v52 = vpop.f32.mrf.mxu1  ;;  %v4121_v62 = vadd.f32 %v9738_v5, %v4120_v0 }
 0x41e   :  { %v5915_v24 = vadd.f32 %v5914_v40, %v5390_v20  ;;  %v5392_v7 = vadd.f32 %v5391_v52, %v9533_v17  ;;  %v4597_v40 = vsel %vm4341_vm15, %v4111_v26, %v4469_v29 }
 0x41f   :  { %v5395_v36 = vpop.f32.mrf.mxu1  ;;  %6658 = vmatmul.mubr.msk.f32.gmra.mxu1 %vm1661_vm2, %v4592_v14  ;;  %v4126_v14 = vadd.f32 %v9738_v5, %v7675_v32  ;;  %vm4343_vm1 = vcmp.gt.f32.partialorder %v4121_v62, 0.0 }
 0x420   :  { %v6048_v6 = vadd.f32 %v6047_v43, %v5392_v7  ;;  %v5396_v47 = vadd.f32 %v5395_v36, %v9525_v8  ;;  %5687 = vmatprep.mubr.f32.mxu1 %v7754_v63  ;;  %v7678_v43 = vpop.f32.mrf.mxu0  ;;  %v4471_v7 = vmul.f32 0.2, %v4121_v62 }
 0x421   :  { %v5397_v57 = vpop.f32.mrf.mxu1  ;;  %vm4344_vm3 = vcmp.gt.f32.partialorder %v4126_v14, 0.0 }
 0x422   :  { %v5916_v54 = vadd.f32 %v5915_v24, %v5396_v47  ;;  %v5398_v19 = vadd.f32 %v5397_v57, %v9533_v17  ;;  %v4598_v24 = vsel %vm4342_vm0, %v4116_v31, %v4470_v21 }
 0x423   :  { %v5401_v58 = vpop.f32.mrf.mxu1  ;;  %6659 = vmatmul.mubr.msk.f32.gmra.mxu1 %vm1661_vm2, %v4593_v46  ;;  %v4472_v46 = vmul.f32 0.2, %v4126_v14 }
 0x424   :  { %v6049_v28 = vadd.f32 %v6048_v6, %v5398_v19  ;;  %v5402_v39 = vadd.f32 %v5401_v58, %v9525_v8  ;;  %5693 = vmatprep.mubr.f32.mxu1 %v7754_v63  ;;  %v4130_v6 = vpop.f32.mrf.mxu0 }
 0x425   :  { %v5403_v59 = vpop.f32.mrf.mxu1  ;;  %v4131_v19 = vadd.f32 %v9738_v5, %v4130_v6 }
 0x426   :  { %v5917_v41 = vadd.f32 %v5916_v54, %v5402_v39  ;;  %v5404_v60 = vadd.f32 %v5403_v59, %v9533_v17  ;;  %v4599_v54 = vsel %vm4343_vm1, %v4121_v62, %v4471_v7 }
 0x427   :  { %v5407_v30 = vpop.f32.mrf.mxu1  ;;  %6660 = vmatmul.mubr.msk.f32.gmra.mxu1 %vm1661_vm2, %v4594_v25  ;;  %v4136_v25 = vadd.f32 %v9738_v5, %v7678_v43  ;;  %vm4345_vm4 = vcmp.gt.f32.partialorder %v4131_v19, 0.0 }
 0x428   :  { %v6050_v9 = vadd.f32 %v6049_v28, %v5404_v60  ;;  %v5408_v53 = vadd.f32 %v5407_v30, %v9525_v8  ;;  %5699 = vmatprep.mubr.f32.mxu1 %v7754_v63  ;;  %v7681_v28 = vpop.f32.mrf.mxu0  ;;  %v4473_v60 = vmul.f32 0.2, %v4131_v19 }
 0x429   :  { %v5409_v11 = vpop.f32.mrf.mxu1  ;;  %vm4346_vm5 = vcmp.gt.f32.partialorder %v4136_v25, 0.0 }
 0x42a   :  { %v5918_v13 = vadd.f32 %v5917_v41, %v5408_v53  ;;  %v5410_v51 = vadd.f32 %v5409_v11, %v9533_v17  ;;  %v4600_v41 = vsel %vm4344_vm3, %v4126_v14, %v4472_v46 }
 0x42b   :  { %v5413_v35 = vpop.f32.mrf.mxu1  ;;  %6661 = vmatmul.mubr.msk.f32.gmra.mxu1 %vm1661_vm2, %v4595_v3  ;;  %v4474_v3 = vmul.f32 0.2, %v4136_v25 }
 0x42c   :  { %v6051_v45 = vadd.f32 %v6050_v9, %v5410_v51  ;;  %v5414_v42 = vadd.f32 %v5413_v35, %v9525_v8  ;;  %5705 = vmatprep.mubr.f32.mxu1 %v7754_v63  ;;  %v4140_v9 = vpop.f32.mrf.mxu0 }
 0x42d   :  { %v5415_v49 = vpop.f32.mrf.mxu1  ;;  %v4141_v51 = vadd.f32 %v9738_v5, %v4140_v9 }
 0x42e   :  { %v5919_v2 = vadd.f32 %v5918_v13, %v5414_v42  ;;  %v5416_v12 = vadd.f32 %v5415_v49, %v9533_v17  ;;  %v4601_v13 = vsel %vm4345_vm4, %v4131_v19, %v4473_v60 }
 0x42f   :  { %v5419_v56 = vpop.f32.mrf.mxu1  ;;  %6662 = vmatmul.mubr.msk.f32.gmra.mxu1 %vm1661_vm2, %v4596_v18  ;;  %v4146_v18 = vadd.f32 %v9738_v5, %v7681_v28  ;;  %vm4347_vm6 = vcmp.gt.f32.partialorder %v4141_v51, 0.0 }
 0x430   :  { %v6052_v33 = vadd.f32 %v6051_v45, %v5416_v12  ;;  %v5420_v44 = vadd.f32 %v5419_v56, %v9525_v8  ;;  %5711 = vmatprep.mubr.f32.mxu1 %v7754_v63  ;;  %v7684_v45 = vpop.f32.mrf.mxu0  ;;  %v4475_v12 = vmul.f32 0.2, %v4141_v51 }
 0x431   :  { %v5421_v22 = vpop.f32.mrf.mxu1  ;;  %vm4348_vm7 = vcmp.gt.f32.partialorder %v4146_v18, 0.0 }
 0x432   :  { %v5920_v55 = vadd.f32 %v5919_v2, %v5420_v44  ;;  %v5422_v27 = vadd.f32 %v5421_v22, %v9533_v17  ;;  %v4602_v2 = vsel %vm4346_vm5, %v4136_v25, %v4474_v3 }
 0x433   :  { %v5425_v20 = vpop.f32.mrf.mxu1  ;;  %6663 = vmatmul.mubr.msk.f32.gmra.mxu1 %vm1661_vm2, %v4597_v40  ;;  %v4476_v40 = vmul.f32 0.2, %v4146_v18 }
 0x434   :  { %v6053_v38 = vadd.f32 %v6052_v33, %v5422_v27  ;;  %v5426_v52 = vadd.f32 %v5425_v20, %v9525_v8  ;;  %5717 = vmatprep.mubr.f32.mxu1 %v7754_v63  ;;  %v4150_v33 = vpop.f32.mrf.mxu0 }
 0x435   :  { %v5427_v16 = vpop.f32.mrf.mxu1  ;;  %v4151_v27 = vadd.f32 %v9738_v5, %v4150_v33 }
 0x436   :  { %v5921_v10 = vadd.f32 %v5920_v55, %v5426_v52  ;;  %v5428_v36 = vadd.f32 %v5427_v16, %v9533_v17  ;;  %v4603_v55 = vsel %vm4347_vm6, %v4141_v51, %v4475_v12 }
 0x437   :  { %v5431_v47 = vpop.f32.mrf.mxu1  ;;  %6664 = vmatmul.mubr.msk.f32.gmra.mxu1 %vm1661_vm2, %v4598_v24  ;;  %v4156_v24 = vadd.f32 %v9738_v5, %v7684_v45  ;;  %vm4349_vm8 = vcmp.gt.f32.partialorder %v4151_v27, 0.0 }
 0x438   :  { %v6054_v61 = vadd.f32 %v6053_v38, %v5428_v36  ;;  %v5432_v57 = vadd.f32 %v5431_v47, %v9525_v8  ;;  %5723 = vmatprep.mubr.f32.mxu1 %v7754_v63  ;;  %v7687_v38 = vpop.f32.mrf.mxu0  ;;  %v4477_v36 = vmul.f32 0.2, %v4151_v27 }
 0x439   :  { %v5433_v48 = vpop.f32.mrf.mxu1  ;;  %vm4350_vm9 = vcmp.gt.f32.partialorder %v4156_v24, 0.0 }
 0x43a   :  { %v5922_v50 = vadd.f32 %v5921_v10, %v5432_v57  ;;  %v5434_v58 = vadd.f32 %v5433_v48, %v9533_v17  ;;  %v4604_v10 = vsel %vm4348_vm7, %v4146_v18, %v4476_v40 }
 0x43b   :  { %v5437_v39 = vpop.f32.mrf.mxu1  ;;  %6665 = vmatmul.mubr.msk.f32.gmra.mxu1 %vm1661_vm2, %v4599_v54  ;;  %v4478_v54 = vmul.f32 0.2, %v4156_v24 }
 0x43c   :  { %v6055_v37 = vadd.f32 %v6054_v61, %v5434_v58  ;;  %v5438_v59 = vadd.f32 %v5437_v39, %v9525_v8  ;;  %5729 = vmatprep.mubr.f32.mxu1 %v7754_v63  ;;  %v4160_v61 = vpop.f32.mrf.mxu0 }
 0x43d   :  { %v5439_v34 = vpop.f32.mrf.mxu1  ;;  %v4161_v58 = vadd.f32 %v9738_v5, %v4160_v61 }
 0x43e   :  { %v5923_v1 = vadd.f32 %v5922_v50, %v5438_v59  ;;  %v5440_v30 = vadd.f32 %v5439_v34, %v9533_v17  ;;  %v4605_v50 = vsel %vm4349_vm8, %v4151_v27, %v4477_v36 }
 0x43f   :  { %v5443_v53 = vpop.f32.mrf.mxu1  ;;  %6666 = vmatmul.mubr.msk.f32.gmra.mxu1 %vm1661_vm2, %v4600_v41  ;;  %v4166_v41 = vadd.f32 %v9738_v5, %v7687_v38  ;;  %vm4351_vm10 = vcmp.gt.f32.partialorder %v4161_v58, 0.0 }
 0x440   :  { %v6056_v4 = vadd.f32 %v6055_v37, %v5440_v30  ;;  %v5444_v11 = vadd.f32 %v5443_v53, %v9525_v8  ;;  %5735 = vmatprep.mubr.f32.mxu1 %v7754_v63  ;;  %v7690_v37 = vpop.f32.mrf.mxu0  ;;  %v4479_v30 = vmul.f32 0.2, %v4161_v58 }
 0x441   :  { %v5445_v26 = vpop.f32.mrf.mxu1  ;;  %vm4352_vm11 = vcmp.gt.f32.partialorder %v4166_v41, 0.0 }
 0x442   :  { %v5924_v32 = vadd.f32 %v5923_v1, %v5444_v11  ;;  %v5446_v35 = vadd.f32 %v5445_v26, %v9533_v17  ;;  %v4606_v1 = vsel %vm4350_vm9, %v4156_v24, %v4478_v54 }
 0x443   :  { %v5449_v42 = vpop.f32.mrf.mxu1  ;;  %6667 = vmatmul.mubr.msk.f32.gmra.mxu1 %vm1661_vm2, %v4601_v13  ;;  %v4480_v13 = vmul.f32 0.2, %v4166_v41 }
 0x444   :  { %v6057_v31 = vadd.f32 %v6056_v4, %v5446_v35  ;;  %v5450_v49 = vadd.f32 %v5449_v42, %v9525_v8  ;;  %5741 = vmatprep.mubr.f32.mxu1 %v7754_v63  ;;  %v4170_v4 = vpop.f32.mrf.mxu0 }
 0x445   :  { %v5451_v29 = vpop.f32.mrf.mxu1  ;;  %v4171_v35 = vadd.f32 %v9738_v5, %v4170_v4 }
 0x446   :  { %v5925_v0 = vadd.f32 %v5924_v32, %v5450_v49  ;;  %v5452_v56 = vadd.f32 %v5451_v29, %v9533_v17  ;;  %v4607_v32 = vsel %vm4351_vm10, %v4161_v58, %v4479_v30 }
 0x447   :  { %v5455_v44 = vpop.f32.mrf.mxu1  ;;  %6668 = vmatmul.mubr.msk.f32.gmra.mxu1 %vm1661_vm2, %v4602_v2  ;;  %v4176_v2 = vadd.f32 %v9738_v5, %v7690_v37  ;;  %vm4353_vm12 = vcmp.gt.f32.partialorder %v4171_v35, 0.0 }
 0x448   :  { %v6058_v21 = vadd.f32 %v6057_v31, %v5452_v56  ;;  %v5456_v22 = vadd.f32 %v5455_v44, %v9525_v8  ;;  %5747 = vmatprep.mubr.f32.mxu1 %v7754_v63  ;;  %v7693_v31 = vpop.f32.mrf.mxu0  ;;  %v4481_v56 = vmul.f32 0.2, %v4171_v35 }
 0x449   :  { %v5457_v62 = vpop.f32.mrf.mxu1  ;;  %vm4354_vm13 = vcmp.gt.f32.partialorder %v4176_v2, 0.0 }
 0x44a   :  { %v5926_v43 = vadd.f32 %v5925_v0, %v5456_v22  ;;  %v5458_v20 = vadd.f32 %v5457_v62, %v9533_v17  ;;  %v4608_v0 = vsel %vm4352_vm11, %v4166_v41, %v4480_v13 }
 0x44b   :  { %v5461_v52 = vpop.f32.mrf.mxu1  ;;  %6669 = vmatmul.mubr.msk.f32.gmra.mxu1 %vm1661_vm2, %v4603_v55  ;;  %v4482_v55 = vmul.f32 0.2, %v4176_v2 }
 0x44c   :  { %v6059_v14 = vadd.f32 %v6058_v21, %v5458_v20  ;;  %v5462_v16 = vadd.f32 %v5461_v52, %v9525_v8  ;;  %5753 = vmatprep.mubr.f32.mxu1 %v7754_v63  ;;  %v4180_v21 = vpop.f32.mrf.mxu0 }
 0x44d   :  { %v5463_v7 = vpop.f32.mrf.mxu1  ;;  %v4181_v20 = vadd.f32 %v9738_v5, %v4180_v21 }
 0x44e   :  { %v5927_v6 = vadd.f32 %v5926_v43, %v5462_v16  ;;  %v5464_v47 = vadd.f32 %v5463_v7, %v9533_v17  ;;  %v4609_v43 = vsel %vm4353_vm12, %v4171_v35, %v4481_v56 }
 0x44f   :  { %v5467_v57 = vpop.f32.mrf.mxu1  ;;  %6670 = vmatmul.mubr.msk.f32.gmra.mxu1 %vm1661_vm2, %v4604_v10  ;;  %v4186_v10 = vadd.f32 %v9738_v5, %v7693_v31  ;;  %vm4355_vm14 = vcmp.gt.f32.partialorder %v4181_v20, 0.0 }
 0x450   :  { %v6060_v46 = vadd.f32 %v6059_v14, %v5464_v47  ;;  %v5468_v48 = vadd.f32 %v5467_v57, %v9525_v8  ;;  %5759 = vmatprep.mubr.f32.mxu1 %v7754_v63  ;;  %v7696_v14 = vpop.f32.mrf.mxu0  ;;  %v4483_v47 = vmul.f32 0.2, %v4181_v20 }
 0x451   :  { %v5469_v19 = vpop.f32.mrf.mxu1  ;;  %vm4356_vm15 = vcmp.gt.f32.partialorder %v4186_v10, 0.0 }
 0x452   :  { %v5928_v28 = vadd.f32 %v5927_v6, %v5468_v48  ;;  %v5470_v39 = vadd.f32 %v5469_v19, %v9533_v17  ;;  %v4610_v6 = vsel %vm4354_vm13, %v4176_v2, %v4482_v55 }
 0x453   :  { %v5473_v59 = vpop.f32.mrf.mxu1  ;;  %6671 = vmatmul.mubr.msk.f32.gmra.mxu1 %vm1661_vm2, %v4605_v50  ;;  %v4484_v50 = vmul.f32 0.2, %v4186_v10 }
 0x454   :  { %v6061_v25 = vadd.f32 %v6060_v46, %v5470_v39  ;;  %v5474_v34 = vadd.f32 %v5473_v59, %v9525_v8  ;;  %5765 = vmatprep.mubr.f32.mxu1 %v7754_v63  ;;  %v4190_v46 = vpop.f32.mrf.mxu0 }
 0x455   :  { %v5475_v60 = vpop.f32.mrf.mxu1  ;;  %v4191_v39 = vadd.f32 %v9738_v5, %v4190_v46 }
 0x456   :  { %v5929_v9 = vadd.f32 %v5928_v28, %v5474_v34  ;;  %v5476_v53 = vadd.f32 %v5475_v60, %v9533_v17  ;;  %v4611_v28 = vsel %vm4355_vm14, %v4181_v20, %v4483_v47 }
 0x457   :  { %v5479_v11 = vpop.f32.mrf.mxu1  ;;  %6672 = vmatmul.mubr.msk.f32.gmra.mxu1 %vm1661_vm2, %v4606_v1  ;;  %v4196_v1 = vadd.f32 %v9738_v5, %v7696_v14  ;;  %vm4357_vm0 = vcmp.gt.f32.partialorder %v4191_v39, 0.0 }
 0x458   :  { %v6062_v3 = vadd.f32 %v6061_v25, %v5476_v53  ;;  %v5480_v26 = vadd.f32 %v5479_v11, %v9525_v8  ;;  %5771 = vmatprep.mubr.f32.mxu1 %v7754_v63  ;;  %v7699_v25 = vpop.f32.mrf.mxu0  ;;  %v4485_v53 = vmul.f32 0.2, %v4191_v39 }
 0x459   :  { %v5481_v51 = vpop.f32.mrf.mxu1  ;;  %vm4358_vm1 = vcmp.gt.f32.partialorder %v4196_v1, 0.0 }
 0x45a   :  { %v5930_v45 = vadd.f32 %v5929_v9, %v5480_v26  ;;  %v5482_v42 = vadd.f32 %v5481_v51, %v9533_v17  ;;  %v4612_v9 = vsel %vm4356_vm15, %v4186_v10, %v4484_v50 }
 0x45b   :  { %v5485_v49 = vpop.f32.mrf.mxu1  ;;  %6673 = vmatmul.mubr.msk.f32.gmra.mxu1 %vm1661_vm2, %v4607_v32  ;;  %v4486_v32 = vmul.f32 0.2, %v4196_v1 }
 0x45c   :  { %v6063_v18 = vadd.f32 %v6062_v3, %v5482_v42  ;;  %v5486_v29 = vadd.f32 %v5485_v49, %v9525_v8  ;;  %5777 = vmatprep.mubr.f32.mxu1 %v7754_v63  ;;  %v4200_v3 = vpop.f32.mrf.mxu0 }
 0x45d   :  { %v5487_v12 = vpop.f32.mrf.mxu1  ;;  %v4201_v42 = vadd.f32 %v9738_v5, %v4200_v3 }
 0x45e   :  { %v5931_v33 = vadd.f32 %v5930_v45, %v5486_v29  ;;  %v5488_v44 = vadd.f32 %v5487_v12, %v9533_v17  ;;  %v4613_v45 = vsel %vm4357_vm0, %v4191_v39, %v4485_v53 }
 0x45f   :  { %v5491_v22 = vpop.f32.mrf.mxu1  ;;  %6674 = vmatmul.mubr.msk.f32.gmra.mxu1 %vm1661_vm2, %v4608_v0  ;;  %v4206_v0 = vadd.f32 %v9738_v5, %v7699_v25  ;;  %vm4359_vm3 = vcmp.gt.f32.partialorder %v4201_v42, 0.0 }
 0x460   :  { %v6064_v40 = vadd.f32 %v6063_v18, %v5488_v44  ;;  %v5492_v62 = vadd.f32 %v5491_v22, %v9525_v8  ;;  %5783 = vmatprep.mubr.f32.mxu1 %v7754_v63  ;;  %v7702_v18 = vpop.f32.mrf.mxu0  ;;  %v4487_v44 = vmul.f32 0.2, %v4201_v42 }
 0x461   :  { %v5493_v27 = vpop.f32.mrf.mxu1  ;;  %vm4360_vm4 = vcmp.gt.f32.partialorder %v4206_v0, 0.0 }
 0x462   :  { %v5932_v38 = vadd.f32 %v5931_v33, %v5492_v62  ;;  %v5494_v52 = vadd.f32 %v5493_v27, %v9533_v17  ;;  %v4614_v33 = vsel %vm4358_vm1, %v4196_v1, %v4486_v32 }
 0x463   :  { %v5497_v16 = vpop.f32.mrf.mxu1  ;;  %6675 = vmatmul.mubr.msk.f32.gmra.mxu1 %vm1661_vm2, %v4609_v43  ;;  %v4488_v43 = vmul.f32 0.2, %v4206_v0 }
 0x464   :  { %v6065_v24 = vadd.f32 %v6064_v40, %v5494_v52  ;;  %v5498_v7 = vadd.f32 %v5497_v16, %v9525_v8  ;;  %5789 = vmatprep.mubr.f32.mxu1 %v7754_v63  ;;  %v4210_v40 = vpop.f32.mrf.mxu0 }
 0x465   :  { %v5499_v36 = vpop.f32.mrf.mxu1  ;;  %v4211_v52 = vadd.f32 %v9738_v5, %v4210_v40 }
 0x466   :  { %v5933_v61 = vadd.f32 %v5932_v38, %v5498_v7  ;;  %v5500_v57 = vadd.f32 %v5499_v36, %v9533_v17  ;;  %v4615_v38 = vsel %vm4359_vm3, %v4201_v42, %v4487_v44 }
 0x467   :  { %v5503_v48 = vpop.f32.mrf.mxu1  ;;  %6676 = vmatmul.mubr.msk.f32.gmra.mxu1 %vm1661_vm2, %v4610_v6  ;;  %v4216_v6 = vadd.f32 %v9738_v5, %v7702_v18  ;;  %vm4361_vm5 = vcmp.gt.f32.partialorder %v4211_v52, 0.0 }
 0x468   :  { %v6066_v54 = vadd.f32 %v6065_v24, %v5500_v57  ;;  %v5504_v19 = vadd.f32 %v5503_v48, %v9525_v8  ;;  %5795 = vmatprep.mubr.f32.mxu1 %v7754_v63  ;;  %v7705_v24 = vpop.f32.mrf.mxu0  ;;  %v4489_v57 = vmul.f32 0.2, %v4211_v52 }
 0x469   :  { %v5505_v58 = vpop.f32.mrf.mxu1  ;;  %vm4362_vm6 = vcmp.gt.f32.partialorder %v4216_v6, 0.0 }
 0x46a   :  { %v5934_v37 = vadd.f32 %v5933_v61, %v5504_v19  ;;  %v5506_v59 = vadd.f32 %v5505_v58, %v9533_v17  ;;  %v4616_v61 = vsel %vm4360_vm4, %v4206_v0, %v4488_v43 }
 0x46b   :  { %v5509_v34 = vpop.f32.mrf.mxu1  ;;  %6677 = vmatmul.mubr.msk.f32.gmra.mxu1 %vm1661_vm2, %v4611_v28  ;;  %v4490_v28 = vmul.f32 0.2, %v4216_v6 }
 0x46c   :  { %v6067_v41 = vadd.f32 %v6066_v54, %v5506_v59  ;;  %v5510_v60 = vadd.f32 %v5509_v34, %v9525_v8  ;;  %5801 = vmatprep.mubr.f32.mxu1 %v7754_v63  ;;  %v4220_v54 = vpop.f32.mrf.mxu0 }
 0x46d   :  { %v5511_v30 = vpop.f32.mrf.mxu1  ;;  %v4221_v59 = vadd.f32 %v9738_v5, %v4220_v54 }
 0x46e   :  { %v5935_v4 = vadd.f32 %v5934_v37, %v5510_v60  ;;  %v5512_v11 = vadd.f32 %v5511_v30, %v9533_v17  ;;  %v4617_v37 = vsel %vm4361_vm5, %v4211_v52, %v4489_v57 }
 0x46f   :  { %v5515_v26 = vpop.f32.mrf.mxu1  ;;  %6678 = vmatmul.mubr.msk.f32.gmra.mxu1 %vm1661_vm2, %v4612_v9  ;;  %v4226_v9 = vadd.f32 %v9738_v5, %v7705_v24  ;;  %vm4363_vm7 = vcmp.gt.f32.partialorder %v4221_v59, 0.0 }
 0x470   :  { %v6068_v13 = vadd.f32 %v6067_v41, %v5512_v11  ;;  %v5516_v51 = vadd.f32 %v5515_v26, %v9525_v8  ;;  %5807 = vmatprep.mubr.f32.mxu1 %v7754_v63  ;;  %v7708_v41 = vpop.f32.mrf.mxu0  ;;  %v4491_v11 = vmul.f32 0.2, %v4221_v59 }
 0x471   :  { %v5517_v35 = vpop.f32.mrf.mxu1  ;;  %vm4364_vm8 = vcmp.gt.f32.partialorder %v4226_v9, 0.0  ;;  %v4236_v44 = vadd.f32 %v9738_v5, %v7708_v41 }
 0x472   :  { %v5936_v31 = vadd.f32 %v5935_v4, %v5516_v51  ;;  %v5518_v49 = vadd.f32 %v5517_v35, %v9533_v17  ;;  %v4618_v4 = vsel %vm4362_vm6, %v4216_v6, %v4490_v28 }
 0x473   :  { %v5521_v29 = vpop.f32.mrf.mxu1  ;;  %6679 = vmatmul.mubr.msk.f32.gmra.mxu1 %vm1661_vm2, %v4613_v45  ;;  %v4492_v45 = vmul.f32 0.2, %v4226_v9  ;;  %vm4366_vm10 = vcmp.gt.f32.partialorder %v4236_v44, 0.0 }
 0x474   :  { %v6069_v2 = vadd.f32 %v6068_v13, %v5518_v49  ;;  %v5522_v12 = vadd.f32 %v5521_v29, %v9525_v8  ;;  %5813 = vmatprep.mubr.f32.mxu1 %v7754_v63  ;;  %v4230_v13 = vpop.f32.mrf.mxu0 }
 0x475   :  { %v5523_v56 = vpop.f32.mrf.mxu1  ;;  %v4231_v49 = vadd.f32 %v9738_v5, %v4230_v13 }
 0x476   :  { %v5937_v21 = vadd.f32 %v5936_v31, %v5522_v12  ;;  %v5524_v22 = vadd.f32 %v5523_v56, %v9533_v17  ;;  %v4619_v31 = vsel %vm4363_vm7, %v4221_v59, %v4491_v11  ;;  %v4620_v56 = vsel %vm4364_vm8, %v4226_v9, %v4492_v45 }
 0x477   :  { %v5527_v62 = vpop.f32.mrf.mxu1  ;;  %6680 = vmatmul.mubr.msk.f32.gmra.mxu1 %vm1661_vm2, %v4614_v33  ;;  %vm4365_vm9 = vcmp.gt.f32.partialorder %v4231_v49, 0.0 }
 0x478   :  { %v6070_v55 = vadd.f32 %v6069_v2, %v5524_v22  ;;  %v5528_v27 = vadd.f32 %v5527_v62, %v9525_v8  ;;  %5819 = vmatprep.mubr.f32.mxu1 %v7754_v63 }
 0x479   :  { %v5529_v20 = vpop.f32.mrf.mxu1 }
 0x47a   :  { %v5938_v14 = vadd.f32 %v5937_v21, %v5528_v27  ;;  %v5530_v16 = vadd.f32 %v5529_v20, %v9533_v17  ;;  %v4493_v21 = vmul.f32 0.2, %v4231_v49  ;;  %v4494_v20 = vmul.f32 0.2, %v4236_v44 }
 0x47b   :  { %v5533_v7 = vpop.f32.mrf.mxu1  ;;  %6681 = vmatmul.mubr.msk.f32.gmra.mxu1 %vm1661_vm2, %v4615_v38 }
 0x47c   :  { %v6071_v10 = vadd.f32 %v6070_v55, %v5530_v16  ;;  %v5534_v36 = vadd.f32 %v5533_v7, %v9525_v8  ;;  %5825 = vmatprep.mubr.f32.mxu1 %v7754_v63  ;;  %v4621_v38 = vsel %vm4365_vm9, %v4231_v49, %v4493_v21 }
 0x47d   :  { %v5535_v47 = vpop.f32.mrf.mxu1 }
 0x47e   :  { %v5939_v46 = vadd.f32 %v5938_v14, %v5534_v36  ;;  %v5536_v48 = vadd.f32 %v5535_v47, %v9533_v17 }
 0x47f   :  { %v5539_v19 = vpop.f32.mrf.mxu1  ;;  %6682 = vmatmul.mubr.msk.f32.gmra.mxu1 %vm1661_vm2, %v4616_v61 }
 0x480   :  { %v6072_v50 = vadd.f32 %v6071_v10, %v5536_v48  ;;  %v5540_v58 = vadd.f32 %v5539_v19, %v9525_v8  ;;  %5831 = vmatprep.mubr.f32.mxu1 %v7754_v63  ;;  %v4622_v10 = vsel %vm4366_vm10, %v4236_v44, %v4494_v20 }
 0x481   :  { %v5541_v39 = vpop.f32.mrf.mxu1 }
 0x482   :  { %v5940_v25 = vadd.f32 %v5939_v46, %v5540_v58  ;;  %v5542_v34 = vadd.f32 %v5541_v39, %v9533_v17 }
 0x483   :  { %v5545_v60 = vpop.f32.mrf.mxu1  ;;  %6683 = vmatmul.mubr.msk.f32.gmra.mxu1 %vm1661_vm2, %v4617_v37 }
 0x484   :  { %v6073_v1 = vadd.f32 %v6072_v50, %v5542_v34  ;;  %v5546_v30 = vadd.f32 %v5545_v60, %v9525_v8  ;;  %5837 = vmatprep.mubr.f32.mxu1 %v7754_v63 }
 0x485   :  { %v5547_v53 = vpop.f32.mrf.mxu1 }
 0x486   :  { %v5941_v3 = vadd.f32 %v5940_v25, %v5546_v30  ;;  %v5548_v26 = vadd.f32 %v5547_v53, %v9533_v17 }
 0x487   :  { %v5551_v51 = vpop.f32.mrf.mxu1  ;;  %6684 = vmatmul.mubr.msk.f32.gmra.mxu1 %vm1661_vm2, %v4618_v4 }
 0x488   :  { %v6074_v32 = vadd.f32 %v6073_v1, %v5548_v26  ;;  %v5552_v35 = vadd.f32 %v5551_v51, %v9525_v8  ;;  %5843 = vmatprep.mubr.f32.mxu1 %v7754_v63 }
 0x489   :  { %v5553_v42 = vpop.f32.mrf.mxu1 }
 0x48a   :  { %v5942_v18 = vadd.f32 %v5941_v3, %v5552_v35  ;;  %v5554_v29 = vadd.f32 %v5553_v42, %v9533_v17 }
 0x48b   :  { %v5557_v2 = vpop.f32.mrf.mxu1  ;;  %6685 = vmatmul.mubr.msk.f32.gmra.mxu1 %vm1661_vm2, %v4619_v31 }
 0x48c   :  { %v6075_v12 = vadd.f32 %v6074_v32, %v5554_v29  ;;  %v5558_v0 = vadd.f32 %v5557_v2, %v9525_v8  ;;  %5849 = vmatprep.mubr.f32.mxu1 %v7754_v63 }
 0x48d   :  { %v5559_v33 = vpop.f32.mrf.mxu1 }
 0x48e   :  { %v5943_v22 = vadd.f32 %v5942_v18, %v5558_v0  ;;  %v5560_v40 = vadd.f32 %v5559_v33, %v9533_v17 }
 0x48f   :  { %v5563_v62 = vpop.f32.mrf.mxu1  ;;  %6686 = vmatmul.mubr.msk.f32.gmra.mxu1 %vm1661_vm2, %v4620_v56 }
 0x490   :  { %v6076_v55 = vadd.f32 %v6075_v12, %v5560_v40  ;;  %v5564_v27 = vadd.f32 %v5563_v62, %v9525_v8  ;;  %5855 = vmatprep.mubr.f32.mxu1 %v7754_v63 }
 0x491   :  { %v5565_v43 = vpop.f32.mrf.mxu1 }
 0x492   :  { %v5944_v52 = vadd.f32 %v5943_v22, %v5564_v27  ;;  %v5566_v14 = vadd.f32 %v5565_v43, %v9533_v17 }
 0x493   :  { %v5569_v5 = vpop.f32.mrf.mxu1  ;;  %6687 = vmatmul.mubr.msk.f32.gmra.mxu1 %vm1661_vm2, %v4621_v38 }
 0x494   :  { %v6077_v16 = vadd.f32 %v6076_v55, %v5566_v14  ;;  %v5570_v24 = vadd.f32 %v5569_v5, %v9525_v8  ;;  %5861 = vmatprep.mubr.f32.mxu1 %v7754_v63 }
 0x495   :  { %v5571_v7 = vpop.f32.mrf.mxu1 }
 0x496   :  { %v5945_v36 = vadd.f32 %v5944_v52, %v5570_v24  ;;  %v5572_v6 = vadd.f32 %v5571_v7, %v9533_v17 }
 0x497   :  { %v5575_v47 = vpop.f32.mrf.mxu1  ;;  %6688 = vmatmul.mubr.msk.f32.gmra.mxu1 %vm1661_vm2, %v4622_v10  ;;  %vm6157_vm2 = vcmp.lt.s32.totalorder %v4641_v23, 256 }
 0x498   :  { %v6078_v61 = vadd.f32 %v6077_v16, %v5572_v6  ;;  %v5576_v57 = vadd.f32 %v5575_v47, %v9525_v8 }
 0x499   :  { %v5577_v46 = vpop.f32.mrf.mxu1 }
 0x49a   :  { %v5946_v48 = vadd.f32 %v5945_v36, %v5576_v57  ;;  %v5578_v54 = vadd.f32 %v5577_v46, %v9533_v17 }
 0x49b   :  { %v5581_v19 = vpop.f32.mrf.mxu1 }
 0x49c   :  { %v6079_v50 = vadd.f32 %v6078_v61, %v5578_v54  ;;  %v5582_v58 = vadd.f32 %v5581_v19, %v9525_v8 }
 0x49d   :  { %v5583_v63 = vpop.f32.mrf.mxu1 }
 0x49e   :  { %v5947_v28 = vadd.f32 %v5946_v48, %v5582_v58  ;;  %v5584_v39 = vadd.f32 %v5583_v63, %v9533_v17 }
 0x49f   :  { %v5587_v37 = vpop.f32.mrf.mxu1 }
 0x4a0   :  { %v6080_v59 = vadd.f32 %v6079_v50, %v5584_v39  ;;  %v5588_v25 = vadd.f32 %v5587_v37, %v9525_v8 }
 0x4a1   :  { %v5589_v34 = vpop.f32.mrf.mxu1 }
 0x4a2   :  { %v5948_v41 = vadd.f32 %v5947_v28, %v5588_v25  ;;  %v5590_v60 = vadd.f32 %v5589_v34, %v9533_v17 }
 0x4a3   :  { %v5593_v1 = vpop.f32.mrf.mxu1 }
 0x4a4   :  { %v6081_v30 = vadd.f32 %v6080_v59, %v5590_v60  ;;  %v5594_v9 = vadd.f32 %v5593_v1, %v9525_v8 }
 0x4a5   :  { %v5595_v53 = vpop.f32.mrf.mxu1 }
 0x4a6   :  { %v5949_v4 = vadd.f32 %v5948_v41, %v5594_v9  ;;  %v5596_v11 = vadd.f32 %v5595_v53, %v9533_v17 }
 0x4a7   :  { %v5599_v3 = vpop.f32.mrf.mxu1 }
 0x4a8   :  { %v6082_v26 = vadd.f32 %v6081_v30, %v5596_v11  ;;  %v5600_v13 = vadd.f32 %v5599_v3, %v9525_v8 }
 0x4a9   :  { %v5601_v51 = vpop.f32.mrf.mxu1 }
 0x4aa   :  { %v5950_v32 = vadd.f32 %v5949_v4, %v5600_v13  ;;  %v5602_v35 = vadd.f32 %v5601_v51, %v9533_v17 }
 0x4ab   :  { %v5605_v45 = vpop.f32.mrf.mxu1 }
 0x4ac   :  { %v6083_v42 = vadd.f32 %v6082_v26, %v5602_v35  ;;  %v5606_v31 = vadd.f32 %v5605_v45, %v9525_v8 }
 0x4ad   :  { %v5607_v49 = vpop.f32.mrf.mxu1 }
 0x4ae   :  { %v5951_v18 = vadd.f32 %v5950_v32, %v5606_v31  ;;  %v5608_v29 = vadd.f32 %v5607_v49, %v9533_v17 }
 0x4af   :  { %v5611_v2 = vpop.f32.mrf.mxu1 }
 0x4b0   :  { %v6084_v12 = vadd.f32 %v6083_v42, %v5608_v29  ;;  %v5612_v0 = vadd.f32 %v5611_v2, %v9525_v8 }
 0x4b1   :  { %v5613_v56 = vpop.f32.mrf.mxu1 }
 0x4b2   :  { %v5952_v33 = vadd.f32 %v5951_v18, %v5612_v0  ;;  %v5614_v44 = vadd.f32 %v5613_v56, %v9533_v17 }
 0x4b3   :  { %v5617_v21 = vpop.f32.mrf.mxu1 }
 0x4b4   :  { %v6085_v22 = vadd.f32 %v6084_v12, %v5614_v44  ;;  %v5618_v40 = vadd.f32 %v5617_v21, %v9525_v8 }
 0x4b5   :  { %v5619_v62 = vpop.f32.mrf.mxu1 }
 0x4b6   :  { %v5953_v55 = vadd.f32 %v5952_v33, %v5618_v40  ;;  %v5620_v27 = vadd.f32 %v5619_v62, %v9533_v17 }
 0x4b7   :  { %v5623_v43 = vpop.f32.mrf.mxu1 }
 0x4b8   :  { %v6086_v20 = vadd.f32 %v6085_v22, %v5620_v27  ;;  %v5624_v38 = vadd.f32 %v5623_v43, %v9525_v8 }
 0x4b9   :  { %v5625_v52 = vpop.f32.mrf.mxu1 }
 0x4ba   :  { %v5954_v14 = vadd.f32 %v5953_v55, %v5624_v38  ;;  %v5626_v5 = vadd.f32 %v5625_v52, %v9533_v17 }
 0x4bb   :  { %v5629_v16 = vpop.f32.mrf.mxu1 }
 0x4bc   :  { %v6087_v24 = vadd.f32 %v6086_v20, %v5626_v5  ;;  %v5630_v7 = vadd.f32 %v5629_v16, %v9525_v8 }
 0x4bd   :  { %v5631_v10 = vpop.f32.mrf.mxu1 }
 0x4be   :  { %v5955_v36 = vadd.f32 %v5954_v14, %v5630_v7  ;;  %v5632_v6 = vadd.f32 %v5631_v10, %v9533_v17 }
 0x4bf   :  { %v5635_v47 = vpop.f32.mrf.mxu1 }
 0x4c0   :  { %v6088_v61 = vadd.f32 %v6087_v24, %v5632_v6  ;;  %v5636_v57 = vadd.f32 %v5635_v47, %v9525_v8 }
 0x4c1   :  { %v5637_v46 = vpop.f32.mrf.mxu1 }
 0x4c2   :  { %v5956_v48 = vadd.f32 %v5955_v36, %v5636_v57  ;;  %v5638_v54 = vadd.f32 %v5637_v46, %v9533_v17 }
 0x4c3   :  { %v5641_v19 = vpop.f32.mrf.mxu1 }
 0x4c4   :  { %v6089_v50 = vadd.f32 %v6088_v61, %v5638_v54  ;;  %v5642_v58 = vadd.f32 %v5641_v19, %v9525_v8 }
 0x4c5   :  { %v5643_v63 = vpop.f32.mrf.mxu1 }
 0x4c6   :  { %v5957_v28 = vadd.f32 %v5956_v48, %v5642_v58  ;;  %v5644_v39 = vadd.f32 %v5643_v63, %v9533_v17 }
 0x4c7   :  { %v5647_v37 = vpop.f32.mrf.mxu1 }
 0x4c8   :  { %v6090_v59 = vadd.f32 %v6089_v50, %v5644_v39  ;;  %v5648_v25 = vadd.f32 %v5647_v37, %v9525_v8 }
 0x4c9   :  { %v5649_v34 = vpop.f32.mrf.mxu1 }
 0x4ca   :  { %v5958_v41 = vadd.f32 %v5957_v28, %v5648_v25  ;;  %v5650_v60 = vadd.f32 %v5649_v34, %v9533_v17 }
 0x4cb   :  { %v5653_v1 = vpop.f32.mrf.mxu1 }
 0x4cc   :  { %v6091_v30 = vadd.f32 %v6090_v59, %v5650_v60  ;;  %v5654_v9 = vadd.f32 %v5653_v1, %v9525_v8 }
 0x4cd   :  { %v5655_v53 = vpop.f32.mrf.mxu1 }
 0x4ce   :  { %v5959_v4 = vadd.f32 %v5958_v41, %v5654_v9  ;;  %v5656_v11 = vadd.f32 %v5655_v53, %v9533_v17 }
 0x4cf   :  { %v5659_v3 = vpop.f32.mrf.mxu1 }
 0x4d0   :  { %v6092_v26 = vadd.f32 %v6091_v30, %v5656_v11  ;;  %v5660_v13 = vadd.f32 %v5659_v3, %v9525_v8 }
 0x4d1   :  { %v5661_v51 = vpop.f32.mrf.mxu1 }
 0x4d2   :  { %v5960_v32 = vadd.f32 %v5959_v4, %v5660_v13  ;;  %v5662_v35 = vadd.f32 %v5661_v51, %v9533_v17 }
 0x4d3   :  { %v5665_v45 = vpop.f32.mrf.mxu1 }
 0x4d4   :  { %v6093_v42 = vadd.f32 %v6092_v26, %v5662_v35  ;;  %v5666_v31 = vadd.f32 %v5665_v45, %v9525_v8 }
 0x4d5   :  { %v5667_v49 = vpop.f32.mrf.mxu1 }
 0x4d6   :  { %v5961_v18 = vadd.f32 %v5960_v32, %v5666_v31  ;;  %v5668_v29 = vadd.f32 %v5667_v49, %v9533_v17 }
 0x4d7   :  { %v5671_v2 = vpop.f32.mrf.mxu1 }
 0x4d8   :  { %v6094_v12 = vadd.f32 %v6093_v42, %v5668_v29  ;;  %v5672_v0 = vadd.f32 %v5671_v2, %v9525_v8 }
 0x4d9   :  { %v5673_v56 = vpop.f32.mrf.mxu1 }
 0x4da   :  { %v5962_v33 = vadd.f32 %v5961_v18, %v5672_v0  ;;  %v5674_v44 = vadd.f32 %v5673_v56, %v9533_v17 }
 0x4db   :  { %v5677_v21 = vpop.f32.mrf.mxu1 }
 0x4dc   :  { %v6095_v22 = vadd.f32 %v6094_v12, %v5674_v44  ;;  %v5678_v40 = vadd.f32 %v5677_v21, %v9525_v8 }
 0x4dd   :  { %v5679_v62 = vpop.f32.mrf.mxu1 }
 0x4de   :  { %v5963_v55 = vadd.f32 %v5962_v33, %v5678_v40  ;;  %v5680_v60 = vadd.f32 %v5679_v62, %v9533_v17 }
 0x4df   :  { %v5683_v27 = vpop.f32.mrf.mxu1 }
 0x4e0   :  { %v5684_v1 = vadd.f32 %v5683_v27, %v9525_v8  ;;  %v6096_v11 = vadd.f32 %v6095_v22, %v5680_v60 }
 0x4e1   :  { %v5685_v43 = vpop.f32.mrf.mxu1 }
 0x4e2   :  { %v5686_v9 = vadd.f32 %v5685_v43, %v9533_v17  ;;  %v5964_v3 = vadd.f32 %v5963_v55, %v5684_v1 }
 0x4e3   :  { %v5689_v20 = vpop.f32.mrf.mxu1 }
 0x4e4   :  { %v5690_v53 = vadd.f32 %v5689_v20, %v9525_v8  ;;  %v6097_v32 = vadd.f32 %v6096_v11, %v5686_v9 }
 0x4e5   :  { %v5691_v38 = vpop.f32.mrf.mxu1 }
 0x4e6   :  { %v5692_v26 = vadd.f32 %v5691_v38, %v9533_v17  ;;  %v5965_v35 = vadd.f32 %v5964_v3, %v5690_v53 }
 0x4e7   :  { %v5695_v52 = vpop.f32.mrf.mxu1 }
 0x4e8   :  { %v5696_v13 = vadd.f32 %v5695_v52, %v9525_v8  ;;  %v6098_v49 = vadd.f32 %v6097_v32, %v5692_v26 }
 0x4e9   :  { %v5697_v14 = vpop.f32.mrf.mxu1 }
 0x4ea   :  { %v5698_v45 = vadd.f32 %v5697_v14, %v9533_v17  ;;  %v5966_v18 = vadd.f32 %v5965_v35, %v5696_v13 }
 0x4eb   :  { %v5701_v5 = vpop.f32.mrf.mxu1 }
 0x4ec   :  { %v5702_v42 = vadd.f32 %v5701_v5, %v9525_v8  ;;  %v6099_v0 = vadd.f32 %v6098_v49, %v5698_v45 }
 0x4ed   :  { %v5703_v16 = vpop.f32.mrf.mxu1 }
 0x4ee   :  { %v5704_v29 = vadd.f32 %v5703_v16, %v9533_v17  ;;  %v5967_v56 = vadd.f32 %v5966_v18, %v5702_v42 }
 0x4ef   :  { %v5707_v24 = vpop.f32.mrf.mxu1 }
 0x4f0   :  { %v5708_v2 = vadd.f32 %v5707_v24, %v9525_v8  ;;  %v6100_v22 = vadd.f32 %v6099_v0, %v5704_v29 }
 0x4f1   :  { %v5709_v7 = vpop.f32.mrf.mxu1 }
 0x4f2   :  { %v5710_v33 = vadd.f32 %v5709_v7, %v9533_v17  ;;  %v5968_v40 = vadd.f32 %v5967_v56, %v5708_v2 }
 0x4f3   :  { %v5713_v10 = vpop.f32.mrf.mxu1 }
 0x4f4   :  { %v5714_v44 = vadd.f32 %v5713_v10, %v9525_v8  ;;  %v6101_v43 = vadd.f32 %v6100_v22, %v5710_v33 }
 0x4f5   :  { %v5715_v36 = vpop.f32.mrf.mxu1 }
 0x4f6   :  { %v5716_v62 = vadd.f32 %v5715_v36, %v9533_v17  ;;  %v5969_v20 = vadd.f32 %v5968_v40, %v5714_v44 }
 0x4f7   :  { %v5719_v6 = vpop.f32.mrf.mxu1 }
 0x4f8   :  { %v5720_v55 = vadd.f32 %v5719_v6, %v9525_v8  ;;  %v6102_v5 = vadd.f32 %v6101_v43, %v5716_v62 }
 0x4f9   :  { %v5721_v47 = vpop.f32.mrf.mxu1 }
 0x4fa   :  { %v5722_v38 = vadd.f32 %v5721_v47, %v9533_v17  ;;  %v5970_v16 = vadd.f32 %v5969_v20, %v5720_v55 }
 0x4fb   :  { %v5725_v61 = vpop.f32.mrf.mxu1 }
 0x4fc   :  { %v5726_v52 = vadd.f32 %v5725_v61, %v9525_v8  ;;  %v6103_v60 = vadd.f32 %v6102_v5, %v5722_v38 }
 0x4fd   :  { %v5727_v57 = vpop.f32.mrf.mxu1 }
 0x4fe   :  { %v5728_v24 = vadd.f32 %v5727_v57, %v9533_v17  ;;  %v5971_v1 = vadd.f32 %v5970_v16, %v5726_v52 }
 0x4ff   :  { %v5731_v46 = vpop.f32.mrf.mxu1 }
 0x500   :  { %v5732_v7 = vadd.f32 %v5731_v46, %v9525_v8  ;;  %v6104_v53 = vadd.f32 %v6103_v60, %v5728_v24 }
 0x501   :  { %v5733_v48 = vpop.f32.mrf.mxu1 }
 0x502   :  { %v5734_v36 = vadd.f32 %v5733_v48, %v9533_v17  ;;  %v5972_v11 = vadd.f32 %v5971_v1, %v5732_v7 }
 0x503   :  { %v5737_v54 = vpop.f32.mrf.mxu1 }
 0x504   :  { %v5738_v6 = vadd.f32 %v5737_v54, %v9525_v8  ;;  %v6105_v26 = vadd.f32 %v6104_v53, %v5734_v36 }
 0x505   :  { %v5739_v19 = vpop.f32.mrf.mxu1 }
 0x506   :  { %v5740_v47 = vadd.f32 %v5739_v19, %v9533_v17  ;;  %v5973_v13 = vadd.f32 %v5972_v11, %v5738_v6 }
 0x507   :  { %v5743_v50 = vpop.f32.mrf.mxu1 }
 0x508   :  { %v5744_v61 = vadd.f32 %v5743_v50, %v9525_v8  ;;  %v6106_v35 = vadd.f32 %v6105_v26, %v5740_v47 }
 0x509   :  { %v5745_v58 = vpop.f32.mrf.mxu1 }
 0x50a   :  { %v5746_v57 = vadd.f32 %v5745_v58, %v9533_v17  ;;  %v5974_v45 = vadd.f32 %v5973_v13, %v5744_v61 }
 0x50b   :  { %v5749_v63 = vpop.f32.mrf.mxu1 }
 0x50c   :  { %v5750_v46 = vadd.f32 %v5749_v63, %v9525_v8  ;;  %v6107_v19 = vadd.f32 %v6106_v35, %v5746_v57 }
 0x50d   :  { %v9966_v28 = vpop.f32.mrf.mxu1 }
 0x50e   :  { %v5752_v48 = vadd.f32 %v9966_v28, %v9533_v17  ;;  %v5975_v49 = vadd.f32 %v5974_v45, %v5750_v46 }
 0x50f   :  { %v9968_v39 = vpop.f32.mrf.mxu1 }
 0x510   :  { %v5756_v54 = vadd.f32 %v9968_v39, %v9525_v8  ;;  %v6108_v63 = vadd.f32 %v6107_v19, %v5752_v48 }
 0x511   :  { %v9970_v37 = vpop.f32.mrf.mxu1 }
 0x512   :  { %v5758_v50 = vadd.f32 %v9970_v37, %v9533_v17  ;;  %v5976_v29 = vadd.f32 %v5975_v49, %v5756_v54 }
 0x513   :  { %v9972_v59 = vpop.f32.mrf.mxu1 }
 0x514   :  { %v5762_v58 = vadd.f32 %v9972_v59, %v9525_v8  ;;  %v6109_v39 = vadd.f32 %v6108_v63, %v5758_v50 }
 0x515   :  { %v9974_v25 = vpop.f32.mrf.mxu1 }
 0x516   :  { %v5764_v2 = vadd.f32 %v9974_v25, %v9533_v17  ;;  %v5977_v56 = vadd.f32 %v5976_v29, %v5762_v58 }
 0x517   :  { %v9976_v34 = vpop.f32.mrf.mxu1 }
 0x518   :  { %v5768_v28 = vadd.f32 %v9976_v34, %v9525_v8  ;;  %v6110_v59 = vadd.f32 %v6109_v39, %v5764_v2 }
 0x519   :  { %v9978_v41 = vpop.f32.mrf.mxu1 }
 0x51a   :  { %v5770_v33 = vadd.f32 %v9978_v41, %v9533_v17  ;;  %v5978_v22 = vadd.f32 %v5977_v56, %v5768_v28 }
 0x51b   :  { %v9982_v30 = vpop.f32.mrf.mxu1 }
 0x51c   :  { %v5774_v37 = vadd.f32 %v9982_v30, %v9525_v8  ;;  %v6111_v34 = vadd.f32 %v6110_v59, %v5770_v33 }
 0x51d   :  { %v9986_v4 = vpop.f32.mrf.mxu1 }
 0x51e   :  { %v5776_v40 = vadd.f32 %v9986_v4, %v9533_v17  ;;  %v5979_v55 = vadd.f32 %v5978_v22, %v5774_v37 }
 0x51f   :  { %v9990_v51 = vpop.f32.mrf.mxu1 }
 0x520   :  { %v5780_v25 = vadd.f32 %v9990_v51, %v9525_v8  ;;  %v6112_v30 = vadd.f32 %v6111_v34, %v5776_v40 }
 0x521   :  { %v9994_v31 = vpop.f32.mrf.mxu1 }
 0x522   :  { %v5782_v43 = vadd.f32 %v9994_v31, %v9533_v17  ;;  %v5980_v38 = vadd.f32 %v5979_v55, %v5780_v25 }
 0x523   :  { %v9998_v12 = vpop.f32.mrf.mxu1 }
 0x524   :  { %v5786_v41 = vadd.f32 %v9998_v12, %v9525_v8  ;;  %v6113_v16 = vadd.f32 %v6112_v30, %v5782_v43 }
 0x525   :  { %v10002_v21 = vpop.f32.mrf.mxu1 }
 0x526   :  { %v5788_v52 = vadd.f32 %v10002_v21, %v9533_v17  ;;  %v5981_v51 = vadd.f32 %v5980_v38, %v5786_v41 }
 0x527   :  { %v5791_v27 = vpop.f32.mrf.mxu1 }
 0x528   :  { %v5792_v4 = vadd.f32 %v5791_v27, %v9525_v8  ;;  %v6114_v31 = vadd.f32 %v6113_v16, %v5788_v52 }
 0x529   :  { %v5793_v14 = vpop.f32.mrf.mxu1 }
 0x52a   :  { %v5794_v24 = vadd.f32 %v5793_v14, %v9533_v17  ;;  %v5982_v1 = vadd.f32 %v5981_v51, %v5792_v4 }
 0x52b   :  { %v5797_v10 = vpop.f32.mrf.mxu1 }
 0x52c   :  { %v5798_v7 = vadd.f32 %v5797_v10, %v9525_v8  ;;  %v6115_v53 = vadd.f32 %v6114_v31, %v5794_v24 }
 0x52d   :  { %v5799_v9 = vpop.f32.mrf.mxu1 }
 0x52e   :  { %v5800_v12 = vadd.f32 %v5799_v9, %v9533_v17  ;;  %v5983_v11 = vadd.f32 %v5982_v1, %v5798_v7 }
 0x52f   :  { %v5803_v3 = vpop.f32.mrf.mxu1 }
 0x530   :  { %v5804_v36 = vadd.f32 %v5803_v3, %v9525_v8  ;;  %v6116_v61 = vadd.f32 %v6115_v53, %v5800_v12 }
 0x531   :  { %v5805_v32 = vpop.f32.mrf.mxu1 }
 0x532   :  { %v5806_v21 = vadd.f32 %v5805_v32, %v9533_v17  ;;  %v5984_v26 = vadd.f32 %v5983_v11, %v5804_v36 }
 0x533   :  { %v5809_v42 = vpop.f32.mrf.mxu1 }
 0x534   :  { %v5810_v27 = vadd.f32 %v5809_v42, %v9525_v8  ;;  %v6117_v57 = vadd.f32 %v6116_v61, %v5806_v21 }
 0x535   :  { %v5811_v18 = vpop.f32.mrf.mxu1 }
 0x536   :  { %v5812_v14 = vadd.f32 %v5811_v18, %v9533_v17  ;;  %v5985_v46 = vadd.f32 %v5984_v26, %v5810_v27 }
 0x537   :  { %v5815_v0 = vpop.f32.mrf.mxu1 }
 0x538   :  { %v5816_v10 = vadd.f32 %v5815_v0, %v9525_v8  ;;  %v6118_v45 = vadd.f32 %v6117_v57, %v5812_v14 }
 0x539   :  { %v5817_v44 = vpop.f32.mrf.mxu1 }
 0x53a   :  { %v5818_v9 = vadd.f32 %v5817_v44, %v9533_v17  ;;  %v5986_v48 = vadd.f32 %v5985_v46, %v5816_v10 }
 0x53b   :  { %v5821_v62 = vpop.f32.mrf.mxu1 }
 0x53c   :  { %v5822_v3 = vadd.f32 %v5821_v62, %v9525_v8  ;;  %v6119_v19 = vadd.f32 %v6118_v45, %v5818_v9 }
 0x53d   :  { %v5823_v20 = vpop.f32.mrf.mxu1 }
 0x53e   :  { %v5824_v32 = vadd.f32 %v5823_v20, %v9533_v17  ;;  %v5987_v49 = vadd.f32 %v5986_v48, %v5822_v3 }
 0x53f   :  { %v5827_v5 = vpop.f32.mrf.mxu1 }
 0x540   :  { %v5828_v54 = vadd.f32 %v5827_v5, %v9525_v8  ;;  %v6120_v63 = vadd.f32 %v6119_v19, %v5824_v32 }
 0x541   :  { %v5829_v60 = vpop.f32.mrf.mxu1 }
 0x542   :  { %v5830_v50 = vadd.f32 %v5829_v60, %v9533_v17  ;;  %v5988_v29 = vadd.f32 %v5987_v49, %v5828_v54 }
 0x543   :  { %v5833_v6 = vpop.f32.mrf.mxu1 }
 0x544   :  { %v5834_v58 = vadd.f32 %v5833_v6, %v9525_v8  ;;  %v6121_v39 = vadd.f32 %v6120_v63, %v5830_v50 }
 0x545   :  { %v5835_v47 = vpop.f32.mrf.mxu1 }
 0x546   :  { %v5836_v2 = vadd.f32 %v5835_v47, %v9533_v17  ;;  %v5989_v56 = vadd.f32 %v5988_v29, %v5834_v58  ;;  %v7755_v47 = vmov 1966171168  }
 0x547   :  { %v5839_v13 = vpop.f32.mrf.mxu1  ;;  %v6141_v61 = vunpack.c.l.s4 %v7755_v47 }
 0x548   :  { %v5840_v28 = vadd.f32 %v5839_v13, %v9525_v8  ;;  %v6122_v59 = vadd.f32 %v6121_v39, %v5836_v2 }
 0x549   :  { %v5841_v35 = vpop.f32.mrf.mxu1 }
 0x54a   :  { %v5842_v33 = vadd.f32 %v5841_v35, %v9533_v17  ;;  %v5990_v22 = vadd.f32 %v5989_v56, %v5840_v28 }
 0x54b   :  { %v5845_v42 = vpop.f32.mrf.mxu1 }
 0x54c   :  { %v5846_v37 = vadd.f32 %v5845_v42, %v9525_v8  ;;  %v6123_v34 = vadd.f32 %v6122_v59, %v5842_v33 }
 0x54d   :  { %v5847_v18 = vpop.f32.mrf.mxu1 }
 0x54e   :  { %v5848_v40 = vadd.f32 %v5847_v18, %v9533_v17  ;;  %v5991_v55 = vadd.f32 %v5990_v22, %v5846_v37 }
 0x54f   :  { %v5851_v0 = vpop.f32.mrf.mxu1 }
 0x550   :  { %v5852_v25 = vadd.f32 %v5851_v0, %v9525_v8  ;;  %v6124_v30 = vadd.f32 %v6123_v34, %v5848_v40 }
 0x551   :  { %v5853_v44 = vpop.f32.mrf.mxu1 }
 0x552   :  { %v5854_v43 = vadd.f32 %v5853_v44, %v9533_v17  ;;  %v5992_v38 = vadd.f32 %v5991_v55, %v5852_v25 }
 0x553   :  { %v5857_v62 = vpop.f32.mrf.mxu1 }
 0x554   :  { %v5858_v41 = vadd.f32 %v5857_v62, %v9525_v8  ;;  %v6125_v5 = vadd.f32 %v6124_v30, %v5854_v43 }
 0x555   :  { %v5859_v20 = vpop.f32.mrf.mxu1 }
 0x556   :  { %v5860_v52 = vadd.f32 %v5859_v20, %v9533_v17  ;;  %v5993_v16 = vadd.f32 %v5992_v38, %v5858_v41 }
 0x557   :  { %v5863_v4 = vpop.f32.mrf.mxu1 }
 0x558   :  { %v5864_v51 = vadd.f32 %v5863_v4, %v9525_v8  ;;  %v6126_v7 = vadd.f32 %v6125_v5, %v5860_v52  ;;  %v6142_v8 = vunpack.c.0.s8 %v6141_v61 }
 0x559   :  { %v5865_v24 = vpop.f32.mrf.mxu1 }
 0x55a   :  { %v5994_v60 = vadd.f32 %v5993_v16, %v5864_v51  ;;  %v5866_v31 = vadd.f32 %v5865_v24, %v9533_v17  ;;  %v6145_v17 = vsub.s32 %v6142_v8, %v9512_v15 }
 0x55c   :  { %v5995_v1 = vrot.slane %v5994_v60, 4  ;;  %v6127_v12 = vadd.f32 %v6126_v7, %v5866_v31 }
 0x55e   :  { %v5996_v36 = vadd.f32 %v5995_v1, %v5994_v60  ;;  %v6128_v6 = vrot.slane %v6127_v12, 4 }
 0x560   :  { %v5997_v53 = vrot.slane %v5996_v36, 2  ;;  %v6129_v11 = vadd.f32 %v6128_v6, %v6127_v12 }
 0x562   :  { %v5998_v21 = vadd.f32 %v5997_v53, %v5996_v36  ;;  %v6130_v27 = vrot.slane %v6129_v11, 2 }
 0x564   :  { %v5999_v26 = vrot.slane %v5998_v21, 1  ;;  %v6131_v14 = vadd.f32 %v6130_v27, %v6129_v11 }
 0x566   :  { %v6000_v10 = vadd.f32 %v5999_v26, %v5998_v21  ;;  %v6132_v13 = vrot.slane %v6131_v14, 1 }
 0x568   :  { %v6133_v57 = vadd.f32 %v6132_v13, %v6131_v14  ;;  %v6135_v46 = vmul.f32 0.0009765625, %v6000_v10 }
 0x56a   :  { %v6136_v9 = vmul.f32 0.0009765625, %v6133_v57 }
 0x56c   :  { %v6139_v3 = vcombine.low %v6135_v46, %v6136_v9 }
 0x56e   :  { %v6146_v35 = vrot.slane %v6139_v3, %v6145_v17 }
 0x570   :  { %v6153_v45 = vrot.slane %v6146_v35, %v6145_v17 }
 0x572   :  { %6159 = vst.msk [vmem:[#allocation2] sm:$0x3] %vm6157_vm2, %v6153_v45 }
 0x573   :  { %7743 = shalt.err (!%p7740_p4)
}
 0x574   :  { %6169 = dma.vmem_to_hbm [thread:$0]  %s6167_s26, 32, %s10082_s9, [#allocation3]  }
 0x575   :  { %7752 = dma.done.wait [#allocation3], 32  }
 0x576   :  { %7753 = vsyncadd [#allocation3], 4294967264 }
 0x577   :  { %6173 = vsyncpa [#allocation3], 1 }

</bundles_post_ra>
